<compile_context>
chip_gen: v5e
topology: v5e:2x2
jax: 0.10.0
libtpu: 0.0.40
codegen_flags: <defaults>
</compile_context>

<pallas_src>
import numpy as np
import jax
import jax.numpy as jnp
from jax import lax
from jax.experimental import pallas as pl
from jax.experimental.pallas import tpu as pltpu

LEAKY_SLOPE = 0.01    # nn.LeakyReLU() default negative_slope
BN_EPS = 1e-5         # nn.BatchNorm2d default eps
CPAD = 128            # lane-dense channel padding for weights / activations
PAD_T = 1             # spatial zero-pad rows (top & bottom)
PAD_L = 2             # left col pad = 2 keeps bf16 sublane stores pair-aligned
PAD_R = 1             # right col pad


def get_encoder_stride_sizes(size, n_layers):
    # TODO(synk): original helper not provided in the source; assume the common
    # VAE-encoder convention "stride 2 while spatial > 1, then stride 1".
    strides = []
    for _ in range(n_layers):
        if size > 1:
            strides.append(2)
            size = (size - 1) // 2 + 1     # k=3, pad=1 conv output size
        else:
            strides.append(1)
    return strides


def build_encoder_config(image_size, hidden_dims, batch):
    C, H, W = image_size
    strides = get_encoder_stride_sizes(H, len(hidden_dims))
    cfg = []
    cin = C
    for i, h in enumerate(hidden_dims):
        assert h <= CPAD and cin <= CPAD
        s = strides[i]
        ho = (H - 1) // s + 1
        wo = (W - 1) // s + 1
        cfg.append(dict(
            stride=s, cin=cin, cout=h,
            h_in=H, w_in=W, h_out=ho, w_out=wo,
            cin_store=(cin if i == 0 else CPAD),
            hp_in=H + 2 * PAD_T, wp_in=W + PAD_L + PAD_R,
            hp_out=ho + 2 * PAD_T, wp_out=wo + PAD_L + PAD_R,
            batch=batch,
        ))
        H, W, cin = ho, wo, h
    return cfg


def make_encoder_kernel(cfg):
    n_layers = len(cfg)
    N = cfg[0]["batch"]

    def kernel(*refs):
        x_ref = refs[0]
        lrefs = refs[1:1 + 3 * n_layers]          # (S, W, prm) per layer
        o_ref = refs[1 + 3 * n_layers]
        scratch = refs[2 + 3 * n_layers:]         # padded bf16 activations

        # Zero the intermediate activation scratches: their untouched borders
        # are exactly the zero padding of the next layer's convolution.
        for a in scratch:
            a[...] = jnp.zeros(a.shape, a.dtype)

        in_ref = x_ref
        for l in range(n_layers):
            c = cfg[l]
            s_ref, w_ref, p_ref = lrefs[3 * l:3 * l + 3]
            last = (l == n_layers - 1)
            out_ref = o_ref if last else scratch[l]

            stride = c["stride"]
            Ho, Wo = c["h_out"], c["w_out"]
            Hp_in, Hp_out = c["hp_in"], c["hp_out"]
            M = N * Ho * Wo

            bias = p_ref[0:1, :]                          # (1, CPAD) f32
            gamma = p_ref[1:2, :]
            beta = p_ref[2:3, :]
            # hoist the tiny column-selection matrices (3, Wo, Wp_in) bf16
            S = [s_ref[k] for k in range(3)]

            # ---- pass 1: conv rows + one-pass BN statistics -------------
            def make_body(n):
                def body(ho, carry):
                    ssum, ssq = carry
                    acc = jnp.zeros((Wo, CPAD), jnp.float32)
                    for kh in range(3):
                        r_in = n * Hp_in + ho * stride + kh
                        row = in_ref[r_in]                # (Wp_in, Cin) bf16
                        for kw in range(3):
                            # column subsample via 0/1 selection matmul (exact)
                            sel = jnp.dot(S[kw], row,
                                          preferred_element_type=jnp.float32)
                            acc = acc + jnp.dot(
                                sel.astype(jnp.bfloat16),
                                w_ref[kh * 3 + kw],
                                preferred_element_type=jnp.float32)
                    acc = acc + bias                      # conv bias (f32)
                    ssum = ssum + jnp.sum(acc, axis=0, keepdims=True)
                    ssq = ssq + jnp.sum(acc * acc, axis=0, keepdims=True)
                    if last:
                        out_ref[n * Ho + ho] = acc
                    else:
                        out_ref[n * Hp_out + PAD_T + ho,
                                pl.ds(PAD_L, Wo), :] = acc.astype(jnp.bfloat16)
                    return ssum, ssq
                return body

            carry = (jnp.zeros((1, CPAD), jnp.float32),
                     jnp.zeros((1, CPAD), jnp.float32))
            for n in range(N):
                carry = lax.fori_loop(0, Ho, make_body(n), carry)
            ssum, ssq = carry

            # ---- per-channel train-mode BN parameters (f32) -------------
            inv_m = 1.0 / float(M)
            mean = ssum * inv_m
            var = jnp.maximum(ssq * inv_m - mean * mean, 0.0)
            scale = lax.rsqrt(var + BN_EPS) * gamma       # (inv * gamma), hoisted
            shift = beta - mean * scale
            scale3 = scale.reshape(1, 1, CPAD)
            shift3 = shift.reshape(1, 1, CPAD)

            # ---- pass 2: fused affine + LeakyReLU ------------------------
            if last:
                y = out_ref[...] * scale3 + shift3
                out_ref[...] = jnp.where(y > 0, y, LEAKY_SLOPE * y)
            else:
                for n in range(N):
                    blk = out_ref[pl.ds(n * Hp_out + PAD_T, Ho),
                                  pl.ds(PAD_L, Wo), :]
                    y = blk.astype(jnp.float32) * scale3 + shift3
                    y = jnp.where(y > 0, y, LEAKY_SLOPE * y)
                    out_ref[pl.ds(n * Hp_out + PAD_T, Ho),
                            pl.ds(PAD_L, Wo), :] = y.astype(jnp.bfloat16)

            in_ref = out_ref

    return kernel


def make_encoder_call(cfg):
    n_layers = len(cfg)
    N = cfg[0]["batch"]
    last = cfg[-1]
    vspec = pl.BlockSpec(memory_space=pltpu.MemorySpace.VMEM)
    scratch_shapes = [
        pltpu.VMEM((N * c["hp_out"], c["wp_out"], CPAD), jnp.bfloat16)
        for c in cfg[:-1]
    ]
    return pl.pallas_call(
        make_encoder_kernel(cfg),
        out_shape=jax.ShapeDtypeStruct(
            (N * last["h_out"], last["w_out"], CPAD), jnp.float32),
        in_specs=[vspec] * (1 + 3 * n_layers),
        out_specs=vspec,
        scratch_shapes=scratch_shapes,
        compiler_params=pltpu.CompilerParams(
            vmem_limit_bytes=32 * 1024 * 1024),
    )


def init_encoder_params(key, cfg):
    """Synthetic params; returns kernel-layout params + reference params."""
    kparams, rparams = [], []
    for c in cfg:
        key, k1, k2, k3, k4 = jax.random.split(key, 5)
        cin, cout, s = c["cin"], c["cout"], c["stride"]
        # (kh, kw, cin, cout) layout.  NOTE: real PyTorch Conv2d weights are
        # (cout, cin, kh, kw) and would need a transpose before packing.
        w4 = jax.random.normal(k1, (3, 3, cin, cout), jnp.float32) * 0.1
        b = jax.random.normal(k2, (cout,), jnp.float32) * 0.05
        gamma = 1.0 + 0.1 * jax.random.normal(k3, (cout,), jnp.float32)
        beta = 0.1 * jax.random.normal(k4, (cout,), jnp.float32)

        # kernel weight layout: (9, cin_store, CPAD) bf16, tap = kh*3 + kw
        wk = jnp.pad(w4, ((0, 0), (0, 0),
                          (0, c["cin_store"] - cin), (0, CPAD - cout)))
        wk = wk.reshape(9, c["cin_store"], CPAD).astype(jnp.bfloat16)
        prm = jnp.stack([jnp.pad(b, (0, CPAD - cout)),
                         jnp.pad(gamma, (0, CPAD - cout)),
                         jnp.pad(beta, (0, CPAD - cout))]).astype(jnp.float32)

        # 0/1 column-selection matrices: S[kw, wo, s*wo + kw + (PAD_L-1)] = 1
        wo, wp = c["w_out"], c["wp_in"]
        cols = s * jnp.arange(wo)[:, None] + jnp.arange(3)[None, :] + (PAD_L - 1)
        S = (jnp.arange(wp)[None, None, :] ==
             cols.T[:, :, None]).astype(jnp.bfloat16)        # (3, wo, wp)

        kparams += [S, wk, prm]
        rparams.append(dict(w=w4, b=b, gamma=gamma, beta=beta, stride=s))
    return kparams, rparams


def encoder_forward(x_nchw, cfg, kparams, encoder_call):
    N = x_nchw.shape[0]
    c0, cl = cfg[0], cfg[-1]
    x = jnp.transpose(x_nchw, (0, 2, 3, 1)).astype(jnp.float32)   # NCHW -> NHWC
    xp = jnp.pad(x, ((0, 0), (PAD_T, PAD_T), (PAD_L, PAD_R), (0, 0)))
    xp = xp.reshape(N * c0["hp_in"], c0["wp_in"], c0["cin"]).astype(jnp.bfloat16)
    out = encoder_call(xp, *kparams)                              # (N*Ho, Wo, 128)
    out = out.reshape(N, cl["h_out"], cl["w_out"], CPAD)[..., :cl["cout"]]
    return jnp.transpose(out, (0, 3, 1, 2))                       # back to NCHW


def encoder_reference(x_nchw, rparams):
    """Pure-JAX f32 reference (train-mode BN, batch statistics)."""
    x = jnp.transpose(x_nchw, (0, 2, 3, 1)).astype(jnp.float32)
    for p in rparams:
        s = p["stride"]
        y = lax.conv_general_dilated(
            x, p["w"], window_strides=(s, s), padding=((1, 1), (1, 1)),
            dimension_numbers=("NHWC", "HWIO", "NHWC")) + p["b"]
        mean = jnp.mean(y, axis=(0, 1, 2), keepdims=True)
        var = jnp.mean((y - mean) ** 2, axis=(0, 1, 2), keepdims=True)
        y = (y - mean) * lax.rsqrt(var + BN_EPS) * p["gamma"] + p["beta"]
        x = jnp.where(y > 0, y, LEAKY_SLOPE * y)
    return jnp.transpose(x, (0, 3, 1, 2))
    # TODO(synk): eval-mode BN (running_mean/var) is not modeled (forward-only).


if __name__ == "__main__":
    image_size = (4, 16, 16)          # (C, H, W)
    hidden_dims = [8, 16, 32]
    batch = 2

    cfg = build_encoder_config(image_size, hidden_dims, batch)
    key = jax.random.PRNGKey(0)
    kx, kp = jax.random.split(key)
    x = jax.random.normal(kx, (batch,) + image_size, jnp.float32)
    kparams, rparams = init_encoder_params(kp, cfg)

    encoder_call = make_encoder_call(cfg)
    fwd = jax.jit(lambda inp: encoder_forward(inp, cfg, kparams, encoder_call))
    out = jax.block_until_ready(fwd(x))

    # 16 -> 8 -> 4 -> 2 spatial with strides (2, 2, 2)
    assert out.shape == (batch, hidden_dims[-1], 2, 2), out.shape
    assert out.dtype == jnp.float32

    # loose tolerance: kernel uses bf16 matmul operands (f32 accumulation)
    ref = encoder_reference(x, rparams)
    np.testing.assert_allclose(np.asarray(out), np.asarray(ref),
                               rtol=0.25, atol=0.25)
    print("KERNEL_OK")
</pallas_src>

<mosaic_0001>
module attributes {stable_mosaic.version = 11 : i64} {
  func.func @kernel(%arg0: memref<36x19x4xbf16, #tpu.memory_space<vmem>>, %arg1: memref<3x8x19xbf16, #tpu.memory_space<vmem>>, %arg2: memref<9x4x128xbf16, #tpu.memory_space<vmem>>, %arg3: memref<3x128xf32, #tpu.memory_space<vmem>>, %arg4: memref<3x4x11xbf16, #tpu.memory_space<vmem>>, %arg5: memref<9x128x128xbf16, #tpu.memory_space<vmem>>, %arg6: memref<3x128xf32, #tpu.memory_space<vmem>>, %arg7: memref<3x2x7xbf16, #tpu.memory_space<vmem>>, %arg8: memref<9x128x128xbf16, #tpu.memory_space<vmem>>, %arg9: memref<3x128xf32, #tpu.memory_space<vmem>>, %arg10: memref<4x2x128xf32, #tpu.memory_space<vmem>>, %arg11: memref<20x11x128xbf16, #tpu.memory_space<vmem>>, %arg12: memref<12x7x128xbf16, #tpu.memory_space<vmem>>) attributes {dimension_semantics = [], scalar_prefetch = 0 : i64, scratch_operands = 2 : i64, tpu.core_type = #tpu.core_type<tc>} {
    %cst = arith.constant 0.000000e+00 : bf16
    %0 = vector.broadcast %cst : bf16 to vector<20x11x128xbf16>
    %c0 = arith.constant 0 : index
    %c0_0 = arith.constant 0 : index
    %c0_1 = arith.constant 0 : index
    %1 = vector.load %arg11[%c0, %c0_0, %c0_1] : memref<20x11x128xbf16, #tpu.memory_space<vmem>>, vector<20x11x128xbf16>
    tpu.vector_store %arg11[%c0, %c0_0, %c0_1], %0 {strides = array<i32>} : memref<20x11x128xbf16, #tpu.memory_space<vmem>>, vector<20x11x128xbf16>,
    %cst_2 = arith.constant 0.000000e+00 : bf16
    %2 = vector.broadcast %cst_2 : bf16 to vector<12x7x128xbf16>
    %c0_3 = arith.constant 0 : index
    %c0_4 = arith.constant 0 : index
    %c0_5 = arith.constant 0 : index
    %3 = vector.load %arg12[%c0_3, %c0_4, %c0_5] : memref<12x7x128xbf16, #tpu.memory_space<vmem>>, vector<12x7x128xbf16>
    tpu.vector_store %arg12[%c0_3, %c0_4, %c0_5], %2 {strides = array<i32>} : memref<12x7x128xbf16, #tpu.memory_space<vmem>>, vector<12x7x128xbf16>,
    %c0_6 = arith.constant 0 : index
    %c0_7 = arith.constant 0 : index
    %4 = vector.load %arg3[%c0_6, %c0_7] : memref<3x128xf32, #tpu.memory_space<vmem>>, vector<1x128xf32>
    %c1 = arith.constant 1 : index
    %c0_8 = arith.constant 0 : index
    %5 = vector.load %arg3[%c1, %c0_8] : memref<3x128xf32, #tpu.memory_space<vmem>>, vector<1x128xf32>
    %c2 = arith.constant 2 : index
    %c0_9 = arith.constant 0 : index
    %6 = vector.load %arg3[%c2, %c0_9] : memref<3x128xf32, #tpu.memory_space<vmem>>, vector<1x128xf32>
    %c0_10 = arith.constant 0 : index
    %c0_11 = arith.constant 0 : index
    %c0_12 = arith.constant 0 : index
    %7 = vector.load %arg1[%c0_10, %c0_11, %c0_12] : memref<3x8x19xbf16, #tpu.memory_space<vmem>>, vector<1x8x19xbf16>
    %8 = vector.shape_cast %7 : vector<1x8x19xbf16> to vector<8x19xbf16>
    %c1_13 = arith.constant 1 : index
    %c0_14 = arith.constant 0 : index
    %c0_15 = arith.constant 0 : index
    %9 = vector.load %arg1[%c1_13, %c0_14, %c0_15] : memref<3x8x19xbf16, #tpu.memory_space<vmem>>, vector<1x8x19xbf16>
    %10 = vector.shape_cast %9 : vector<1x8x19xbf16> to vector<8x19xbf16>
    %c2_16 = arith.constant 2 : index
    %c0_17 = arith.constant 0 : index
    %c0_18 = arith.constant 0 : index
    %11 = vector.load %arg1[%c2_16, %c0_17, %c0_18] : memref<3x8x19xbf16, #tpu.memory_space<vmem>>, vector<1x8x19xbf16>
    %12 = vector.shape_cast %11 : vector<1x8x19xbf16> to vector<8x19xbf16>
    %cst_19 = arith.constant 0.000000e+00 : f32
    %13 = vector.broadcast %cst_19 : f32 to vector<1x128xf32>
    %cst_20 = arith.constant 0.000000e+00 : f32
    %14 = vector.broadcast %cst_20 : f32 to vector<1x128xf32>
    %c0_i32 = arith.constant 0 : i32
    %c8_i32 = arith.constant 8 : i32
    %15 = arith.addi %c0_i32, %c8_i32 : i32
    %c1_i32 = arith.constant 1 : i32
    %16:2 = scf.for %arg13 = %c0_i32 to %15 step %c1_i32 iter_args(%arg14 = %13, %arg15 = %14) -> (vector<1x128xf32>, vector<1x128xf32>)  : i32 {
      %cst_124 = arith.constant 0.000000e+00 : f32
      %160 = vector.broadcast %cst_124 : f32 to vector<8x128xf32>
      %c2_i32_125 = arith.constant 2 : i32
      %161 = arith.muli %arg13, %c2_i32_125 : i32
      %c0_i32_126 = arith.constant 0 : i32
      %162 = arith.addi %c0_i32_126, %161 : i32
      %c0_i32_127 = arith.constant 0 : i32
      %163 = arith.addi %162, %c0_i32_127 : i32
      %164 = arith.index_cast %163 : i32 to index
      %c0_128 = arith.constant 0 : index
      %c0_129 = arith.constant 0 : index
      %165 = vector.load %arg0[%164, %c0_128, %c0_129] : memref<36x19x4xbf16, #tpu.memory_space<vmem>>, vector<1x19x4xbf16>
      %166 = vector.shape_cast %165 : vector<1x19x4xbf16> to vector<19x4xbf16>
      %cst_130 = arith.constant dense<0.000000e+00> : vector<8x4xf32>
      %167 = tpu.matmul %8, %166, %cst_130 {dimension_numbers = #tpu.dot_dimension_numbers<[1], [0], [0], [1], [0, 0, 1, 1], [], []>} : vector<8x19xbf16>, vector<19x4xbf16>, vector<8x4xf32> -> vector<8x4xf32>
      %168 = arith.truncf %167 : vector<8x4xf32> to vector<8x4xbf16>
      %c0_131 = arith.constant 0 : index
      %c0_132 = arith.constant 0 : index
      %c0_133 = arith.constant 0 : index
      %169 = vector.load %arg2[%c0_131, %c0_132, %c0_133] : memref<9x4x128xbf16, #tpu.memory_space<vmem>>, vector<1x4x128xbf16>
      %170 = vector.shape_cast %169 : vector<1x4x128xbf16> to vector<4x128xbf16>
      %cst_134 = arith.constant dense<0.000000e+00> : vector<8x128xf32>
      %171 = tpu.matmul %168, %170, %cst_134 {dimension_numbers = #tpu.dot_dimension_numbers<[1], [0], [0], [1], [0, 0, 1, 1], [], []>} : vector<8x4xbf16>, vector<4x128xbf16>, vector<8x128xf32> -> vector<8x128xf32>
      %172 = arith.addf %160, %171 : vector<8x128xf32>
      %cst_135 = arith.constant dense<0.000000e+00> : vector<8x4xf32>
      %173 = tpu.matmul %10, %166, %cst_135 {dimension_numbers = #tpu.dot_dimension_numbers<[1], [0], [0], [1], [0, 0, 1, 1], [], []>} : vector<8x19xbf16>, vector<19x4xbf16>, vector<8x4xf32> -> vector<8x4xf32>
      %174 = arith.truncf %173 : vector<8x4xf32> to vector<8x4xbf16>
      %c1_136 = arith.constant 1 : index
      %c0_137 = arith.constant 0 : index
      %c0_138 = arith.constant 0 : index
      %175 = vector.load %arg2[%c1_136, %c0_137, %c0_138] : memref<9x4x128xbf16, #tpu.memory_space<vmem>>, vector<1x4x128xbf16>
      %176 = vector.shape_cast %175 : vector<1x4x128xbf16> to vector<4x128xbf16>
      %cst_139 = arith.constant dense<0.000000e+00> : vector<8x128xf32>
      %177 = tpu.matmul %174, %176, %cst_139 {dimension_numbers = #tpu.dot_dimension_numbers<[1], [0], [0], [1], [0, 0, 1, 1], [], []>} : vector<8x4xbf16>, vector<4x128xbf16>, vector<8x128xf32> -> vector<8x128xf32>
      %178 = arith.addf %172, %177 : vector<8x128xf32>
      %cst_140 = arith.constant dense<0.000000e+00> : vector<8x4xf32>
      %179 = tpu.matmul %12, %166, %cst_140 {dimension_numbers = #tpu.dot_dimension_numbers<[1], [0], [0], [1], [0, 0, 1, 1], [], []>} : vector<8x19xbf16>, vector<19x4xbf16>, vector<8x4xf32> -> vector<8x4xf32>
      %180 = arith.truncf %179 : vector<8x4xf32> to vector<8x4xbf16>
      %c2_141 = arith.constant 2 : index
      %c0_142 = arith.constant 0 : index
      %c0_143 = arith.constant 0 : index
      %181 = vector.load %arg2[%c2_141, %c0_142, %c0_143] : memref<9x4x128xbf16, #tpu.memory_space<vmem>>, vector<1x4x128xbf16>
      %182 = vector.shape_cast %181 : vector<1x4x128xbf16> to vector<4x128xbf16>
      %cst_144 = arith.constant dense<0.000000e+00> : vector<8x128xf32>
      %183 = tpu.matmul %180, %182, %cst_144 {dimension_numbers = #tpu.dot_dimension_numbers<[1], [0], [0], [1], [0, 0, 1, 1], [], []>} : vector<8x4xbf16>, vector<4x128xbf16>, vector<8x128xf32> -> vector<8x128xf32>
      %184 = arith.addf %178, %183 : vector<8x128xf32>
      %c2_i32_145 = arith.constant 2 : i32
      %185 = arith.muli %arg13, %c2_i32_145 : i32
      %c0_i32_146 = arith.constant 0 : i32
      %186 = arith.addi %c0_i32_146, %185 : i32
      %c1_i32_147 = arith.constant 1 : i32
      %187 = arith.addi %186, %c1_i32_147 : i32
      %188 = arith.index_cast %187 : i32 to index
      %c0_148 = arith.constant 0 : index
      %c0_149 = arith.constant 0 : index
      %189 = vector.load %arg0[%188, %c0_148, %c0_149] : memref<36x19x4xbf16, #tpu.memory_space<vmem>>, vector<1x19x4xbf16>
      %190 = vector.shape_cast %189 : vector<1x19x4xbf16> to vector<19x4xbf16>
      %cst_150 = arith.constant dense<0.000000e+00> : vector<8x4xf32>
      %191 = tpu.matmul %8, %190, %cst_150 {dimension_numbers = #tpu.dot_dimension_numbers<[1], [0], [0], [1], [0, 0, 1, 1], [], []>} : vector<8x19xbf16>, vector<19x4xbf16>, vector<8x4xf32> -> vector<8x4xf32>
      %192 = arith.truncf %191 : vector<8x4xf32> to vector<8x4xbf16>
      %c3 = arith.constant 3 : index
      %c0_151 = arith.constant 0 : index
      %c0_152 = arith.constant 0 : index
      %193 = vector.load %arg2[%c3, %c0_151, %c0_152] : memref<9x4x128xbf16, #tpu.memory_space<vmem>>, vector<1x4x128xbf16>
      %194 = vector.shape_cast %193 : vector<1x4x128xbf16> to vector<4x128xbf16>
      %cst_153 = arith.constant dense<0.000000e+00> : vector<8x128xf32>
      %195 = tpu.matmul %192, %194, %cst_153 {dimension_numbers = #tpu.dot_dimension_numbers<[1], [0], [0], [1], [0, 0, 1, 1], [], []>} : vector<8x4xbf16>, vector<4x128xbf16>, vector<8x128xf32> -> vector<8x128xf32>
      %196 = arith.addf %184, %195 : vector<8x128xf32>
      %cst_154 = arith.constant dense<0.000000e+00> : vector<8x4xf32>
      %197 = tpu.matmul %10, %190, %cst_154 {dimension_numbers = #tpu.dot_dimension_numbers<[1], [0], [0], [1], [0, 0, 1, 1], [], []>} : vector<8x19xbf16>, vector<19x4xbf16>, vector<8x4xf32> -> vector<8x4xf32>
      %198 = arith.truncf %197 : vector<8x4xf32> to vector<8x4xbf16>
      %c4 = arith.constant 4 : index
      %c0_155 = arith.constant 0 : index
      %c0_156 = arith.constant 0 : index
      %199 = vector.load %arg2[%c4, %c0_155, %c0_156] : memref<9x4x128xbf16, #tpu.memory_space<vmem>>, vector<1x4x128xbf16>
      %200 = vector.shape_cast %199 : vector<1x4x128xbf16> to vector<4x128xbf16>
      %cst_157 = arith.constant dense<0.000000e+00> : vector<8x128xf32>
      %201 = tpu.matmul %198, %200, %cst_157 {dimension_numbers = #tpu.dot_dimension_numbers<[1], [0], [0], [1], [0, 0, 1, 1], [], []>} : vector<8x4xbf16>, vector<4x128xbf16>, vector<8x128xf32> -> vector<8x128xf32>
      %202 = arith.addf %196, %201 : vector<8x128xf32>
      %cst_158 = arith.constant dense<0.000000e+00> : vector<8x4xf32>
      %203 = tpu.matmul %12, %190, %cst_158 {dimension_numbers = #tpu.dot_dimension_numbers<[1], [0], [0], [1], [0, 0, 1, 1], [], []>} : vector<8x19xbf16>, vector<19x4xbf16>, vector<8x4xf32> -> vector<8x4xf32>
      %204 = arith.truncf %203 : vector<8x4xf32> to vector<8x4xbf16>
      %c5 = arith.constant 5 : index
      %c0_159 = arith.constant 0 : index
      %c0_160 = arith.constant 0 : index
      %205 = vector.load %arg2[%c5, %c0_159, %c0_160] : memref<9x4x128xbf16, #tpu.memory_space<vmem>>, vector<1x4x128xbf16>
      %206 = vector.shape_cast %205 : vector<1x4x128xbf16> to vector<4x128xbf16>
      %cst_161 = arith.constant dense<0.000000e+00> : vector<8x128xf32>
      %207 = tpu.matmul %204, %206, %cst_161 {dimension_numbers = #tpu.dot_dimension_numbers<[1], [0], [0], [1], [0, 0, 1, 1], [], []>} : vector<8x4xbf16>, vector<4x128xbf16>, vector<8x128xf32> -> vector<8x128xf32>
      %208 = arith.addf %202, %207 : vector<8x128xf32>
      %c2_i32_162 = arith.constant 2 : i32
      %209 = arith.muli %arg13, %c2_i32_162 : i32
      %c0_i32_163 = arith.constant 0 : i32
      %210 = arith.addi %c0_i32_163, %209 : i32
      %c2_i32_164 = arith.constant 2 : i32
      %211 = arith.addi %210, %c2_i32_164 : i32
      %212 = arith.index_cast %211 : i32 to index
      %c0_165 = arith.constant 0 : index
      %c0_166 = arith.constant 0 : index
      %213 = vector.load %arg0[%212, %c0_165, %c0_166] : memref<36x19x4xbf16, #tpu.memory_space<vmem>>, vector<1x19x4xbf16>
      %214 = vector.shape_cast %213 : vector<1x19x4xbf16> to vector<19x4xbf16>
      %cst_167 = arith.constant dense<0.000000e+00> : vector<8x4xf32>
      %215 = tpu.matmul %8, %214, %cst_167 {dimension_numbers = #tpu.dot_dimension_numbers<[1], [0], [0], [1], [0, 0, 1, 1], [], []>} : vector<8x19xbf16>, vector<19x4xbf16>, vector<8x4xf32> -> vector<8x4xf32>
      %216 = arith.truncf %215 : vector<8x4xf32> to vector<8x4xbf16>
      %c6 = arith.constant 6 : index
      %c0_168 = arith.constant 0 : index
      %c0_169 = arith.constant 0 : index
      %217 = vector.load %arg2[%c6, %c0_168, %c0_169] : memref<9x4x128xbf16, #tpu.memory_space<vmem>>, vector<1x4x128xbf16>
      %218 = vector.shape_cast %217 : vector<1x4x128xbf16> to vector<4x128xbf16>
      %cst_170 = arith.constant dense<0.000000e+00> : vector<8x128xf32>
      %219 = tpu.matmul %216, %218, %cst_170 {dimension_numbers = #tpu.dot_dimension_numbers<[1], [0], [0], [1], [0, 0, 1, 1], [], []>} : vector<8x4xbf16>, vector<4x128xbf16>, vector<8x128xf32> -> vector<8x128xf32>
      %220 = arith.addf %208, %219 : vector<8x128xf32>
      %cst_171 = arith.constant dense<0.000000e+00> : vector<8x4xf32>
      %221 = tpu.matmul %10, %214, %cst_171 {dimension_numbers = #tpu.dot_dimension_numbers<[1], [0], [0], [1], [0, 0, 1, 1], [], []>} : vector<8x19xbf16>, vector<19x4xbf16>, vector<8x4xf32> -> vector<8x4xf32>
      %222 = arith.truncf %221 : vector<8x4xf32> to vector<8x4xbf16>
      %c7_172 = arith.constant 7 : index
      %c0_173 = arith.constant 0 : index
      %c0_174 = arith.constant 0 : index
      %223 = vector.load %arg2[%c7_172, %c0_173, %c0_174] : memref<9x4x128xbf16, #tpu.memory_space<vmem>>, vector<1x4x128xbf16>
      %224 = vector.shape_cast %223 : vector<1x4x128xbf16> to vector<4x128xbf16>
      %cst_175 = arith.constant dense<0.000000e+00> : vector<8x128xf32>
      %225 = tpu.matmul %222, %224, %cst_175 {dimension_numbers = #tpu.dot_dimension_numbers<[1], [0], [0], [1], [0, 0, 1, 1], [], []>} : vector<8x4xbf16>, vector<4x128xbf16>, vector<8x128xf32> -> vector<8x128xf32>
      %226 = arith.addf %220, %225 : vector<8x128xf32>
      %cst_176 = arith.constant dense<0.000000e+00> : vector<8x4xf32>
      %227 = tpu.matmul %12, %214, %cst_176 {dimension_numbers = #tpu.dot_dimension_numbers<[1], [0], [0], [1], [0, 0, 1, 1], [], []>} : vector<8x19xbf16>, vector<19x4xbf16>, vector<8x4xf32> -> vector<8x4xf32>
      %228 = arith.truncf %227 : vector<8x4xf32> to vector<8x4xbf16>
      %c8 = arith.constant 8 : index
      %c0_177 = arith.constant 0 : index
      %c0_178 = arith.constant 0 : index
      %229 = vector.load %arg2[%c8, %c0_177, %c0_178] : memref<9x4x128xbf16, #tpu.memory_space<vmem>>, vector<1x4x128xbf16>
      %230 = vector.shape_cast %229 : vector<1x4x128xbf16> to vector<4x128xbf16>
      %cst_179 = arith.constant dense<0.000000e+00> : vector<8x128xf32>
      %231 = tpu.matmul %228, %230, %cst_179 {dimension_numbers = #tpu.dot_dimension_numbers<[1], [0], [0], [1], [0, 0, 1, 1], [], []>} : vector<8x4xbf16>, vector<4x128xbf16>, vector<8x128xf32> -> vector<8x128xf32>
      %232 = arith.addf %226, %231 : vector<8x128xf32>
      %233 = vector.broadcast %4 : vector<1x128xf32> to vector<8x128xf32>
      %234 = arith.addf %232, %233 : vector<8x128xf32>
      %cst_180 = arith.constant dense<0.000000e+00> : vector<128xf32>
      %235 = vector.multi_reduction <add>, %234, %cst_180 [0] : vector<8x128xf32> to vector<128xf32>
      %236 = vector.shape_cast %235 : vector<128xf32> to vector<1x128xf32>
      %237 = arith.addf %arg14, %236 : vector<1x128xf32>
      %238 = arith.mulf %234, %234 : vector<8x128xf32>
      %cst_181 = arith.constant dense<0.000000e+00> : vector<128xf32>
      %239 = vector.multi_reduction <add>, %238, %cst_181 [0] : vector<8x128xf32> to vector<128xf32>
      %240 = vector.shape_cast %239 : vector<128xf32> to vector<1x128xf32>
      %241 = arith.addf %arg15, %240 : vector<1x128xf32>
      %242 = arith.truncf %234 : vector<8x128xf32> to vector<8x128xbf16>
      %c1_i32_182 = arith.constant 1 : i32
      %243 = arith.addi %c1_i32_182, %arg13 : i32
      %244 = arith.index_cast %243 : i32 to index
      %c2_183 = arith.constant 2 : index
      %c0_184 = arith.constant 0 : index
      %245 = vector.load %arg11[%244, %c2_183, %c0_184] : memref<20x11x128xbf16, #tpu.memory_space<vmem>>, vector<1x8x128xbf16>
      %246 = vector.shape_cast %245 : vector<1x8x128xbf16> to vector<8x128xbf16>
      %247 = vector.shape_cast %242 : vector<8x128xbf16> to vector<1x8x128xbf16>
      tpu.vector_store %arg11[%244, %c2_183, %c0_184], %247 {strides = array<i32>} : memref<20x11x128xbf16, #tpu.memory_space<vmem>>, vector<1x8x128xbf16>,
      scf.yield %237, %241 : vector<1x128xf32>, vector<1x128xf32>
    }
    %c8_i32_21 = arith.constant 8 : i32
    %c0_i32_22 = arith.constant 0 : i32
    %c8_i32_23 = arith.constant 8 : i32
    %17 = arith.addi %c0_i32_22, %c8_i32_23 : i32
    %c1_i32_24 = arith.constant 1 : i32
    %18:2 = scf.for %arg13 = %c0_i32_22 to %17 step %c1_i32_24 iter_args(%arg14 = %16#0, %arg15 = %16#1) -> (vector<1x128xf32>, vector<1x128xf32>)  : i32 {
      %cst_124 = arith.constant 0.000000e+00 : f32
      %160 = vector.broadcast %cst_124 : f32 to vector<8x128xf32>
      %c2_i32_125 = arith.constant 2 : i32
      %161 = arith.muli %arg13, %c2_i32_125 : i32
      %c18_i32 = arith.constant 18 : i32
      %162 = arith.addi %c18_i32, %161 : i32
      %c0_i32_126 = arith.constant 0 : i32
      %163 = arith.addi %162, %c0_i32_126 : i32
      %164 = arith.index_cast %163 : i32 to index
      %c0_127 = arith.constant 0 : index
      %c0_128 = arith.constant 0 : index
      %165 = vector.load %arg0[%164, %c0_127, %c0_128] : memref<36x19x4xbf16, #tpu.memory_space<vmem>>, vector<1x19x4xbf16>
      %166 = vector.shape_cast %165 : vector<1x19x4xbf16> to vector<19x4xbf16>
      %cst_129 = arith.constant dense<0.000000e+00> : vector<8x4xf32>
      %167 = tpu.matmul %8, %166, %cst_129 {dimension_numbers = #tpu.dot_dimension_numbers<[1], [0], [0], [1], [0, 0, 1, 1], [], []>} : vector<8x19xbf16>, vector<19x4xbf16>, vector<8x4xf32> -> vector<8x4xf32>
      %168 = arith.truncf %167 : vector<8x4xf32> to vector<8x4xbf16>
      %c0_130 = arith.constant 0 : index
      %c0_131 = arith.constant 0 : index
      %c0_132 = arith.constant 0 : index
      %169 = vector.load %arg2[%c0_130, %c0_131, %c0_132] : memref<9x4x128xbf16, #tpu.memory_space<vmem>>, vector<1x4x128xbf16>
      %170 = vector.shape_cast %169 : vector<1x4x128xbf16> to vector<4x128xbf16>
      %cst_133 = arith.constant dense<0.000000e+00> : vector<8x128xf32>
      %171 = tpu.matmul %168, %170, %cst_133 {dimension_numbers = #tpu.dot_dimension_numbers<[1], [0], [0], [1], [0, 0, 1, 1], [], []>} : vector<8x4xbf16>, vector<4x128xbf16>, vector<8x128xf32> -> vector<8x128xf32>
      %172 = arith.addf %160, %171 : vector<8x128xf32>
      %cst_134 = arith.constant dense<0.000000e+00> : vector<8x4xf32>
      %173 = tpu.matmul %10, %166, %cst_134 {dimension_numbers = #tpu.dot_dimension_numbers<[1], [0], [0], [1], [0, 0, 1, 1], [], []>} : vector<8x19xbf16>, vector<19x4xbf16>, vector<8x4xf32> -> vector<8x4xf32>
      %174 = arith.truncf %173 : vector<8x4xf32> to vector<8x4xbf16>
      %c1_135 = arith.constant 1 : index
      %c0_136 = arith.constant 0 : index
      %c0_137 = arith.constant 0 : index
      %175 = vector.load %arg2[%c1_135, %c0_136, %c0_137] : memref<9x4x128xbf16, #tpu.memory_space<vmem>>, vector<1x4x128xbf16>
      %176 = vector.shape_cast %175 : vector<1x4x128xbf16> to vector<4x128xbf16>
      %cst_138 = arith.constant dense<0.000000e+00> : vector<8x128xf32>
      %177 = tpu.matmul %174, %176, %cst_138 {dimension_numbers = #tpu.dot_dimension_numbers<[1], [0], [0], [1], [0, 0, 1, 1], [], []>} : vector<8x4xbf16>, vector<4x128xbf16>, vector<8x128xf32> -> vector<8x128xf32>
      %178 = arith.addf %172, %177 : vector<8x128xf32>
      %cst_139 = arith.constant dense<0.000000e+00> : vector<8x4xf32>
      %179 = tpu.matmul %12, %166, %cst_139 {dimension_numbers = #tpu.dot_dimension_numbers<[1], [0], [0], [1], [0, 0, 1, 1], [], []>} : vector<8x19xbf16>, vector<19x4xbf16>, vector<8x4xf32> -> vector<8x4xf32>
      %180 = arith.truncf %179 : vector<8x4xf32> to vector<8x4xbf16>
      %c2_140 = arith.constant 2 : index
      %c0_141 = arith.constant 0 : index
      %c0_142 = arith.constant 0 : index
      %181 = vector.load %arg2[%c2_140, %c0_141, %c0_142] : memref<9x4x128xbf16, #tpu.memory_space<vmem>>, vector<1x4x128xbf16>
      %182 = vector.shape_cast %181 : vector<1x4x128xbf16> to vector<4x128xbf16>
      %cst_143 = arith.constant dense<0.000000e+00> : vector<8x128xf32>
      %183 = tpu.matmul %180, %182, %cst_143 {dimension_numbers = #tpu.dot_dimension_numbers<[1], [0], [0], [1], [0, 0, 1, 1], [], []>} : vector<8x4xbf16>, vector<4x128xbf16>, vector<8x128xf32> -> vector<8x128xf32>
      %184 = arith.addf %178, %183 : vector<8x128xf32>
      %c2_i32_144 = arith.constant 2 : i32
      %185 = arith.muli %arg13, %c2_i32_144 : i32
      %c18_i32_145 = arith.constant 18 : i32
      %186 = arith.addi %c18_i32_145, %185 : i32
      %c1_i32_146 = arith.constant 1 : i32
      %187 = arith.addi %186, %c1_i32_146 : i32
      %188 = arith.index_cast %187 : i32 to index
      %c0_147 = arith.constant 0 : index
      %c0_148 = arith.constant 0 : index
      %189 = vector.load %arg0[%188, %c0_147, %c0_148] : memref<36x19x4xbf16, #tpu.memory_space<vmem>>, vector<1x19x4xbf16>
      %190 = vector.shape_cast %189 : vector<1x19x4xbf16> to vector<19x4xbf16>
      %cst_149 = arith.constant dense<0.000000e+00> : vector<8x4xf32>
      %191 = tpu.matmul %8, %190, %cst_149 {dimension_numbers = #tpu.dot_dimension_numbers<[1], [0], [0], [1], [0, 0, 1, 1], [], []>} : vector<8x19xbf16>, vector<19x4xbf16>, vector<8x4xf32> -> vector<8x4xf32>
      %192 = arith.truncf %191 : vector<8x4xf32> to vector<8x4xbf16>
      %c3 = arith.constant 3 : index
      %c0_150 = arith.constant 0 : index
      %c0_151 = arith.constant 0 : index
      %193 = vector.load %arg2[%c3, %c0_150, %c0_151] : memref<9x4x128xbf16, #tpu.memory_space<vmem>>, vector<1x4x128xbf16>
      %194 = vector.shape_cast %193 : vector<1x4x128xbf16> to vector<4x128xbf16>
      %cst_152 = arith.constant dense<0.000000e+00> : vector<8x128xf32>
      %195 = tpu.matmul %192, %194, %cst_152 {dimension_numbers = #tpu.dot_dimension_numbers<[1], [0], [0], [1], [0, 0, 1, 1], [], []>} : vector<8x4xbf16>, vector<4x128xbf16>, vector<8x128xf32> -> vector<8x128xf32>
      %196 = arith.addf %184, %195 : vector<8x128xf32>
      %cst_153 = arith.constant dense<0.000000e+00> : vector<8x4xf32>
      %197 = tpu.matmul %10, %190, %cst_153 {dimension_numbers = #tpu.dot_dimension_numbers<[1], [0], [0], [1], [0, 0, 1, 1], [], []>} : vector<8x19xbf16>, vector<19x4xbf16>, vector<8x4xf32> -> vector<8x4xf32>
      %198 = arith.truncf %197 : vector<8x4xf32> to vector<8x4xbf16>
      %c4 = arith.constant 4 : index
      %c0_154 = arith.constant 0 : index
      %c0_155 = arith.constant 0 : index
      %199 = vector.load %arg2[%c4, %c0_154, %c0_155] : memref<9x4x128xbf16, #tpu.memory_space<vmem>>, vector<1x4x128xbf16>
      %200 = vector.shape_cast %199 : vector<1x4x128xbf16> to vector<4x128xbf16>
      %cst_156 = arith.constant dense<0.000000e+00> : vector<8x128xf32>
      %201 = tpu.matmul %198, %200, %cst_156 {dimension_numbers = #tpu.dot_dimension_numbers<[1], [0], [0], [1], [0, 0, 1, 1], [], []>} : vector<8x4xbf16>, vector<4x128xbf16>, vector<8x128xf32> -> vector<8x128xf32>
      %202 = arith.addf %196, %201 : vector<8x128xf32>
      %cst_157 = arith.constant dense<0.000000e+00> : vector<8x4xf32>
      %203 = tpu.matmul %12, %190, %cst_157 {dimension_numbers = #tpu.dot_dimension_numbers<[1], [0], [0], [1], [0, 0, 1, 1], [], []>} : vector<8x19xbf16>, vector<19x4xbf16>, vector<8x4xf32> -> vector<8x4xf32>
      %204 = arith.truncf %203 : vector<8x4xf32> to vector<8x4xbf16>
      %c5 = arith.constant 5 : index
      %c0_158 = arith.constant 0 : index
      %c0_159 = arith.constant 0 : index
      %205 = vector.load %arg2[%c5, %c0_158, %c0_159] : memref<9x4x128xbf16, #tpu.memory_space<vmem>>, vector<1x4x128xbf16>
      %206 = vector.shape_cast %205 : vector<1x4x128xbf16> to vector<4x128xbf16>
      %cst_160 = arith.constant dense<0.000000e+00> : vector<8x128xf32>
      %207 = tpu.matmul %204, %206, %cst_160 {dimension_numbers = #tpu.dot_dimension_numbers<[1], [0], [0], [1], [0, 0, 1, 1], [], []>} : vector<8x4xbf16>, vector<4x128xbf16>, vector<8x128xf32> -> vector<8x128xf32>
      %208 = arith.addf %202, %207 : vector<8x128xf32>
      %c2_i32_161 = arith.constant 2 : i32
      %209 = arith.muli %arg13, %c2_i32_161 : i32
      %c18_i32_162 = arith.constant 18 : i32
      %210 = arith.addi %c18_i32_162, %209 : i32
      %c2_i32_163 = arith.constant 2 : i32
      %211 = arith.addi %210, %c2_i32_163 : i32
      %212 = arith.index_cast %211 : i32 to index
      %c0_164 = arith.constant 0 : index
      %c0_165 = arith.constant 0 : index
      %213 = vector.load %arg0[%212, %c0_164, %c0_165] : memref<36x19x4xbf16, #tpu.memory_space<vmem>>, vector<1x19x4xbf16>
      %214 = vector.shape_cast %213 : vector<1x19x4xbf16> to vector<19x4xbf16>
      %cst_166 = arith.constant dense<0.000000e+00> : vector<8x4xf32>
      %215 = tpu.matmul %8, %214, %cst_166 {dimension_numbers = #tpu.dot_dimension_numbers<[1], [0], [0], [1], [0, 0, 1, 1], [], []>} : vector<8x19xbf16>, vector<19x4xbf16>, vector<8x4xf32> -> vector<8x4xf32>
      %216 = arith.truncf %215 : vector<8x4xf32> to vector<8x4xbf16>
      %c6 = arith.constant 6 : index
      %c0_167 = arith.constant 0 : index
      %c0_168 = arith.constant 0 : index
      %217 = vector.load %arg2[%c6, %c0_167, %c0_168] : memref<9x4x128xbf16, #tpu.memory_space<vmem>>, vector<1x4x128xbf16>
      %218 = vector.shape_cast %217 : vector<1x4x128xbf16> to vector<4x128xbf16>
      %cst_169 = arith.constant dense<0.000000e+00> : vector<8x128xf32>
      %219 = tpu.matmul %216, %218, %cst_169 {dimension_numbers = #tpu.dot_dimension_numbers<[1], [0], [0], [1], [0, 0, 1, 1], [], []>} : vector<8x4xbf16>, vector<4x128xbf16>, vector<8x128xf32> -> vector<8x128xf32>
      %220 = arith.addf %208, %219 : vector<8x128xf32>
      %cst_170 = arith.constant dense<0.000000e+00> : vector<8x4xf32>
      %221 = tpu.matmul %10, %214, %cst_170 {dimension_numbers = #tpu.dot_dimension_numbers<[1], [0], [0], [1], [0, 0, 1, 1], [], []>} : vector<8x19xbf16>, vector<19x4xbf16>, vector<8x4xf32> -> vector<8x4xf32>
      %222 = arith.truncf %221 : vector<8x4xf32> to vector<8x4xbf16>
      %c7_171 = arith.constant 7 : index
      %c0_172 = arith.constant 0 : index
      %c0_173 = arith.constant 0 : index
      %223 = vector.load %arg2[%c7_171, %c0_172, %c0_173] : memref<9x4x128xbf16, #tpu.memory_space<vmem>>, vector<1x4x128xbf16>
      %224 = vector.shape_cast %223 : vector<1x4x128xbf16> to vector<4x128xbf16>
      %cst_174 = arith.constant dense<0.000000e+00> : vector<8x128xf32>
      %225 = tpu.matmul %222, %224, %cst_174 {dimension_numbers = #tpu.dot_dimension_numbers<[1], [0], [0], [1], [0, 0, 1, 1], [], []>} : vector<8x4xbf16>, vector<4x128xbf16>, vector<8x128xf32> -> vector<8x128xf32>
      %226 = arith.addf %220, %225 : vector<8x128xf32>
      %cst_175 = arith.constant dense<0.000000e+00> : vector<8x4xf32>
      %227 = tpu.matmul %12, %214, %cst_175 {dimension_numbers = #tpu.dot_dimension_numbers<[1], [0], [0], [1], [0, 0, 1, 1], [], []>} : vector<8x19xbf16>, vector<19x4xbf16>, vector<8x4xf32> -> vector<8x4xf32>
      %228 = arith.truncf %227 : vector<8x4xf32> to vector<8x4xbf16>
      %c8 = arith.constant 8 : index
      %c0_176 = arith.constant 0 : index
      %c0_177 = arith.constant 0 : index
      %229 = vector.load %arg2[%c8, %c0_176, %c0_177] : memref<9x4x128xbf16, #tpu.memory_space<vmem>>, vector<1x4x128xbf16>
      %230 = vector.shape_cast %229 : vector<1x4x128xbf16> to vector<4x128xbf16>
      %cst_178 = arith.constant dense<0.000000e+00> : vector<8x128xf32>
      %231 = tpu.matmul %228, %230, %cst_178 {dimension_numbers = #tpu.dot_dimension_numbers<[1], [0], [0], [1], [0, 0, 1, 1], [], []>} : vector<8x4xbf16>, vector<4x128xbf16>, vector<8x128xf32> -> vector<8x128xf32>
      %232 = arith.addf %226, %231 : vector<8x128xf32>
      %233 = vector.broadcast %4 : vector<1x128xf32> to vector<8x128xf32>
      %234 = arith.addf %232, %233 : vector<8x128xf32>
      %cst_179 = arith.constant dense<0.000000e+00> : vector<128xf32>
      %235 = vector.multi_reduction <add>, %234, %cst_179 [0] : vector<8x128xf32> to vector<128xf32>
      %236 = vector.shape_cast %235 : vector<128xf32> to vector<1x128xf32>
      %237 = arith.addf %arg14, %236 : vector<1x128xf32>
      %238 = arith.mulf %234, %234 : vector<8x128xf32>
      %cst_180 = arith.constant dense<0.000000e+00> : vector<128xf32>
      %239 = vector.multi_reduction <add>, %238, %cst_180 [0] : vector<8x128xf32> to vector<128xf32>
      %240 = vector.shape_cast %239 : vector<128xf32> to vector<1x128xf32>
      %241 = arith.addf %arg15, %240 : vector<1x128xf32>
      %242 = arith.truncf %234 : vector<8x128xf32> to vector<8x128xbf16>
      %c11_i32 = arith.constant 11 : i32
      %243 = arith.addi %c11_i32, %arg13 : i32
      %244 = arith.index_cast %243 : i32 to index
      %c2_181 = arith.constant 2 : index
      %c0_182 = arith.constant 0 : index
      %245 = vector.load %arg11[%244, %c2_181, %c0_182] : memref<20x11x128xbf16, #tpu.memory_space<vmem>>, vector<1x8x128xbf16>
      %246 = vector.shape_cast %245 : vector<1x8x128xbf16> to vector<8x128xbf16>
      %247 = vector.shape_cast %242 : vector<8x128xbf16> to vector<1x8x128xbf16>
      tpu.vector_store %arg11[%244, %c2_181, %c0_182], %247 {strides = array<i32>} : memref<20x11x128xbf16, #tpu.memory_space<vmem>>, vector<1x8x128xbf16>,
      scf.yield %237, %241 : vector<1x128xf32>, vector<1x128xf32>
    }
    %c8_i32_25 = arith.constant 8 : i32
    %cst_26 = arith.constant 7.812500e-03 : f32
    %19 = vector.broadcast %cst_26 : f32 to vector<1x128xf32>
    %20 = arith.mulf %18#0, %19 : vector<1x128xf32>
    %cst_27 = arith.constant 7.812500e-03 : f32
    %21 = vector.broadcast %cst_27 : f32 to vector<1x128xf32>
    %22 = arith.mulf %18#1, %21 : vector<1x128xf32>
    %23 = arith.mulf %20, %20 : vector<1x128xf32>
    %24 = arith.subf %22, %23 : vector<1x128xf32>
    %cst_28 = arith.constant 0.000000e+00 : f32
    %25 = vector.broadcast %cst_28 : f32 to vector<1x128xf32>
    %26 = arith.maximumf %24, %25 : vector<1x128xf32>
    %cst_29 = arith.constant 9.99999974E-6 : f32
    %27 = vector.broadcast %cst_29 : f32 to vector<1x128xf32>
    %28 = arith.addf %26, %27 : vector<1x128xf32>
    %29 = math.rsqrt %28 : vector<1x128xf32>
    %30 = arith.mulf %29, %5 : vector<1x128xf32>
    %31 = arith.mulf %20, %30 : vector<1x128xf32>
    %32 = arith.subf %6, %31 : vector<1x128xf32>
    %33 = vector.shape_cast %30 : vector<1x128xf32> to vector<1x1x128xf32>
    %34 = vector.shape_cast %32 : vector<1x128xf32> to vector<1x1x128xf32>
    %c1_30 = arith.constant 1 : index
    %c2_31 = arith.constant 2 : index
    %c0_32 = arith.constant 0 : index
    %35 = vector.load %arg11[%c1_30, %c2_31, %c0_32] : memref<20x11x128xbf16, #tpu.memory_space<vmem>>, vector<8x8x128xbf16>
    %36 = arith.extf %35 : vector<8x8x128xbf16> to vector<8x8x128xf32>
    %37 = vector.broadcast %33 : vector<1x1x128xf32> to vector<8x8x128xf32>
    %38 = arith.mulf %36, %37 : vector<8x8x128xf32>
    %39 = vector.broadcast %34 : vector<1x1x128xf32> to vector<8x8x128xf32>
    %40 = arith.addf %38, %39 : vector<8x8x128xf32>
    %cst_33 = arith.constant 0.000000e+00 : f32
    %41 = vector.broadcast %cst_33 : f32 to vector<8x8x128xf32>
    %42 = arith.cmpf ogt, %40, %41 : vector<8x8x128xf32>
    %cst_34 = arith.constant 0.00999999977 : f32
    %43 = vector.broadcast %cst_34 : f32 to vector<8x8x128xf32>
    %44 = arith.mulf %43, %40 : vector<8x8x128xf32>
    %45 = arith.select %42, %40, %44 : vector<8x8x128xi1>, vector<8x8x128xf32>
    %46 = arith.truncf %45 : vector<8x8x128xf32> to vector<8x8x128xbf16>
    %c1_35 = arith.constant 1 : index
    %c2_36 = arith.constant 2 : index
    %c0_37 = arith.constant 0 : index
    %47 = vector.load %arg11[%c1_35, %c2_36, %c0_37] : memref<20x11x128xbf16, #tpu.memory_space<vmem>>, vector<8x8x128xbf16>
    tpu.vector_store %arg11[%c1_35, %c2_36, %c0_37], %46 {strides = array<i32>} : memref<20x11x128xbf16, #tpu.memory_space<vmem>>, vector<8x8x128xbf16>,
    %c11 = arith.constant 11 : index
    %c2_38 = arith.constant 2 : index
    %c0_39 = arith.constant 0 : index
    %48 = vector.load %arg11[%c11, %c2_38, %c0_39] : memref<20x11x128xbf16, #tpu.memory_space<vmem>>, vector<8x8x128xbf16>
    %49 = arith.extf %48 : vector<8x8x128xbf16> to vector<8x8x128xf32>
    %50 = vector.broadcast %33 : vector<1x1x128xf32> to vector<8x8x128xf32>
    %51 = arith.mulf %49, %50 : vector<8x8x128xf32>
    %52 = vector.broadcast %34 : vector<1x1x128xf32> to vector<8x8x128xf32>
    %53 = arith.addf %51, %52 : vector<8x8x128xf32>
    %cst_40 = arith.constant 0.000000e+00 : f32
    %54 = vector.broadcast %cst_40 : f32 to vector<8x8x128xf32>
    %55 = arith.cmpf ogt, %53, %54 : vector<8x8x128xf32>
    %cst_41 = arith.constant 0.00999999977 : f32
    %56 = vector.broadcast %cst_41 : f32 to vector<8x8x128xf32>
    %57 = arith.mulf %56, %53 : vector<8x8x128xf32>
    %58 = arith.select %55, %53, %57 : vector<8x8x128xi1>, vector<8x8x128xf32>
    %59 = arith.truncf %58 : vector<8x8x128xf32> to vector<8x8x128xbf16>
    %c11_42 = arith.constant 11 : index
    %c2_43 = arith.constant 2 : index
    %c0_44 = arith.constant 0 : index
    %60 = vector.load %arg11[%c11_42, %c2_43, %c0_44] : memref<20x11x128xbf16, #tpu.memory_space<vmem>>, vector<8x8x128xbf16>
    tpu.vector_store %arg11[%c11_42, %c2_43, %c0_44], %59 {strides = array<i32>} : memref<20x11x128xbf16, #tpu.memory_space<vmem>>, vector<8x8x128xbf16>,
    %c0_45 = arith.constant 0 : index
    %c0_46 = arith.constant 0 : index
    %61 = vector.load %arg6[%c0_45, %c0_46] : memref<3x128xf32, #tpu.memory_space<vmem>>, vector<1x128xf32>
    %c1_47 = arith.constant 1 : index
    %c0_48 = arith.constant 0 : index
    %62 = vector.load %arg6[%c1_47, %c0_48] : memref<3x128xf32, #tpu.memory_space<vmem>>, vector<1x128xf32>
    %c2_49 = arith.constant 2 : index
    %c0_50 = arith.constant 0 : index
    %63 = vector.load %arg6[%c2_49, %c0_50] : memref<3x128xf32, #tpu.memory_space<vmem>>, vector<1x128xf32>
    %c0_51 = arith.constant 0 : index
    %c0_52 = arith.constant 0 : index
    %c0_53 = arith.constant 0 : index
    %64 = vector.load %arg4[%c0_51, %c0_52, %c0_53] : memref<3x4x11xbf16, #tpu.memory_space<vmem>>, vector<1x4x11xbf16>
    %65 = vector.shape_cast %64 : vector<1x4x11xbf16> to vector<4x11xbf16>
    %c1_54 = arith.constant 1 : index
    %c0_55 = arith.constant 0 : index
    %c0_56 = arith.constant 0 : index
    %66 = vector.load %arg4[%c1_54, %c0_55, %c0_56] : memref<3x4x11xbf16, #tpu.memory_space<vmem>>, vector<1x4x11xbf16>
    %67 = vector.shape_cast %66 : vector<1x4x11xbf16> to vector<4x11xbf16>
    %c2_57 = arith.constant 2 : index
    %c0_58 = arith.constant 0 : index
    %c0_59 = arith.constant 0 : index
    %68 = vector.load %arg4[%c2_57, %c0_58, %c0_59] : memref<3x4x11xbf16, #tpu.memory_space<vmem>>, vector<1x4x11xbf16>
    %69 = vector.shape_cast %68 : vector<1x4x11xbf16> to vector<4x11xbf16>
    %cst_60 = arith.constant 0.000000e+00 : f32
    %70 = vector.broadcast %cst_60 : f32 to vector<1x128xf32>
    %cst_61 = arith.constant 0.000000e+00 : f32
    %71 = vector.broadcast %cst_61 : f32 to vector<1x128xf32>
    %c0_i32_62 = arith.constant 0 : i32
    %c4_i32 = arith.constant 4 : i32
    %72 = arith.addi %c0_i32_62, %c4_i32 : i32
    %c1_i32_63 = arith.constant 1 : i32
    %73:2 = scf.for %arg13 = %c0_i32_62 to %72 step %c1_i32_63 iter_args(%arg14 = %70, %arg15 = %71) -> (vector<1x128xf32>, vector<1x128xf32>)  : i32 {
      %cst_124 = arith.constant 0.000000e+00 : f32
      %160 = vector.broadcast %cst_124 : f32 to vector<4x128xf32>
      %c2_i32_125 = arith.constant 2 : i32
      %161 = arith.muli %arg13, %c2_i32_125 : i32
      %c0_i32_126 = arith.constant 0 : i32
      %162 = arith.addi %c0_i32_126, %161 : i32
      %c0_i32_127 = arith.constant 0 : i32
      %163 = arith.addi %162, %c0_i32_127 : i32
      %164 = arith.index_cast %163 : i32 to index
      %c0_128 = arith.constant 0 : index
      %c0_129 = arith.constant 0 : index
      %165 = vector.load %arg11[%164, %c0_128, %c0_129] : memref<20x11x128xbf16, #tpu.memory_space<vmem>>, vector<1x11x128xbf16>
      %166 = vector.shape_cast %165 : vector<1x11x128xbf16> to vector<11x128xbf16>
      %cst_130 = arith.constant dense<0.000000e+00> : vector<4x128xf32>
      %167 = tpu.matmul %65, %166, %cst_130 {dimension_numbers = #tpu.dot_dimension_numbers<[1], [0], [0], [1], [0, 0, 1, 1], [], []>} : vector<4x11xbf16>, vector<11x128xbf16>, vector<4x128xf32> -> vector<4x128xf32>
      %168 = arith.truncf %167 : vector<4x128xf32> to vector<4x128xbf16>
      %c0_131 = arith.constant 0 : index
      %c0_132 = arith.constant 0 : index
      %c0_133 = arith.constant 0 : index
      %169 = vector.load %arg5[%c0_131, %c0_132, %c0_133] : memref<9x128x128xbf16, #tpu.memory_space<vmem>>, vector<1x128x128xbf16>
      %170 = vector.shape_cast %169 : vector<1x128x128xbf16> to vector<128x128xbf16>
      %cst_134 = arith.constant dense<0.000000e+00> : vector<4x128xf32>
      %171 = tpu.matmul %168, %170, %cst_134 {dimension_numbers = #tpu.dot_dimension_numbers<[1], [0], [0], [1], [0, 0, 1, 1], [], []>} : vector<4x128xbf16>, vector<128x128xbf16>, vector<4x128xf32> -> vector<4x128xf32>
      %172 = arith.addf %160, %171 : vector<4x128xf32>
      %cst_135 = arith.constant dense<0.000000e+00> : vector<4x128xf32>
      %173 = tpu.matmul %67, %166, %cst_135 {dimension_numbers = #tpu.dot_dimension_numbers<[1], [0], [0], [1], [0, 0, 1, 1], [], []>} : vector<4x11xbf16>, vector<11x128xbf16>, vector<4x128xf32> -> vector<4x128xf32>
      %174 = arith.truncf %173 : vector<4x128xf32> to vector<4x128xbf16>
      %c1_136 = arith.constant 1 : index
      %c0_137 = arith.constant 0 : index
      %c0_138 = arith.constant 0 : index
      %175 = vector.load %arg5[%c1_136, %c0_137, %c0_138] : memref<9x128x128xbf16, #tpu.memory_space<vmem>>, vector<1x128x128xbf16>
      %176 = vector.shape_cast %175 : vector<1x128x128xbf16> to vector<128x128xbf16>
      %cst_139 = arith.constant dense<0.000000e+00> : vector<4x128xf32>
      %177 = tpu.matmul %174, %176, %cst_139 {dimension_numbers = #tpu.dot_dimension_numbers<[1], [0], [0], [1], [0, 0, 1, 1], [], []>} : vector<4x128xbf16>, vector<128x128xbf16>, vector<4x128xf32> -> vector<4x128xf32>
      %178 = arith.addf %172, %177 : vector<4x128xf32>
      %cst_140 = arith.constant dense<0.000000e+00> : vector<4x128xf32>
      %179 = tpu.matmul %69, %166, %cst_140 {dimension_numbers = #tpu.dot_dimension_numbers<[1], [0], [0], [1], [0, 0, 1, 1], [], []>} : vector<4x11xbf16>, vector<11x128xbf16>, vector<4x128xf32> -> vector<4x128xf32>
      %180 = arith.truncf %179 : vector<4x128xf32> to vector<4x128xbf16>
      %c2_141 = arith.constant 2 : index
      %c0_142 = arith.constant 0 : index
      %c0_143 = arith.constant 0 : index
      %181 = vector.load %arg5[%c2_141, %c0_142, %c0_143] : memref<9x128x128xbf16, #tpu.memory_space<vmem>>, vector<1x128x128xbf16>
      %182 = vector.shape_cast %181 : vector<1x128x128xbf16> to vector<128x128xbf16>
      %cst_144 = arith.constant dense<0.000000e+00> : vector<4x128xf32>
      %183 = tpu.matmul %180, %182, %cst_144 {dimension_numbers = #tpu.dot_dimension_numbers<[1], [0], [0], [1], [0, 0, 1, 1], [], []>} : vector<4x128xbf16>, vector<128x128xbf16>, vector<4x128xf32> -> vector<4x128xf32>
      %184 = arith.addf %178, %183 : vector<4x128xf32>
      %c2_i32_145 = arith.constant 2 : i32
      %185 = arith.muli %arg13, %c2_i32_145 : i32
      %c0_i32_146 = arith.constant 0 : i32
      %186 = arith.addi %c0_i32_146, %185 : i32
      %c1_i32_147 = arith.constant 1 : i32
      %187 = arith.addi %186, %c1_i32_147 : i32
      %188 = arith.index_cast %187 : i32 to index
      %c0_148 = arith.constant 0 : index
      %c0_149 = arith.constant 0 : index
      %189 = vector.load %arg11[%188, %c0_148, %c0_149] : memref<20x11x128xbf16, #tpu.memory_space<vmem>>, vector<1x11x128xbf16>
      %190 = vector.shape_cast %189 : vector<1x11x128xbf16> to vector<11x128xbf16>
      %cst_150 = arith.constant dense<0.000000e+00> : vector<4x128xf32>
      %191 = tpu.matmul %65, %190, %cst_150 {dimension_numbers = #tpu.dot_dimension_numbers<[1], [0], [0], [1], [0, 0, 1, 1], [], []>} : vector<4x11xbf16>, vector<11x128xbf16>, vector<4x128xf32> -> vector<4x128xf32>
      %192 = arith.truncf %191 : vector<4x128xf32> to vector<4x128xbf16>
      %c3 = arith.constant 3 : index
      %c0_151 = arith.constant 0 : index
      %c0_152 = arith.constant 0 : index
      %193 = vector.load %arg5[%c3, %c0_151, %c0_152] : memref<9x128x128xbf16, #tpu.memory_space<vmem>>, vector<1x128x128xbf16>
      %194 = vector.shape_cast %193 : vector<1x128x128xbf16> to vector<128x128xbf16>
      %cst_153 = arith.constant dense<0.000000e+00> : vector<4x128xf32>
      %195 = tpu.matmul %192, %194, %cst_153 {dimension_numbers = #tpu.dot_dimension_numbers<[1], [0], [0], [1], [0, 0, 1, 1], [], []>} : vector<4x128xbf16>, vector<128x128xbf16>, vector<4x128xf32> -> vector<4x128xf32>
      %196 = arith.addf %184, %195 : vector<4x128xf32>
      %cst_154 = arith.constant dense<0.000000e+00> : vector<4x128xf32>
      %197 = tpu.matmul %67, %190, %cst_154 {dimension_numbers = #tpu.dot_dimension_numbers<[1], [0], [0], [1], [0, 0, 1, 1], [], []>} : vector<4x11xbf16>, vector<11x128xbf16>, vector<4x128xf32> -> vector<4x128xf32>
      %198 = arith.truncf %197 : vector<4x128xf32> to vector<4x128xbf16>
      %c4 = arith.constant 4 : index
      %c0_155 = arith.constant 0 : index
      %c0_156 = arith.constant 0 : index
      %199 = vector.load %arg5[%c4, %c0_155, %c0_156] : memref<9x128x128xbf16, #tpu.memory_space<vmem>>, vector<1x128x128xbf16>
      %200 = vector.shape_cast %199 : vector<1x128x128xbf16> to vector<128x128xbf16>
      %cst_157 = arith.constant dense<0.000000e+00> : vector<4x128xf32>
      %201 = tpu.matmul %198, %200, %cst_157 {dimension_numbers = #tpu.dot_dimension_numbers<[1], [0], [0], [1], [0, 0, 1, 1], [], []>} : vector<4x128xbf16>, vector<128x128xbf16>, vector<4x128xf32> -> vector<4x128xf32>
      %202 = arith.addf %196, %201 : vector<4x128xf32>
      %cst_158 = arith.constant dense<0.000000e+00> : vector<4x128xf32>
      %203 = tpu.matmul %69, %190, %cst_158 {dimension_numbers = #tpu.dot_dimension_numbers<[1], [0], [0], [1], [0, 0, 1, 1], [], []>} : vector<4x11xbf16>, vector<11x128xbf16>, vector<4x128xf32> -> vector<4x128xf32>
      %204 = arith.truncf %203 : vector<4x128xf32> to vector<4x128xbf16>
      %c5 = arith.constant 5 : index
      %c0_159 = arith.constant 0 : index
      %c0_160 = arith.constant 0 : index
      %205 = vector.load %arg5[%c5, %c0_159, %c0_160] : memref<9x128x128xbf16, #tpu.memory_space<vmem>>, vector<1x128x128xbf16>
      %206 = vector.shape_cast %205 : vector<1x128x128xbf16> to vector<128x128xbf16>
      %cst_161 = arith.constant dense<0.000000e+00> : vector<4x128xf32>
      %207 = tpu.matmul %204, %206, %cst_161 {dimension_numbers = #tpu.dot_dimension_numbers<[1], [0], [0], [1], [0, 0, 1, 1], [], []>} : vector<4x128xbf16>, vector<128x128xbf16>, vector<4x128xf32> -> vector<4x128xf32>
      %208 = arith.addf %202, %207 : vector<4x128xf32>
      %c2_i32_162 = arith.constant 2 : i32
      %209 = arith.muli %arg13, %c2_i32_162 : i32
      %c0_i32_163 = arith.constant 0 : i32
      %210 = arith.addi %c0_i32_163, %209 : i32
      %c2_i32_164 = arith.constant 2 : i32
      %211 = arith.addi %210, %c2_i32_164 : i32
      %212 = arith.index_cast %211 : i32 to index
      %c0_165 = arith.constant 0 : index
      %c0_166 = arith.constant 0 : index
      %213 = vector.load %arg11[%212, %c0_165, %c0_166] : memref<20x11x128xbf16, #tpu.memory_space<vmem>>, vector<1x11x128xbf16>
      %214 = vector.shape_cast %213 : vector<1x11x128xbf16> to vector<11x128xbf16>
      %cst_167 = arith.constant dense<0.000000e+00> : vector<4x128xf32>
      %215 = tpu.matmul %65, %214, %cst_167 {dimension_numbers = #tpu.dot_dimension_numbers<[1], [0], [0], [1], [0, 0, 1, 1], [], []>} : vector<4x11xbf16>, vector<11x128xbf16>, vector<4x128xf32> -> vector<4x128xf32>
      %216 = arith.truncf %215 : vector<4x128xf32> to vector<4x128xbf16>
      %c6 = arith.constant 6 : index
      %c0_168 = arith.constant 0 : index
      %c0_169 = arith.constant 0 : index
      %217 = vector.load %arg5[%c6, %c0_168, %c0_169] : memref<9x128x128xbf16, #tpu.memory_space<vmem>>, vector<1x128x128xbf16>
      %218 = vector.shape_cast %217 : vector<1x128x128xbf16> to vector<128x128xbf16>
      %cst_170 = arith.constant dense<0.000000e+00> : vector<4x128xf32>
      %219 = tpu.matmul %216, %218, %cst_170 {dimension_numbers = #tpu.dot_dimension_numbers<[1], [0], [0], [1], [0, 0, 1, 1], [], []>} : vector<4x128xbf16>, vector<128x128xbf16>, vector<4x128xf32> -> vector<4x128xf32>
      %220 = arith.addf %208, %219 : vector<4x128xf32>
      %cst_171 = arith.constant dense<0.000000e+00> : vector<4x128xf32>
      %221 = tpu.matmul %67, %214, %cst_171 {dimension_numbers = #tpu.dot_dimension_numbers<[1], [0], [0], [1], [0, 0, 1, 1], [], []>} : vector<4x11xbf16>, vector<11x128xbf16>, vector<4x128xf32> -> vector<4x128xf32>
      %222 = arith.truncf %221 : vector<4x128xf32> to vector<4x128xbf16>
      %c7_172 = arith.constant 7 : index
      %c0_173 = arith.constant 0 : index
      %c0_174 = arith.constant 0 : index
      %223 = vector.load %arg5[%c7_172, %c0_173, %c0_174] : memref<9x128x128xbf16, #tpu.memory_space<vmem>>, vector<1x128x128xbf16>
      %224 = vector.shape_cast %223 : vector<1x128x128xbf16> to vector<128x128xbf16>
      %cst_175 = arith.constant dense<0.000000e+00> : vector<4x128xf32>
      %225 = tpu.matmul %222, %224, %cst_175 {dimension_numbers = #tpu.dot_dimension_numbers<[1], [0], [0], [1], [0, 0, 1, 1], [], []>} : vector<4x128xbf16>, vector<128x128xbf16>, vector<4x128xf32> -> vector<4x128xf32>
      %226 = arith.addf %220, %225 : vector<4x128xf32>
      %cst_176 = arith.constant dense<0.000000e+00> : vector<4x128xf32>
      %227 = tpu.matmul %69, %214, %cst_176 {dimension_numbers = #tpu.dot_dimension_numbers<[1], [0], [0], [1], [0, 0, 1, 1], [], []>} : vector<4x11xbf16>, vector<11x128xbf16>, vector<4x128xf32> -> vector<4x128xf32>
      %228 = arith.truncf %227 : vector<4x128xf32> to vector<4x128xbf16>
      %c8 = arith.constant 8 : index
      %c0_177 = arith.constant 0 : index
      %c0_178 = arith.constant 0 : index
      %229 = vector.load %arg5[%c8, %c0_177, %c0_178] : memref<9x128x128xbf16, #tpu.memory_space<vmem>>, vector<1x128x128xbf16>
      %230 = vector.shape_cast %229 : vector<1x128x128xbf16> to vector<128x128xbf16>
      %cst_179 = arith.constant dense<0.000000e+00> : vector<4x128xf32>
      %231 = tpu.matmul %228, %230, %cst_179 {dimension_numbers = #tpu.dot_dimension_numbers<[1], [0], [0], [1], [0, 0, 1, 1], [], []>} : vector<4x128xbf16>, vector<128x128xbf16>, vector<4x128xf32> -> vector<4x128xf32>
      %232 = arith.addf %226, %231 : vector<4x128xf32>
      %233 = vector.broadcast %61 : vector<1x128xf32> to vector<4x128xf32>
      %234 = arith.addf %232, %233 : vector<4x128xf32>
      %cst_180 = arith.constant dense<0.000000e+00> : vector<128xf32>
      %235 = vector.multi_reduction <add>, %234, %cst_180 [0] : vector<4x128xf32> to vector<128xf32>
      %236 = vector.shape_cast %235 : vector<128xf32> to vector<1x128xf32>
      %237 = arith.addf %arg14, %236 : vector<1x128xf32>
      %238 = arith.mulf %234, %234 : vector<4x128xf32>
      %cst_181 = arith.constant dense<0.000000e+00> : vector<128xf32>
      %239 = vector.multi_reduction <add>, %238, %cst_181 [0] : vector<4x128xf32> to vector<128xf32>
      %240 = vector.shape_cast %239 : vector<128xf32> to vector<1x128xf32>
      %241 = arith.addf %arg15, %240 : vector<1x128xf32>
      %242 = arith.truncf %234 : vector<4x128xf32> to vector<4x128xbf16>
      %c1_i32_182 = arith.constant 1 : i32
      %243 = arith.addi %c1_i32_182, %arg13 : i32
      %244 = arith.index_cast %243 : i32 to index
      %c2_183 = arith.constant 2 : index
      %c0_184 = arith.constant 0 : index
      %245 = vector.load %arg12[%244, %c2_183, %c0_184] : memref<12x7x128xbf16, #tpu.memory_space<vmem>>, vector<1x4x128xbf16>
      %246 = vector.shape_cast %245 : vector<1x4x128xbf16> to vector<4x128xbf16>
      %247 = vector.shape_cast %242 : vector<4x128xbf16> to vector<1x4x128xbf16>
      tpu.vector_store %arg12[%244, %c2_183, %c0_184], %247 {strides = array<i32>} : memref<12x7x128xbf16, #tpu.memory_space<vmem>>, vector<1x4x128xbf16>,
      scf.yield %237, %241 : vector<1x128xf32>, vector<1x128xf32>
    }
    %c4_i32_64 = arith.constant 4 : i32
    %c0_i32_65 = arith.constant 0 : i32
    %c4_i32_66 = arith.constant 4 : i32
    %74 = arith.addi %c0_i32_65, %c4_i32_66 : i32
    %c1_i32_67 = arith.constant 1 : i32
    %75:2 = scf.for %arg13 = %c0_i32_65 to %74 step %c1_i32_67 iter_args(%arg14 = %73#0, %arg15 = %73#1) -> (vector<1x128xf32>, vector<1x128xf32>)  : i32 {
      %cst_124 = arith.constant 0.000000e+00 : f32
      %160 = vector.broadcast %cst_124 : f32 to vector<4x128xf32>
      %c2_i32_125 = arith.constant 2 : i32
      %161 = arith.muli %arg13, %c2_i32_125 : i32
      %c10_i32 = arith.constant 10 : i32
      %162 = arith.addi %c10_i32, %161 : i32
      %c0_i32_126 = arith.constant 0 : i32
      %163 = arith.addi %162, %c0_i32_126 : i32
      %164 = arith.index_cast %163 : i32 to index
      %c0_127 = arith.constant 0 : index
      %c0_128 = arith.constant 0 : index
      %165 = vector.load %arg11[%164, %c0_127, %c0_128] : memref<20x11x128xbf16, #tpu.memory_space<vmem>>, vector<1x11x128xbf16>
      %166 = vector.shape_cast %165 : vector<1x11x128xbf16> to vector<11x128xbf16>
      %cst_129 = arith.constant dense<0.000000e+00> : vector<4x128xf32>
      %167 = tpu.matmul %65, %166, %cst_129 {dimension_numbers = #tpu.dot_dimension_numbers<[1], [0], [0], [1], [0, 0, 1, 1], [], []>} : vector<4x11xbf16>, vector<11x128xbf16>, vector<4x128xf32> -> vector<4x128xf32>
      %168 = arith.truncf %167 : vector<4x128xf32> to vector<4x128xbf16>
      %c0_130 = arith.constant 0 : index
      %c0_131 = arith.constant 0 : index
      %c0_132 = arith.constant 0 : index
      %169 = vector.load %arg5[%c0_130, %c0_131, %c0_132] : memref<9x128x128xbf16, #tpu.memory_space<vmem>>, vector<1x128x128xbf16>
      %170 = vector.shape_cast %169 : vector<1x128x128xbf16> to vector<128x128xbf16>
      %cst_133 = arith.constant dense<0.000000e+00> : vector<4x128xf32>
      %171 = tpu.matmul %168, %170, %cst_133 {dimension_numbers = #tpu.dot_dimension_numbers<[1], [0], [0], [1], [0, 0, 1, 1], [], []>} : vector<4x128xbf16>, vector<128x128xbf16>, vector<4x128xf32> -> vector<4x128xf32>
      %172 = arith.addf %160, %171 : vector<4x128xf32>
      %cst_134 = arith.constant dense<0.000000e+00> : vector<4x128xf32>
      %173 = tpu.matmul %67, %166, %cst_134 {dimension_numbers = #tpu.dot_dimension_numbers<[1], [0], [0], [1], [0, 0, 1, 1], [], []>} : vector<4x11xbf16>, vector<11x128xbf16>, vector<4x128xf32> -> vector<4x128xf32>
      %174 = arith.truncf %173 : vector<4x128xf32> to vector<4x128xbf16>
      %c1_135 = arith.constant 1 : index
      %c0_136 = arith.constant 0 : index
      %c0_137 = arith.constant 0 : index
      %175 = vector.load %arg5[%c1_135, %c0_136, %c0_137] : memref<9x128x128xbf16, #tpu.memory_space<vmem>>, vector<1x128x128xbf16>
      %176 = vector.shape_cast %175 : vector<1x128x128xbf16> to vector<128x128xbf16>
      %cst_138 = arith.constant dense<0.000000e+00> : vector<4x128xf32>
      %177 = tpu.matmul %174, %176, %cst_138 {dimension_numbers = #tpu.dot_dimension_numbers<[1], [0], [0], [1], [0, 0, 1, 1], [], []>} : vector<4x128xbf16>, vector<128x128xbf16>, vector<4x128xf32> -> vector<4x128xf32>
      %178 = arith.addf %172, %177 : vector<4x128xf32>
      %cst_139 = arith.constant dense<0.000000e+00> : vector<4x128xf32>
      %179 = tpu.matmul %69, %166, %cst_139 {dimension_numbers = #tpu.dot_dimension_numbers<[1], [0], [0], [1], [0, 0, 1, 1], [], []>} : vector<4x11xbf16>, vector<11x128xbf16>, vector<4x128xf32> -> vector<4x128xf32>
      %180 = arith.truncf %179 : vector<4x128xf32> to vector<4x128xbf16>
      %c2_140 = arith.constant 2 : index
      %c0_141 = arith.constant 0 : index
      %c0_142 = arith.constant 0 : index
      %181 = vector.load %arg5[%c2_140, %c0_141, %c0_142] : memref<9x128x128xbf16, #tpu.memory_space<vmem>>, vector<1x128x128xbf16>
      %182 = vector.shape_cast %181 : vector<1x128x128xbf16> to vector<128x128xbf16>
      %cst_143 = arith.constant dense<0.000000e+00> : vector<4x128xf32>
      %183 = tpu.matmul %180, %182, %cst_143 {dimension_numbers = #tpu.dot_dimension_numbers<[1], [0], [0], [1], [0, 0, 1, 1], [], []>} : vector<4x128xbf16>, vector<128x128xbf16>, vector<4x128xf32> -> vector<4x128xf32>
      %184 = arith.addf %178, %183 : vector<4x128xf32>
      %c2_i32_144 = arith.constant 2 : i32
      %185 = arith.muli %arg13, %c2_i32_144 : i32
      %c10_i32_145 = arith.constant 10 : i32
      %186 = arith.addi %c10_i32_145, %185 : i32
      %c1_i32_146 = arith.constant 1 : i32
      %187 = arith.addi %186, %c1_i32_146 : i32
      %188 = arith.index_cast %187 : i32 to index
      %c0_147 = arith.constant 0 : index
      %c0_148 = arith.constant 0 : index
      %189 = vector.load %arg11[%188, %c0_147, %c0_148] : memref<20x11x128xbf16, #tpu.memory_space<vmem>>, vector<1x11x128xbf16>
      %190 = vector.shape_cast %189 : vector<1x11x128xbf16> to vector<11x128xbf16>
      %cst_149 = arith.constant dense<0.000000e+00> : vector<4x128xf32>
      %191 = tpu.matmul %65, %190, %cst_149 {dimension_numbers = #tpu.dot_dimension_numbers<[1], [0], [0], [1], [0, 0, 1, 1], [], []>} : vector<4x11xbf16>, vector<11x128xbf16>, vector<4x128xf32> -> vector<4x128xf32>
      %192 = arith.truncf %191 : vector<4x128xf32> to vector<4x128xbf16>
      %c3 = arith.constant 3 : index
      %c0_150 = arith.constant 0 : index
      %c0_151 = arith.constant 0 : index
      %193 = vector.load %arg5[%c3, %c0_150, %c0_151] : memref<9x128x128xbf16, #tpu.memory_space<vmem>>, vector<1x128x128xbf16>
      %194 = vector.shape_cast %193 : vector<1x128x128xbf16> to vector<128x128xbf16>
      %cst_152 = arith.constant dense<0.000000e+00> : vector<4x128xf32>
      %195 = tpu.matmul %192, %194, %cst_152 {dimension_numbers = #tpu.dot_dimension_numbers<[1], [0], [0], [1], [0, 0, 1, 1], [], []>} : vector<4x128xbf16>, vector<128x128xbf16>, vector<4x128xf32> -> vector<4x128xf32>
      %196 = arith.addf %184, %195 : vector<4x128xf32>
      %cst_153 = arith.constant dense<0.000000e+00> : vector<4x128xf32>
      %197 = tpu.matmul %67, %190, %cst_153 {dimension_numbers = #tpu.dot_dimension_numbers<[1], [0], [0], [1], [0, 0, 1, 1], [], []>} : vector<4x11xbf16>, vector<11x128xbf16>, vector<4x128xf32> -> vector<4x128xf32>
      %198 = arith.truncf %197 : vector<4x128xf32> to vector<4x128xbf16>
      %c4 = arith.constant 4 : index
      %c0_154 = arith.constant 0 : index
      %c0_155 = arith.constant 0 : index
      %199 = vector.load %arg5[%c4, %c0_154, %c0_155] : memref<9x128x128xbf16, #tpu.memory_space<vmem>>, vector<1x128x128xbf16>
      %200 = vector.shape_cast %199 : vector<1x128x128xbf16> to vector<128x128xbf16>
      %cst_156 = arith.constant dense<0.000000e+00> : vector<4x128xf32>
      %201 = tpu.matmul %198, %200, %cst_156 {dimension_numbers = #tpu.dot_dimension_numbers<[1], [0], [0], [1], [0, 0, 1, 1], [], []>} : vector<4x128xbf16>, vector<128x128xbf16>, vector<4x128xf32> -> vector<4x128xf32>
      %202 = arith.addf %196, %201 : vector<4x128xf32>
      %cst_157 = arith.constant dense<0.000000e+00> : vector<4x128xf32>
      %203 = tpu.matmul %69, %190, %cst_157 {dimension_numbers = #tpu.dot_dimension_numbers<[1], [0], [0], [1], [0, 0, 1, 1], [], []>} : vector<4x11xbf16>, vector<11x128xbf16>, vector<4x128xf32> -> vector<4x128xf32>
      %204 = arith.truncf %203 : vector<4x128xf32> to vector<4x128xbf16>
      %c5 = arith.constant 5 : index
      %c0_158 = arith.constant 0 : index
      %c0_159 = arith.constant 0 : index
      %205 = vector.load %arg5[%c5, %c0_158, %c0_159] : memref<9x128x128xbf16, #tpu.memory_space<vmem>>, vector<1x128x128xbf16>
      %206 = vector.shape_cast %205 : vector<1x128x128xbf16> to vector<128x128xbf16>
      %cst_160 = arith.constant dense<0.000000e+00> : vector<4x128xf32>
      %207 = tpu.matmul %204, %206, %cst_160 {dimension_numbers = #tpu.dot_dimension_numbers<[1], [0], [0], [1], [0, 0, 1, 1], [], []>} : vector<4x128xbf16>, vector<128x128xbf16>, vector<4x128xf32> -> vector<4x128xf32>
      %208 = arith.addf %202, %207 : vector<4x128xf32>
      %c2_i32_161 = arith.constant 2 : i32
      %209 = arith.muli %arg13, %c2_i32_161 : i32
      %c10_i32_162 = arith.constant 10 : i32
      %210 = arith.addi %c10_i32_162, %209 : i32
      %c2_i32_163 = arith.constant 2 : i32
      %211 = arith.addi %210, %c2_i32_163 : i32
      %212 = arith.index_cast %211 : i32 to index
      %c0_164 = arith.constant 0 : index
      %c0_165 = arith.constant 0 : index
      %213 = vector.load %arg11[%212, %c0_164, %c0_165] : memref<20x11x128xbf16, #tpu.memory_space<vmem>>, vector<1x11x128xbf16>
      %214 = vector.shape_cast %213 : vector<1x11x128xbf16> to vector<11x128xbf16>
      %cst_166 = arith.constant dense<0.000000e+00> : vector<4x128xf32>
      %215 = tpu.matmul %65, %214, %cst_166 {dimension_numbers = #tpu.dot_dimension_numbers<[1], [0], [0], [1], [0, 0, 1, 1], [], []>} : vector<4x11xbf16>, vector<11x128xbf16>, vector<4x128xf32> -> vector<4x128xf32>
      %216 = arith.truncf %215 : vector<4x128xf32> to vector<4x128xbf16>
      %c6 = arith.constant 6 : index
      %c0_167 = arith.constant 0 : index
      %c0_168 = arith.constant 0 : index
      %217 = vector.load %arg5[%c6, %c0_167, %c0_168] : memref<9x128x128xbf16, #tpu.memory_space<vmem>>, vector<1x128x128xbf16>
      %218 = vector.shape_cast %217 : vector<1x128x128xbf16> to vector<128x128xbf16>
      %cst_169 = arith.constant dense<0.000000e+00> : vector<4x128xf32>
      %219 = tpu.matmul %216, %218, %cst_169 {dimension_numbers = #tpu.dot_dimension_numbers<[1], [0], [0], [1], [0, 0, 1, 1], [], []>} : vector<4x128xbf16>, vector<128x128xbf16>, vector<4x128xf32> -> vector<4x128xf32>
      %220 = arith.addf %208, %219 : vector<4x128xf32>
      %cst_170 = arith.constant dense<0.000000e+00> : vector<4x128xf32>
      %221 = tpu.matmul %67, %214, %cst_170 {dimension_numbers = #tpu.dot_dimension_numbers<[1], [0], [0], [1], [0, 0, 1, 1], [], []>} : vector<4x11xbf16>, vector<11x128xbf16>, vector<4x128xf32> -> vector<4x128xf32>
      %222 = arith.truncf %221 : vector<4x128xf32> to vector<4x128xbf16>
      %c7_171 = arith.constant 7 : index
      %c0_172 = arith.constant 0 : index
      %c0_173 = arith.constant 0 : index
      %223 = vector.load %arg5[%c7_171, %c0_172, %c0_173] : memref<9x128x128xbf16, #tpu.memory_space<vmem>>, vector<1x128x128xbf16>
      %224 = vector.shape_cast %223 : vector<1x128x128xbf16> to vector<128x128xbf16>
      %cst_174 = arith.constant dense<0.000000e+00> : vector<4x128xf32>
      %225 = tpu.matmul %222, %224, %cst_174 {dimension_numbers = #tpu.dot_dimension_numbers<[1], [0], [0], [1], [0, 0, 1, 1], [], []>} : vector<4x128xbf16>, vector<128x128xbf16>, vector<4x128xf32> -> vector<4x128xf32>
      %226 = arith.addf %220, %225 : vector<4x128xf32>
      %cst_175 = arith.constant dense<0.000000e+00> : vector<4x128xf32>
      %227 = tpu.matmul %69, %214, %cst_175 {dimension_numbers = #tpu.dot_dimension_numbers<[1], [0], [0], [1], [0, 0, 1, 1], [], []>} : vector<4x11xbf16>, vector<11x128xbf16>, vector<4x128xf32> -> vector<4x128xf32>
      %228 = arith.truncf %227 : vector<4x128xf32> to vector<4x128xbf16>
      %c8 = arith.constant 8 : index
      %c0_176 = arith.constant 0 : index
      %c0_177 = arith.constant 0 : index
      %229 = vector.load %arg5[%c8, %c0_176, %c0_177] : memref<9x128x128xbf16, #tpu.memory_space<vmem>>, vector<1x128x128xbf16>
      %230 = vector.shape_cast %229 : vector<1x128x128xbf16> to vector<128x128xbf16>
      %cst_178 = arith.constant dense<0.000000e+00> : vector<4x128xf32>
      %231 = tpu.matmul %228, %230, %cst_178 {dimension_numbers = #tpu.dot_dimension_numbers<[1], [0], [0], [1], [0, 0, 1, 1], [], []>} : vector<4x128xbf16>, vector<128x128xbf16>, vector<4x128xf32> -> vector<4x128xf32>
      %232 = arith.addf %226, %231 : vector<4x128xf32>
      %233 = vector.broadcast %61 : vector<1x128xf32> to vector<4x128xf32>
      %234 = arith.addf %232, %233 : vector<4x128xf32>
      %cst_179 = arith.constant dense<0.000000e+00> : vector<128xf32>
      %235 = vector.multi_reduction <add>, %234, %cst_179 [0] : vector<4x128xf32> to vector<128xf32>
      %236 = vector.shape_cast %235 : vector<128xf32> to vector<1x128xf32>
      %237 = arith.addf %arg14, %236 : vector<1x128xf32>
      %238 = arith.mulf %234, %234 : vector<4x128xf32>
      %cst_180 = arith.constant dense<0.000000e+00> : vector<128xf32>
      %239 = vector.multi_reduction <add>, %238, %cst_180 [0] : vector<4x128xf32> to vector<128xf32>
      %240 = vector.shape_cast %239 : vector<128xf32> to vector<1x128xf32>
      %241 = arith.addf %arg15, %240 : vector<1x128xf32>
      %242 = arith.truncf %234 : vector<4x128xf32> to vector<4x128xbf16>
      %c7_i32 = arith.constant 7 : i32
      %243 = arith.addi %c7_i32, %arg13 : i32
      %244 = arith.index_cast %243 : i32 to index
      %c2_181 = arith.constant 2 : index
      %c0_182 = arith.constant 0 : index
      %245 = vector.load %arg12[%244, %c2_181, %c0_182] : memref<12x7x128xbf16, #tpu.memory_space<vmem>>, vector<1x4x128xbf16>
      %246 = vector.shape_cast %245 : vector<1x4x128xbf16> to vector<4x128xbf16>
      %247 = vector.shape_cast %242 : vector<4x128xbf16> to vector<1x4x128xbf16>
      tpu.vector_store %arg12[%244, %c2_181, %c0_182], %247 {strides = array<i32>} : memref<12x7x128xbf16, #tpu.memory_space<vmem>>, vector<1x4x128xbf16>,
      scf.yield %237, %241 : vector<1x128xf32>, vector<1x128xf32>
    }
    %c4_i32_68 = arith.constant 4 : i32
    %cst_69 = arith.constant 3.125000e-02 : f32
    %76 = vector.broadcast %cst_69 : f32 to vector<1x128xf32>
    %77 = arith.mulf %75#0, %76 : vector<1x128xf32>
    %cst_70 = arith.constant 3.125000e-02 : f32
    %78 = vector.broadcast %cst_70 : f32 to vector<1x128xf32>
    %79 = arith.mulf %75#1, %78 : vector<1x128xf32>
    %80 = arith.mulf %77, %77 : vector<1x128xf32>
    %81 = arith.subf %79, %80 : vector<1x128xf32>
    %cst_71 = arith.constant 0.000000e+00 : f32
    %82 = vector.broadcast %cst_71 : f32 to vector<1x128xf32>
    %83 = arith.maximumf %81, %82 : vector<1x128xf32>
    %cst_72 = arith.constant 9.99999974E-6 : f32
    %84 = vector.broadcast %cst_72 : f32 to vector<1x128xf32>
    %85 = arith.addf %83, %84 : vector<1x128xf32>
    %86 = math.rsqrt %85 : vector<1x128xf32>
    %87 = arith.mulf %86, %62 : vector<1x128xf32>
    %88 = arith.mulf %77, %87 : vector<1x128xf32>
    %89 = arith.subf %63, %88 : vector<1x128xf32>
    %90 = vector.shape_cast %87 : vector<1x128xf32> to vector<1x1x128xf32>
    %91 = vector.shape_cast %89 : vector<1x128xf32> to vector<1x1x128xf32>
    %c1_73 = arith.constant 1 : index
    %c2_74 = arith.constant 2 : index
    %c0_75 = arith.constant 0 : index
    %92 = vector.load %arg12[%c1_73, %c2_74, %c0_75] : memref<12x7x128xbf16, #tpu.memory_space<vmem>>, vector<4x4x128xbf16>
    %93 = arith.extf %92 : vector<4x4x128xbf16> to vector<4x4x128xf32>
    %94 = vector.broadcast %90 : vector<1x1x128xf32> to vector<4x4x128xf32>
    %95 = arith.mulf %93, %94 : vector<4x4x128xf32>
    %96 = vector.broadcast %91 : vector<1x1x128xf32> to vector<4x4x128xf32>
    %97 = arith.addf %95, %96 : vector<4x4x128xf32>
    %cst_76 = arith.constant 0.000000e+00 : f32
    %98 = vector.broadcast %cst_76 : f32 to vector<4x4x128xf32>
    %99 = arith.cmpf ogt, %97, %98 : vector<4x4x128xf32>
    %cst_77 = arith.constant 0.00999999977 : f32
    %100 = vector.broadcast %cst_77 : f32 to vector<4x4x128xf32>
    %101 = arith.mulf %100, %97 : vector<4x4x128xf32>
    %102 = arith.select %99, %97, %101 : vector<4x4x128xi1>, vector<4x4x128xf32>
    %103 = arith.truncf %102 : vector<4x4x128xf32> to vector<4x4x128xbf16>
    %c1_78 = arith.constant 1 : index
    %c2_79 = arith.constant 2 : index
    %c0_80 = arith.constant 0 : index
    %104 = vector.load %arg12[%c1_78, %c2_79, %c0_80] : memref<12x7x128xbf16, #tpu.memory_space<vmem>>, vector<4x4x128xbf16>
    tpu.vector_store %arg12[%c1_78, %c2_79, %c0_80], %103 {strides = array<i32>} : memref<12x7x128xbf16, #tpu.memory_space<vmem>>, vector<4x4x128xbf16>,
    %c7 = arith.constant 7 : index
    %c2_81 = arith.constant 2 : index
    %c0_82 = arith.constant 0 : index
    %105 = vector.load %arg12[%c7, %c2_81, %c0_82] : memref<12x7x128xbf16, #tpu.memory_space<vmem>>, vector<4x4x128xbf16>
    %106 = arith.extf %105 : vector<4x4x128xbf16> to vector<4x4x128xf32>
    %107 = vector.broadcast %90 : vector<1x1x128xf32> to vector<4x4x128xf32>
    %108 = arith.mulf %106, %107 : vector<4x4x128xf32>
    %109 = vector.broadcast %91 : vector<1x1x128xf32> to vector<4x4x128xf32>
    %110 = arith.addf %108, %109 : vector<4x4x128xf32>
    %cst_83 = arith.constant 0.000000e+00 : f32
    %111 = vector.broadcast %cst_83 : f32 to vector<4x4x128xf32>
    %112 = arith.cmpf ogt, %110, %111 : vector<4x4x128xf32>
    %cst_84 = arith.constant 0.00999999977 : f32
    %113 = vector.broadcast %cst_84 : f32 to vector<4x4x128xf32>
    %114 = arith.mulf %113, %110 : vector<4x4x128xf32>
    %115 = arith.select %112, %110, %114 : vector<4x4x128xi1>, vector<4x4x128xf32>
    %116 = arith.truncf %115 : vector<4x4x128xf32> to vector<4x4x128xbf16>
    %c7_85 = arith.constant 7 : index
    %c2_86 = arith.constant 2 : index
    %c0_87 = arith.constant 0 : index
    %117 = vector.load %arg12[%c7_85, %c2_86, %c0_87] : memref<12x7x128xbf16, #tpu.memory_space<vmem>>, vector<4x4x128xbf16>
    tpu.vector_store %arg12[%c7_85, %c2_86, %c0_87], %116 {strides = array<i32>} : memref<12x7x128xbf16, #tpu.memory_space<vmem>>, vector<4x4x128xbf16>,
    %c0_88 = arith.constant 0 : index
    %c0_89 = arith.constant 0 : index
    %118 = vector.load %arg9[%c0_88, %c0_89] : memref<3x128xf32, #tpu.memory_space<vmem>>, vector<1x128xf32>
    %c1_90 = arith.constant 1 : index
    %c0_91 = arith.constant 0 : index
    %119 = vector.load %arg9[%c1_90, %c0_91] : memref<3x128xf32, #tpu.memory_space<vmem>>, vector<1x128xf32>
    %c2_92 = arith.constant 2 : index
    %c0_93 = arith.constant 0 : index
    %120 = vector.load %arg9[%c2_92, %c0_93] : memref<3x128xf32, #tpu.memory_space<vmem>>, vector<1x128xf32>
    %c0_94 = arith.constant 0 : index
    %c0_95 = arith.constant 0 : index
    %c0_96 = arith.constant 0 : index
    %121 = vector.load %arg7[%c0_94, %c0_95, %c0_96] : memref<3x2x7xbf16, #tpu.memory_space<vmem>>, vector<1x2x7xbf16>
    %122 = vector.shape_cast %121 : vector<1x2x7xbf16> to vector<2x7xbf16>
    %c1_97 = arith.constant 1 : index
    %c0_98 = arith.constant 0 : index
    %c0_99 = arith.constant 0 : index
    %123 = vector.load %arg7[%c1_97, %c0_98, %c0_99] : memref<3x2x7xbf16, #tpu.memory_space<vmem>>, vector<1x2x7xbf16>
    %124 = vector.shape_cast %123 : vector<1x2x7xbf16> to vector<2x7xbf16>
    %c2_100 = arith.constant 2 : index
    %c0_101 = arith.constant 0 : index
    %c0_102 = arith.constant 0 : index
    %125 = vector.load %arg7[%c2_100, %c0_101, %c0_102] : memref<3x2x7xbf16, #tpu.memory_space<vmem>>, vector<1x2x7xbf16>
    %126 = vector.shape_cast %125 : vector<1x2x7xbf16> to vector<2x7xbf16>
    %cst_103 = arith.constant 0.000000e+00 : f32
    %127 = vector.broadcast %cst_103 : f32 to vector<1x128xf32>
    %cst_104 = arith.constant 0.000000e+00 : f32
    %128 = vector.broadcast %cst_104 : f32 to vector<1x128xf32>
    %c0_i32_105 = arith.constant 0 : i32
    %c2_i32 = arith.constant 2 : i32
    %129 = arith.addi %c0_i32_105, %c2_i32 : i32
    %c1_i32_106 = arith.constant 1 : i32
    %130:2 = scf.for %arg13 = %c0_i32_105 to %129 step %c1_i32_106 iter_args(%arg14 = %127, %arg15 = %128) -> (vector<1x128xf32>, vector<1x128xf32>)  : i32 {
      %cst_124 = arith.constant 0.000000e+00 : f32
      %160 = vector.broadcast %cst_124 : f32 to vector<2x128xf32>
      %c2_i32_125 = arith.constant 2 : i32
      %161 = arith.muli %arg13, %c2_i32_125 : i32
      %c0_i32_126 = arith.constant 0 : i32
      %162 = arith.addi %c0_i32_126, %161 : i32
      %c0_i32_127 = arith.constant 0 : i32
      %163 = arith.addi %162, %c0_i32_127 : i32
      %164 = arith.index_cast %163 : i32 to index
      %c0_128 = arith.constant 0 : index
      %c0_129 = arith.constant 0 : index
      %165 = vector.load %arg12[%164, %c0_128, %c0_129] : memref<12x7x128xbf16, #tpu.memory_space<vmem>>, vector<1x7x128xbf16>
      %166 = vector.shape_cast %165 : vector<1x7x128xbf16> to vector<7x128xbf16>
      %cst_130 = arith.constant dense<0.000000e+00> : vector<2x128xf32>
      %167 = tpu.matmul %122, %166, %cst_130 {dimension_numbers = #tpu.dot_dimension_numbers<[1], [0], [0], [1], [0, 0, 1, 1], [], []>} : vector<2x7xbf16>, vector<7x128xbf16>, vector<2x128xf32> -> vector<2x128xf32>
      %168 = arith.truncf %167 : vector<2x128xf32> to vector<2x128xbf16>
      %c0_131 = arith.constant 0 : index
      %c0_132 = arith.constant 0 : index
      %c0_133 = arith.constant 0 : index
      %169 = vector.load %arg8[%c0_131, %c0_132, %c0_133] : memref<9x128x128xbf16, #tpu.memory_space<vmem>>, vector<1x128x128xbf16>
      %170 = vector.shape_cast %169 : vector<1x128x128xbf16> to vector<128x128xbf16>
      %cst_134 = arith.constant dense<0.000000e+00> : vector<2x128xf32>
      %171 = tpu.matmul %168, %170, %cst_134 {dimension_numbers = #tpu.dot_dimension_numbers<[1], [0], [0], [1], [0, 0, 1, 1], [], []>} : vector<2x128xbf16>, vector<128x128xbf16>, vector<2x128xf32> -> vector<2x128xf32>
      %172 = arith.addf %160, %171 : vector<2x128xf32>
      %cst_135 = arith.constant dense<0.000000e+00> : vector<2x128xf32>
      %173 = tpu.matmul %124, %166, %cst_135 {dimension_numbers = #tpu.dot_dimension_numbers<[1], [0], [0], [1], [0, 0, 1, 1], [], []>} : vector<2x7xbf16>, vector<7x128xbf16>, vector<2x128xf32> -> vector<2x128xf32>
      %174 = arith.truncf %173 : vector<2x128xf32> to vector<2x128xbf16>
      %c1_136 = arith.constant 1 : index
      %c0_137 = arith.constant 0 : index
      %c0_138 = arith.constant 0 : index
      %175 = vector.load %arg8[%c1_136, %c0_137, %c0_138] : memref<9x128x128xbf16, #tpu.memory_space<vmem>>, vector<1x128x128xbf16>
      %176 = vector.shape_cast %175 : vector<1x128x128xbf16> to vector<128x128xbf16>
      %cst_139 = arith.constant dense<0.000000e+00> : vector<2x128xf32>
      %177 = tpu.matmul %174, %176, %cst_139 {dimension_numbers = #tpu.dot_dimension_numbers<[1], [0], [0], [1], [0, 0, 1, 1], [], []>} : vector<2x128xbf16>, vector<128x128xbf16>, vector<2x128xf32> -> vector<2x128xf32>
      %178 = arith.addf %172, %177 : vector<2x128xf32>
      %cst_140 = arith.constant dense<0.000000e+00> : vector<2x128xf32>
      %179 = tpu.matmul %126, %166, %cst_140 {dimension_numbers = #tpu.dot_dimension_numbers<[1], [0], [0], [1], [0, 0, 1, 1], [], []>} : vector<2x7xbf16>, vector<7x128xbf16>, vector<2x128xf32> -> vector<2x128xf32>
      %180 = arith.truncf %179 : vector<2x128xf32> to vector<2x128xbf16>
      %c2_141 = arith.constant 2 : index
      %c0_142 = arith.constant 0 : index
      %c0_143 = arith.constant 0 : index
      %181 = vector.load %arg8[%c2_141, %c0_142, %c0_143] : memref<9x128x128xbf16, #tpu.memory_space<vmem>>, vector<1x128x128xbf16>
      %182 = vector.shape_cast %181 : vector<1x128x128xbf16> to vector<128x128xbf16>
      %cst_144 = arith.constant dense<0.000000e+00> : vector<2x128xf32>
      %183 = tpu.matmul %180, %182, %cst_144 {dimension_numbers = #tpu.dot_dimension_numbers<[1], [0], [0], [1], [0, 0, 1, 1], [], []>} : vector<2x128xbf16>, vector<128x128xbf16>, vector<2x128xf32> -> vector<2x128xf32>
      %184 = arith.addf %178, %183 : vector<2x128xf32>
      %c2_i32_145 = arith.constant 2 : i32
      %185 = arith.muli %arg13, %c2_i32_145 : i32
      %c0_i32_146 = arith.constant 0 : i32
      %186 = arith.addi %c0_i32_146, %185 : i32
      %c1_i32_147 = arith.constant 1 : i32
      %187 = arith.addi %186, %c1_i32_147 : i32
      %188 = arith.index_cast %187 : i32 to index
      %c0_148 = arith.constant 0 : index
      %c0_149 = arith.constant 0 : index
      %189 = vector.load %arg12[%188, %c0_148, %c0_149] : memref<12x7x128xbf16, #tpu.memory_space<vmem>>, vector<1x7x128xbf16>
      %190 = vector.shape_cast %189 : vector<1x7x128xbf16> to vector<7x128xbf16>
      %cst_150 = arith.constant dense<0.000000e+00> : vector<2x128xf32>
      %191 = tpu.matmul %122, %190, %cst_150 {dimension_numbers = #tpu.dot_dimension_numbers<[1], [0], [0], [1], [0, 0, 1, 1], [], []>} : vector<2x7xbf16>, vector<7x128xbf16>, vector<2x128xf32> -> vector<2x128xf32>
      %192 = arith.truncf %191 : vector<2x128xf32> to vector<2x128xbf16>
      %c3 = arith.constant 3 : index
      %c0_151 = arith.constant 0 : index
      %c0_152 = arith.constant 0 : index
      %193 = vector.load %arg8[%c3, %c0_151, %c0_152] : memref<9x128x128xbf16, #tpu.memory_space<vmem>>, vector<1x128x128xbf16>
      %194 = vector.shape_cast %193 : vector<1x128x128xbf16> to vector<128x128xbf16>
      %cst_153 = arith.constant dense<0.000000e+00> : vector<2x128xf32>
      %195 = tpu.matmul %192, %194, %cst_153 {dimension_numbers = #tpu.dot_dimension_numbers<[1], [0], [0], [1], [0, 0, 1, 1], [], []>} : vector<2x128xbf16>, vector<128x128xbf16>, vector<2x128xf32> -> vector<2x128xf32>
      %196 = arith.addf %184, %195 : vector<2x128xf32>
      %cst_154 = arith.constant dense<0.000000e+00> : vector<2x128xf32>
      %197 = tpu.matmul %124, %190, %cst_154 {dimension_numbers = #tpu.dot_dimension_numbers<[1], [0], [0], [1], [0, 0, 1, 1], [], []>} : vector<2x7xbf16>, vector<7x128xbf16>, vector<2x128xf32> -> vector<2x128xf32>
      %198 = arith.truncf %197 : vector<2x128xf32> to vector<2x128xbf16>
      %c4 = arith.constant 4 : index
      %c0_155 = arith.constant 0 : index
      %c0_156 = arith.constant 0 : index
      %199 = vector.load %arg8[%c4, %c0_155, %c0_156] : memref<9x128x128xbf16, #tpu.memory_space<vmem>>, vector<1x128x128xbf16>
      %200 = vector.shape_cast %199 : vector<1x128x128xbf16> to vector<128x128xbf16>
      %cst_157 = arith.constant dense<0.000000e+00> : vector<2x128xf32>
      %201 = tpu.matmul %198, %200, %cst_157 {dimension_numbers = #tpu.dot_dimension_numbers<[1], [0], [0], [1], [0, 0, 1, 1], [], []>} : vector<2x128xbf16>, vector<128x128xbf16>, vector<2x128xf32> -> vector<2x128xf32>
      %202 = arith.addf %196, %201 : vector<2x128xf32>
      %cst_158 = arith.constant dense<0.000000e+00> : vector<2x128xf32>
      %203 = tpu.matmul %126, %190, %cst_158 {dimension_numbers = #tpu.dot_dimension_numbers<[1], [0], [0], [1], [0, 0, 1, 1], [], []>} : vector<2x7xbf16>, vector<7x128xbf16>, vector<2x128xf32> -> vector<2x128xf32>
      %204 = arith.truncf %203 : vector<2x128xf32> to vector<2x128xbf16>
      %c5 = arith.constant 5 : index
      %c0_159 = arith.constant 0 : index
      %c0_160 = arith.constant 0 : index
      %205 = vector.load %arg8[%c5, %c0_159, %c0_160] : memref<9x128x128xbf16, #tpu.memory_space<vmem>>, vector<1x128x128xbf16>
      %206 = vector.shape_cast %205 : vector<1x128x128xbf16> to vector<128x128xbf16>
      %cst_161 = arith.constant dense<0.000000e+00> : vector<2x128xf32>
      %207 = tpu.matmul %204, %206, %cst_161 {dimension_numbers = #tpu.dot_dimension_numbers<[1], [0], [0], [1], [0, 0, 1, 1], [], []>} : vector<2x128xbf16>, vector<128x128xbf16>, vector<2x128xf32> -> vector<2x128xf32>
      %208 = arith.addf %202, %207 : vector<2x128xf32>
      %c2_i32_162 = arith.constant 2 : i32
      %209 = arith.muli %arg13, %c2_i32_162 : i32
      %c0_i32_163 = arith.constant 0 : i32
      %210 = arith.addi %c0_i32_163, %209 : i32
      %c2_i32_164 = arith.constant 2 : i32
      %211 = arith.addi %210, %c2_i32_164 : i32
      %212 = arith.index_cast %211 : i32 to index
      %c0_165 = arith.constant 0 : index
      %c0_166 = arith.constant 0 : index
      %213 = vector.load %arg12[%212, %c0_165, %c0_166] : memref<12x7x128xbf16, #tpu.memory_space<vmem>>, vector<1x7x128xbf16>
      %214 = vector.shape_cast %213 : vector<1x7x128xbf16> to vector<7x128xbf16>
      %cst_167 = arith.constant dense<0.000000e+00> : vector<2x128xf32>
      %215 = tpu.matmul %122, %214, %cst_167 {dimension_numbers = #tpu.dot_dimension_numbers<[1], [0], [0], [1], [0, 0, 1, 1], [], []>} : vector<2x7xbf16>, vector<7x128xbf16>, vector<2x128xf32> -> vector<2x128xf32>
      %216 = arith.truncf %215 : vector<2x128xf32> to vector<2x128xbf16>
      %c6 = arith.constant 6 : index
      %c0_168 = arith.constant 0 : index
      %c0_169 = arith.constant 0 : index
      %217 = vector.load %arg8[%c6, %c0_168, %c0_169] : memref<9x128x128xbf16, #tpu.memory_space<vmem>>, vector<1x128x128xbf16>
      %218 = vector.shape_cast %217 : vector<1x128x128xbf16> to vector<128x128xbf16>
      %cst_170 = arith.constant dense<0.000000e+00> : vector<2x128xf32>
      %219 = tpu.matmul %216, %218, %cst_170 {dimension_numbers = #tpu.dot_dimension_numbers<[1], [0], [0], [1], [0, 0, 1, 1], [], []>} : vector<2x128xbf16>, vector<128x128xbf16>, vector<2x128xf32> -> vector<2x128xf32>
      %220 = arith.addf %208, %219 : vector<2x128xf32>
      %cst_171 = arith.constant dense<0.000000e+00> : vector<2x128xf32>
      %221 = tpu.matmul %124, %214, %cst_171 {dimension_numbers = #tpu.dot_dimension_numbers<[1], [0], [0], [1], [0, 0, 1, 1], [], []>} : vector<2x7xbf16>, vector<7x128xbf16>, vector<2x128xf32> -> vector<2x128xf32>
      %222 = arith.truncf %221 : vector<2x128xf32> to vector<2x128xbf16>
      %c7_172 = arith.constant 7 : index
      %c0_173 = arith.constant 0 : index
      %c0_174 = arith.constant 0 : index
      %223 = vector.load %arg8[%c7_172, %c0_173, %c0_174] : memref<9x128x128xbf16, #tpu.memory_space<vmem>>, vector<1x128x128xbf16>
      %224 = vector.shape_cast %223 : vector<1x128x128xbf16> to vector<128x128xbf16>
      %cst_175 = arith.constant dense<0.000000e+00> : vector<2x128xf32>
      %225 = tpu.matmul %222, %224, %cst_175 {dimension_numbers = #tpu.dot_dimension_numbers<[1], [0], [0], [1], [0, 0, 1, 1], [], []>} : vector<2x128xbf16>, vector<128x128xbf16>, vector<2x128xf32> -> vector<2x128xf32>
      %226 = arith.addf %220, %225 : vector<2x128xf32>
      %cst_176 = arith.constant dense<0.000000e+00> : vector<2x128xf32>
      %227 = tpu.matmul %126, %214, %cst_176 {dimension_numbers = #tpu.dot_dimension_numbers<[1], [0], [0], [1], [0, 0, 1, 1], [], []>} : vector<2x7xbf16>, vector<7x128xbf16>, vector<2x128xf32> -> vector<2x128xf32>
      %228 = arith.truncf %227 : vector<2x128xf32> to vector<2x128xbf16>
      %c8 = arith.constant 8 : index
      %c0_177 = arith.constant 0 : index
      %c0_178 = arith.constant 0 : index
      %229 = vector.load %arg8[%c8, %c0_177, %c0_178] : memref<9x128x128xbf16, #tpu.memory_space<vmem>>, vector<1x128x128xbf16>
      %230 = vector.shape_cast %229 : vector<1x128x128xbf16> to vector<128x128xbf16>
      %cst_179 = arith.constant dense<0.000000e+00> : vector<2x128xf32>
      %231 = tpu.matmul %228, %230, %cst_179 {dimension_numbers = #tpu.dot_dimension_numbers<[1], [0], [0], [1], [0, 0, 1, 1], [], []>} : vector<2x128xbf16>, vector<128x128xbf16>, vector<2x128xf32> -> vector<2x128xf32>
      %232 = arith.addf %226, %231 : vector<2x128xf32>
      %233 = vector.broadcast %118 : vector<1x128xf32> to vector<2x128xf32>
      %234 = arith.addf %232, %233 : vector<2x128xf32>
      %cst_180 = arith.constant dense<0.000000e+00> : vector<128xf32>
      %235 = vector.multi_reduction <add>, %234, %cst_180 [0] : vector<2x128xf32> to vector<128xf32>
      %236 = vector.shape_cast %235 : vector<128xf32> to vector<1x128xf32>
      %237 = arith.addf %arg14, %236 : vector<1x128xf32>
      %238 = arith.mulf %234, %234 : vector<2x128xf32>
      %cst_181 = arith.constant dense<0.000000e+00> : vector<128xf32>
      %239 = vector.multi_reduction <add>, %238, %cst_181 [0] : vector<2x128xf32> to vector<128xf32>
      %240 = vector.shape_cast %239 : vector<128xf32> to vector<1x128xf32>
      %241 = arith.addf %arg15, %240 : vector<1x128xf32>
      %c0_i32_182 = arith.constant 0 : i32
      %242 = arith.addi %c0_i32_182, %arg13 : i32
      %243 = arith.index_cast %242 : i32 to index
      %c0_183 = arith.constant 0 : index
      %c0_184 = arith.constant 0 : index
      %244 = vector.load %arg10[%243, %c0_183, %c0_184] : memref<4x2x128xf32, #tpu.memory_space<vmem>>, vector<1x2x128xf32>
      %245 = vector.shape_cast %244 : vector<1x2x128xf32> to vector<2x128xf32>
      %246 = vector.shape_cast %234 : vector<2x128xf32> to vector<1x2x128xf32>
      tpu.vector_store %arg10[%243, %c0_183, %c0_184], %246 {strides = array<i32>} : memref<4x2x128xf32, #tpu.memory_space<vmem>>, vector<1x2x128xf32>,
      scf.yield %237, %241 : vector<1x128xf32>, vector<1x128xf32>
    }
    %c2_i32_107 = arith.constant 2 : i32
    %c0_i32_108 = arith.constant 0 : i32
    %c2_i32_109 = arith.constant 2 : i32
    %131 = arith.addi %c0_i32_108, %c2_i32_109 : i32
    %c1_i32_110 = arith.constant 1 : i32
    %132:2 = scf.for %arg13 = %c0_i32_108 to %131 step %c1_i32_110 iter_args(%arg14 = %130#0, %arg15 = %130#1) -> (vector<1x128xf32>, vector<1x128xf32>)  : i32 {
      %cst_124 = arith.constant 0.000000e+00 : f32
      %160 = vector.broadcast %cst_124 : f32 to vector<2x128xf32>
      %c2_i32_125 = arith.constant 2 : i32
      %161 = arith.muli %arg13, %c2_i32_125 : i32
      %c6_i32 = arith.constant 6 : i32
      %162 = arith.addi %c6_i32, %161 : i32
      %c0_i32_126 = arith.constant 0 : i32
      %163 = arith.addi %162, %c0_i32_126 : i32
      %164 = arith.index_cast %163 : i32 to index
      %c0_127 = arith.constant 0 : index
      %c0_128 = arith.constant 0 : index
      %165 = vector.load %arg12[%164, %c0_127, %c0_128] : memref<12x7x128xbf16, #tpu.memory_space<vmem>>, vector<1x7x128xbf16>
      %166 = vector.shape_cast %165 : vector<1x7x128xbf16> to vector<7x128xbf16>
      %cst_129 = arith.constant dense<0.000000e+00> : vector<2x128xf32>
      %167 = tpu.matmul %122, %166, %cst_129 {dimension_numbers = #tpu.dot_dimension_numbers<[1], [0], [0], [1], [0, 0, 1, 1], [], []>} : vector<2x7xbf16>, vector<7x128xbf16>, vector<2x128xf32> -> vector<2x128xf32>
      %168 = arith.truncf %167 : vector<2x128xf32> to vector<2x128xbf16>
      %c0_130 = arith.constant 0 : index
      %c0_131 = arith.constant 0 : index
      %c0_132 = arith.constant 0 : index
      %169 = vector.load %arg8[%c0_130, %c0_131, %c0_132] : memref<9x128x128xbf16, #tpu.memory_space<vmem>>, vector<1x128x128xbf16>
      %170 = vector.shape_cast %169 : vector<1x128x128xbf16> to vector<128x128xbf16>
      %cst_133 = arith.constant dense<0.000000e+00> : vector<2x128xf32>
      %171 = tpu.matmul %168, %170, %cst_133 {dimension_numbers = #tpu.dot_dimension_numbers<[1], [0], [0], [1], [0, 0, 1, 1], [], []>} : vector<2x128xbf16>, vector<128x128xbf16>, vector<2x128xf32> -> vector<2x128xf32>
      %172 = arith.addf %160, %171 : vector<2x128xf32>
      %cst_134 = arith.constant dense<0.000000e+00> : vector<2x128xf32>
      %173 = tpu.matmul %124, %166, %cst_134 {dimension_numbers = #tpu.dot_dimension_numbers<[1], [0], [0], [1], [0, 0, 1, 1], [], []>} : vector<2x7xbf16>, vector<7x128xbf16>, vector<2x128xf32> -> vector<2x128xf32>
      %174 = arith.truncf %173 : vector<2x128xf32> to vector<2x128xbf16>
      %c1_135 = arith.constant 1 : index
      %c0_136 = arith.constant 0 : index
      %c0_137 = arith.constant 0 : index
      %175 = vector.load %arg8[%c1_135, %c0_136, %c0_137] : memref<9x128x128xbf16, #tpu.memory_space<vmem>>, vector<1x128x128xbf16>
      %176 = vector.shape_cast %175 : vector<1x128x128xbf16> to vector<128x128xbf16>
      %cst_138 = arith.constant dense<0.000000e+00> : vector<2x128xf32>
      %177 = tpu.matmul %174, %176, %cst_138 {dimension_numbers = #tpu.dot_dimension_numbers<[1], [0], [0], [1], [0, 0, 1, 1], [], []>} : vector<2x128xbf16>, vector<128x128xbf16>, vector<2x128xf32> -> vector<2x128xf32>
      %178 = arith.addf %172, %177 : vector<2x128xf32>
      %cst_139 = arith.constant dense<0.000000e+00> : vector<2x128xf32>
      %179 = tpu.matmul %126, %166, %cst_139 {dimension_numbers = #tpu.dot_dimension_numbers<[1], [0], [0], [1], [0, 0, 1, 1], [], []>} : vector<2x7xbf16>, vector<7x128xbf16>, vector<2x128xf32> -> vector<2x128xf32>
      %180 = arith.truncf %179 : vector<2x128xf32> to vector<2x128xbf16>
      %c2_140 = arith.constant 2 : index
      %c0_141 = arith.constant 0 : index
      %c0_142 = arith.constant 0 : index
      %181 = vector.load %arg8[%c2_140, %c0_141, %c0_142] : memref<9x128x128xbf16, #tpu.memory_space<vmem>>, vector<1x128x128xbf16>
      %182 = vector.shape_cast %181 : vector<1x128x128xbf16> to vector<128x128xbf16>
      %cst_143 = arith.constant dense<0.000000e+00> : vector<2x128xf32>
      %183 = tpu.matmul %180, %182, %cst_143 {dimension_numbers = #tpu.dot_dimension_numbers<[1], [0], [0], [1], [0, 0, 1, 1], [], []>} : vector<2x128xbf16>, vector<128x128xbf16>, vector<2x128xf32> -> vector<2x128xf32>
      %184 = arith.addf %178, %183 : vector<2x128xf32>
      %c2_i32_144 = arith.constant 2 : i32
      %185 = arith.muli %arg13, %c2_i32_144 : i32
      %c6_i32_145 = arith.constant 6 : i32
      %186 = arith.addi %c6_i32_145, %185 : i32
      %c1_i32_146 = arith.constant 1 : i32
      %187 = arith.addi %186, %c1_i32_146 : i32
      %188 = arith.index_cast %187 : i32 to index
      %c0_147 = arith.constant 0 : index
      %c0_148 = arith.constant 0 : index
      %189 = vector.load %arg12[%188, %c0_147, %c0_148] : memref<12x7x128xbf16, #tpu.memory_space<vmem>>, vector<1x7x128xbf16>
      %190 = vector.shape_cast %189 : vector<1x7x128xbf16> to vector<7x128xbf16>
      %cst_149 = arith.constant dense<0.000000e+00> : vector<2x128xf32>
      %191 = tpu.matmul %122, %190, %cst_149 {dimension_numbers = #tpu.dot_dimension_numbers<[1], [0], [0], [1], [0, 0, 1, 1], [], []>} : vector<2x7xbf16>, vector<7x128xbf16>, vector<2x128xf32> -> vector<2x128xf32>
      %192 = arith.truncf %191 : vector<2x128xf32> to vector<2x128xbf16>
      %c3 = arith.constant 3 : index
      %c0_150 = arith.constant 0 : index
      %c0_151 = arith.constant 0 : index
      %193 = vector.load %arg8[%c3, %c0_150, %c0_151] : memref<9x128x128xbf16, #tpu.memory_space<vmem>>, vector<1x128x128xbf16>
      %194 = vector.shape_cast %193 : vector<1x128x128xbf16> to vector<128x128xbf16>
      %cst_152 = arith.constant dense<0.000000e+00> : vector<2x128xf32>
      %195 = tpu.matmul %192, %194, %cst_152 {dimension_numbers = #tpu.dot_dimension_numbers<[1], [0], [0], [1], [0, 0, 1, 1], [], []>} : vector<2x128xbf16>, vector<128x128xbf16>, vector<2x128xf32> -> vector<2x128xf32>
      %196 = arith.addf %184, %195 : vector<2x128xf32>
      %cst_153 = arith.constant dense<0.000000e+00> : vector<2x128xf32>
      %197 = tpu.matmul %124, %190, %cst_153 {dimension_numbers = #tpu.dot_dimension_numbers<[1], [0], [0], [1], [0, 0, 1, 1], [], []>} : vector<2x7xbf16>, vector<7x128xbf16>, vector<2x128xf32> -> vector<2x128xf32>
      %198 = arith.truncf %197 : vector<2x128xf32> to vector<2x128xbf16>
      %c4 = arith.constant 4 : index
      %c0_154 = arith.constant 0 : index
      %c0_155 = arith.constant 0 : index
      %199 = vector.load %arg8[%c4, %c0_154, %c0_155] : memref<9x128x128xbf16, #tpu.memory_space<vmem>>, vector<1x128x128xbf16>
      %200 = vector.shape_cast %199 : vector<1x128x128xbf16> to vector<128x128xbf16>
      %cst_156 = arith.constant dense<0.000000e+00> : vector<2x128xf32>
      %201 = tpu.matmul %198, %200, %cst_156 {dimension_numbers = #tpu.dot_dimension_numbers<[1], [0], [0], [1], [0, 0, 1, 1], [], []>} : vector<2x128xbf16>, vector<128x128xbf16>, vector<2x128xf32> -> vector<2x128xf32>
      %202 = arith.addf %196, %201 : vector<2x128xf32>
      %cst_157 = arith.constant dense<0.000000e+00> : vector<2x128xf32>
      %203 = tpu.matmul %126, %190, %cst_157 {dimension_numbers = #tpu.dot_dimension_numbers<[1], [0], [0], [1], [0, 0, 1, 1], [], []>} : vector<2x7xbf16>, vector<7x128xbf16>, vector<2x128xf32> -> vector<2x128xf32>
      %204 = arith.truncf %203 : vector<2x128xf32> to vector<2x128xbf16>
      %c5 = arith.constant 5 : index
      %c0_158 = arith.constant 0 : index
      %c0_159 = arith.constant 0 : index
      %205 = vector.load %arg8[%c5, %c0_158, %c0_159] : memref<9x128x128xbf16, #tpu.memory_space<vmem>>, vector<1x128x128xbf16>
      %206 = vector.shape_cast %205 : vector<1x128x128xbf16> to vector<128x128xbf16>
      %cst_160 = arith.constant dense<0.000000e+00> : vector<2x128xf32>
      %207 = tpu.matmul %204, %206, %cst_160 {dimension_numbers = #tpu.dot_dimension_numbers<[1], [0], [0], [1], [0, 0, 1, 1], [], []>} : vector<2x128xbf16>, vector<128x128xbf16>, vector<2x128xf32> -> vector<2x128xf32>
      %208 = arith.addf %202, %207 : vector<2x128xf32>
      %c2_i32_161 = arith.constant 2 : i32
      %209 = arith.muli %arg13, %c2_i32_161 : i32
      %c6_i32_162 = arith.constant 6 : i32
      %210 = arith.addi %c6_i32_162, %209 : i32
      %c2_i32_163 = arith.constant 2 : i32
      %211 = arith.addi %210, %c2_i32_163 : i32
      %212 = arith.index_cast %211 : i32 to index
      %c0_164 = arith.constant 0 : index
      %c0_165 = arith.constant 0 : index
      %213 = vector.load %arg12[%212, %c0_164, %c0_165] : memref<12x7x128xbf16, #tpu.memory_space<vmem>>, vector<1x7x128xbf16>
      %214 = vector.shape_cast %213 : vector<1x7x128xbf16> to vector<7x128xbf16>
      %cst_166 = arith.constant dense<0.000000e+00> : vector<2x128xf32>
      %215 = tpu.matmul %122, %214, %cst_166 {dimension_numbers = #tpu.dot_dimension_numbers<[1], [0], [0], [1], [0, 0, 1, 1], [], []>} : vector<2x7xbf16>, vector<7x128xbf16>, vector<2x128xf32> -> vector<2x128xf32>
      %216 = arith.truncf %215 : vector<2x128xf32> to vector<2x128xbf16>
      %c6 = arith.constant 6 : index
      %c0_167 = arith.constant 0 : index
      %c0_168 = arith.constant 0 : index
      %217 = vector.load %arg8[%c6, %c0_167, %c0_168] : memref<9x128x128xbf16, #tpu.memory_space<vmem>>, vector<1x128x128xbf16>
      %218 = vector.shape_cast %217 : vector<1x128x128xbf16> to vector<128x128xbf16>
      %cst_169 = arith.constant dense<0.000000e+00> : vector<2x128xf32>
      %219 = tpu.matmul %216, %218, %cst_169 {dimension_numbers = #tpu.dot_dimension_numbers<[1], [0], [0], [1], [0, 0, 1, 1], [], []>} : vector<2x128xbf16>, vector<128x128xbf16>, vector<2x128xf32> -> vector<2x128xf32>
      %220 = arith.addf %208, %219 : vector<2x128xf32>
      %cst_170 = arith.constant dense<0.000000e+00> : vector<2x128xf32>
      %221 = tpu.matmul %124, %214, %cst_170 {dimension_numbers = #tpu.dot_dimension_numbers<[1], [0], [0], [1], [0, 0, 1, 1], [], []>} : vector<2x7xbf16>, vector<7x128xbf16>, vector<2x128xf32> -> vector<2x128xf32>
      %222 = arith.truncf %221 : vector<2x128xf32> to vector<2x128xbf16>
      %c7_171 = arith.constant 7 : index
      %c0_172 = arith.constant 0 : index
      %c0_173 = arith.constant 0 : index
      %223 = vector.load %arg8[%c7_171, %c0_172, %c0_173] : memref<9x128x128xbf16, #tpu.memory_space<vmem>>, vector<1x128x128xbf16>
      %224 = vector.shape_cast %223 : vector<1x128x128xbf16> to vector<128x128xbf16>
      %cst_174 = arith.constant dense<0.000000e+00> : vector<2x128xf32>
      %225 = tpu.matmul %222, %224, %cst_174 {dimension_numbers = #tpu.dot_dimension_numbers<[1], [0], [0], [1], [0, 0, 1, 1], [], []>} : vector<2x128xbf16>, vector<128x128xbf16>, vector<2x128xf32> -> vector<2x128xf32>
      %226 = arith.addf %220, %225 : vector<2x128xf32>
      %cst_175 = arith.constant dense<0.000000e+00> : vector<2x128xf32>
      %227 = tpu.matmul %126, %214, %cst_175 {dimension_numbers = #tpu.dot_dimension_numbers<[1], [0], [0], [1], [0, 0, 1, 1], [], []>} : vector<2x7xbf16>, vector<7x128xbf16>, vector<2x128xf32> -> vector<2x128xf32>
      %228 = arith.truncf %227 : vector<2x128xf32> to vector<2x128xbf16>
      %c8 = arith.constant 8 : index
      %c0_176 = arith.constant 0 : index
      %c0_177 = arith.constant 0 : index
      %229 = vector.load %arg8[%c8, %c0_176, %c0_177] : memref<9x128x128xbf16, #tpu.memory_space<vmem>>, vector<1x128x128xbf16>
      %230 = vector.shape_cast %229 : vector<1x128x128xbf16> to vector<128x128xbf16>
      %cst_178 = arith.constant dense<0.000000e+00> : vector<2x128xf32>
      %231 = tpu.matmul %228, %230, %cst_178 {dimension_numbers = #tpu.dot_dimension_numbers<[1], [0], [0], [1], [0, 0, 1, 1], [], []>} : vector<2x128xbf16>, vector<128x128xbf16>, vector<2x128xf32> -> vector<2x128xf32>
      %232 = arith.addf %226, %231 : vector<2x128xf32>
      %233 = vector.broadcast %118 : vector<1x128xf32> to vector<2x128xf32>
      %234 = arith.addf %232, %233 : vector<2x128xf32>
      %cst_179 = arith.constant dense<0.000000e+00> : vector<128xf32>
      %235 = vector.multi_reduction <add>, %234, %cst_179 [0] : vector<2x128xf32> to vector<128xf32>
      %236 = vector.shape_cast %235 : vector<128xf32> to vector<1x128xf32>
      %237 = arith.addf %arg14, %236 : vector<1x128xf32>
      %238 = arith.mulf %234, %234 : vector<2x128xf32>
      %cst_180 = arith.constant dense<0.000000e+00> : vector<128xf32>
      %239 = vector.multi_reduction <add>, %238, %cst_180 [0] : vector<2x128xf32> to vector<128xf32>
      %240 = vector.shape_cast %239 : vector<128xf32> to vector<1x128xf32>
      %241 = arith.addf %arg15, %240 : vector<1x128xf32>
      %c2_i32_181 = arith.constant 2 : i32
      %242 = arith.addi %c2_i32_181, %arg13 : i32
      %243 = arith.index_cast %242 : i32 to index
      %c0_182 = arith.constant 0 : index
      %c0_183 = arith.constant 0 : index
      %244 = vector.load %arg10[%243, %c0_182, %c0_183] : memref<4x2x128xf32, #tpu.memory_space<vmem>>, vector<1x2x128xf32>
      %245 = vector.shape_cast %244 : vector<1x2x128xf32> to vector<2x128xf32>
      %246 = vector.shape_cast %234 : vector<2x128xf32> to vector<1x2x128xf32>
      tpu.vector_store %arg10[%243, %c0_182, %c0_183], %246 {strides = array<i32>} : memref<4x2x128xf32, #tpu.memory_space<vmem>>, vector<1x2x128xf32>,
      scf.yield %237, %241 : vector<1x128xf32>, vector<1x128xf32>
    }
    %c2_i32_111 = arith.constant 2 : i32
    %cst_112 = arith.constant 1.250000e-01 : f32
    %133 = vector.broadcast %cst_112 : f32 to vector<1x128xf32>
    %134 = arith.mulf %132#0, %133 : vector<1x128xf32>
    %cst_113 = arith.constant 1.250000e-01 : f32
    %135 = vector.broadcast %cst_113 : f32 to vector<1x128xf32>
    %136 = arith.mulf %132#1, %135 : vector<1x128xf32>
    %137 = arith.mulf %134, %134 : vector<1x128xf32>
    %138 = arith.subf %136, %137 : vector<1x128xf32>
    %cst_114 = arith.constant 0.000000e+00 : f32
    %139 = vector.broadcast %cst_114 : f32 to vector<1x128xf32>
    %140 = arith.maximumf %138, %139 : vector<1x128xf32>
    %cst_115 = arith.constant 9.99999974E-6 : f32
    %141 = vector.broadcast %cst_115 : f32 to vector<1x128xf32>
    %142 = arith.addf %140, %141 : vector<1x128xf32>
    %143 = math.rsqrt %142 : vector<1x128xf32>
    %144 = arith.mulf %143, %119 : vector<1x128xf32>
    %145 = arith.mulf %134, %144 : vector<1x128xf32>
    %146 = arith.subf %120, %145 : vector<1x128xf32>
    %147 = vector.shape_cast %144 : vector<1x128xf32> to vector<1x1x128xf32>
    %148 = vector.shape_cast %146 : vector<1x128xf32> to vector<1x1x128xf32>
    %c0_116 = arith.constant 0 : index
    %c0_117 = arith.constant 0 : index
    %c0_118 = arith.constant 0 : index
    %149 = vector.load %arg10[%c0_116, %c0_117, %c0_118] : memref<4x2x128xf32, #tpu.memory_space<vmem>>, vector<4x2x128xf32>
    %150 = vector.broadcast %147 : vector<1x1x128xf32> to vector<4x2x128xf32>
    %151 = arith.mulf %149, %150 : vector<4x2x128xf32>
    %152 = vector.broadcast %148 : vector<1x1x128xf32> to vector<4x2x128xf32>
    %153 = arith.addf %151, %152 : vector<4x2x128xf32>
    %cst_119 = arith.constant 0.000000e+00 : f32
    %154 = vector.broadcast %cst_119 : f32 to vector<4x2x128xf32>
    %155 = arith.cmpf ogt, %153, %154 : vector<4x2x128xf32>
    %cst_120 = arith.constant 0.00999999977 : f32
    %156 = vector.broadcast %cst_120 : f32 to vector<4x2x128xf32>
    %157 = arith.mulf %156, %153 : vector<4x2x128xf32>
    %158 = arith.select %155, %153, %157 : vector<4x2x128xi1>, vector<4x2x128xf32>
    %c0_121 = arith.constant 0 : index
    %c0_122 = arith.constant 0 : index
    %c0_123 = arith.constant 0 : index
    %159 = vector.load %arg10[%c0_121, %c0_122, %c0_123] : memref<4x2x128xf32, #tpu.memory_space<vmem>>, vector<4x2x128xf32>
    tpu.vector_store %arg10[%c0_121, %c0_122, %c0_123], %158 {strides = array<i32>} : memref<4x2x128xf32, #tpu.memory_space<vmem>>, vector<4x2x128xf32>,
    return
  }
}

</mosaic_0001>

<bundles_post_ra>
// kernel: _lambda_.1
= control target key start
LH: loop header
LB: loop body
LE: loop exit
PB: predicated region body
PF: predicated region fallthrough
CT: control target
= control target key end

     0   :  { %15 = vsyncpa [#allocation5], 0  ;;  %s7847_s16 = smov [#allocation4]   ;;  %s7848_s18 = smov 16   ;;  %s9612_s0 = inlined_call_operand.vmem [shape: bf16[36,19,4], index: 0, kind: input, shape index: {}]   ;;  %s9613_s1 = inlined_call_operand.vmem [shape: bf16[3,8,19], index: 1, kind: input, shape index: {}]   ;;  %s9614_s2 = inlined_call_operand.vmem [shape: bf16[9,4,128], index: 2, kind: input, shape index: {}]   ;;  %s9615_s3 = inlined_call_operand.vmem [shape: f32[3,128], index: 3, kind: input, shape index: {}]   ;;  %s9616_s4 = inlined_call_operand.vmem [shape: bf16[3,4,11], index: 4, kind: input, shape index: {}]   ;;  %s9617_s5 = inlined_call_operand.vmem [shape: bf16[9,128,128], index: 5, kind: input, shape index: {}]   ;;  %s9618_s6 = inlined_call_operand.vmem [shape: f32[3,128], index: 6, kind: input, shape index: {}]   ;;  %s9619_s7 = inlined_call_operand.hbm [shape: bf16[3,2,7], index: 7, kind: input, shape index: {}]   ;;  %s9620_s8 = inlined_call_operand.vmem [shape: bf16[9,128,128], index: 8, kind: input, shape index: {}]   ;;  %s9621_s9 = inlined_call_operand.vmem [shape: f32[3,128], index: 9, kind: input, shape index: {}]   ;;  %s9622_s10 = inlined_call_operand.vmem [shape: f32[4,2,128], index: 10, kind: output, shape index: {}]  }
   0x1   :  { %s34_s15 = sshll.u32 %s9619_s7, 4  ;;  %s36_s17 = sshll.u32 %s7847_s16, 4  ;;  %s35_s15 = int_to_ptr.hbm [resolvable:$true] %s34_s15  ;;  %s37_s17 = int_to_ptr.vmem [resolvable:$true] %s36_s17 }
   0x2   :  { %s7849_s19 = smov 1  }
   0x3   :  { %42 = dma.hbm_to_vmem [thread:$0]  %s35_s15, 48, %s37_s17, [#allocation5], %s7848_s18, %s7848_s18, %s7849_s19  }
   0x4   :  { %7773 = dma.done.wait [#allocation5], 48  }
   0x5   :  { %7774 = vsyncadd [#allocation5], 4294967248  ;;  %v7850_v0 = vmov 0   ;;  %v7915_v1 = vld [vmem:[%s9615_s3] sm:$0x1]  ;;  %vm53_vm0 = vcmask 1041408  }
   0x6   :  { %52 = vst [vmem:[#allocation2] sm:$0xf] %v7850_v0  ;;  %v7920_v2 = vld [vmem:[%s9615_s3 + $0x1] sm:$0x1]  ;;  %v7925_v3 = vld [vmem:[%s9615_s3 + $0x2] sm:$0x1] }
   0x7   :  { %59 = vst [vmem:[#allocation2 + $0x8] sm:$0xf] %v7850_v0  ;;  %v7930_v4 = vld [vmem:[%s9613_s1] sm:$0xf]  ;;  %v7935_v5 = vld [vmem:[%s9613_s1 + $0x4] sm:$0xf] }
   0x8   :  { %63 = vst [vmem:[#allocation2 + $0x10] sm:$0xf] %v7850_v0  ;;  %v7940_v6 = vld [vmem:[%s9613_s1 + $0x8] sm:$0xf]  ;;  %vm54_vm1 = vsmask.f32 1280 }
   0x9   :  { %67 = vst [vmem:[#allocation2 + $0x18] sm:$0xf] %v7850_v0  ;;  %vm7943_vm2 = vmand %vm53_vm0, %vm54_vm1  ;;  %v56_v8 = vld [vmem:[#allocation2 + $0x4] sm:$0x3]  ;;  %v60_v9 = vld [vmem:[#allocation2 + $0xc] sm:$0x3] }
   0xa   :  { %71 = vst [vmem:[#allocation2 + $0x20] sm:$0xf] %v7850_v0  ;;  %v64_v10 = vld [vmem:[#allocation2 + $0x14] sm:$0x3]  ;;  %v57_v11 = vsel %vm7943_vm2, 0, %v56_v8  ;;  %v61_v13 = vsel %vm7943_vm2, 0, %v60_v9 }
   0xb   :  { %75 = vst [vmem:[#allocation2 + $0x28] sm:$0xf] %v7850_v0  ;;  %v68_v12 = vld [vmem:[#allocation2 + $0x1c] sm:$0x3]  ;;  %v65_v14 = vsel %vm7943_vm2, 0, %v64_v10  ;;  %vm135_vm3 = vcmask 1043456  }
   0xc   :  { %79 = vst [vmem:[#allocation2 + $0x30] sm:$0xf] %v7850_v0  ;;  %v72_v15 = vld [vmem:[#allocation2 + $0x24] sm:$0x3]  ;;  %v76_v16 = vld [vmem:[#allocation2 + $0x2c] sm:$0x3] }
   0xd   :  { %83 = vst [vmem:[#allocation2 + $0x38] sm:$0xf] %v7850_v0  ;;  %v80_v17 = vld [vmem:[#allocation2 + $0x34] sm:$0x3]  ;;  %v69_v18 = vsel %vm7943_vm2, 0, %v68_v12  ;;  %v73_v19 = vsel %vm7943_vm2, 0, %v72_v15 }
   0xe   :  { %87 = vst [vmem:[#allocation2 + $0x40] sm:$0xf] %v7850_v0  ;;  %v84_v20 = vld [vmem:[#allocation2 + $0x3c] sm:$0x3]  ;;  %v77_v21 = vsel %vm7943_vm2, 0, %v76_v16  ;;  %v81_v22 = vsel %vm7943_vm2, 0, %v80_v17 }
   0xf   :  { %91 = vst [vmem:[#allocation2 + $0x48] sm:$0xf] %v7850_v0  ;;  %v88_v23 = vld [vmem:[#allocation2 + $0x44] sm:$0x3]  ;;  %v92_v24 = vld [vmem:[#allocation2 + $0x4c] sm:$0x3] }
  0x10   :  { %95 = vst [vmem:[#allocation2 + $0x50] sm:$0xf] %v7850_v0  ;;  %v96_v25 = vld [vmem:[#allocation2 + $0x54] sm:$0x3]  ;;  %v85_v26 = vsel %vm7943_vm2, 0, %v84_v20  ;;  %v89_v27 = vsel %vm7943_vm2, 0, %v88_v23 }
  0x11   :  { %99 = vst [vmem:[#allocation2 + $0x58] sm:$0xf] %v7850_v0  ;;  %v100_v28 = vld [vmem:[#allocation2 + $0x5c] sm:$0x3]  ;;  %v93_v29 = vsel %vm7943_vm2, 0, %v92_v24  ;;  %v97_v30 = vsel %vm7943_vm2, 0, %v96_v25 }
  0x12   :  { %103 = vst [vmem:[#allocation2 + $0x60] sm:$0xf] %v7850_v0  ;;  %v104_v31 = vld [vmem:[#allocation2 + $0x64] sm:$0x3]  ;;  %v108_v32 = vld [vmem:[#allocation2 + $0x6c] sm:$0x3] }
  0x13   :  { %107 = vst [vmem:[#allocation2 + $0x68] sm:$0xf] %v7850_v0  ;;  %v112_v33 = vld [vmem:[#allocation2 + $0x74] sm:$0x3]  ;;  %v101_v34 = vsel %vm7943_vm2, 0, %v100_v28  ;;  %v105_v35 = vsel %vm7943_vm2, 0, %v104_v31 }
  0x14   :  { %111 = vst [vmem:[#allocation2 + $0x70] sm:$0xf] %v7850_v0  ;;  %v116_v36 = vld [vmem:[#allocation2 + $0x7c] sm:$0x3]  ;;  %v109_v37 = vsel %vm7943_vm2, 0, %v108_v32  ;;  %v113_v38 = vsel %vm7943_vm2, 0, %v112_v33 }
  0x15   :  { %115 = vst [vmem:[#allocation2 + $0x78] sm:$0xf] %v7850_v0  ;;  %v120_v39 = vld [vmem:[#allocation2 + $0x84] sm:$0x3]  ;;  %v124_v40 = vld [vmem:[#allocation2 + $0x8c] sm:$0x3] }
  0x16   :  { %119 = vst [vmem:[#allocation2 + $0x80] sm:$0xf] %v7850_v0  ;;  %vm136_vm4 = vsmask.f32 3328  ;;  %v117_v41 = vsel %vm7943_vm2, 0, %v116_v36  ;;  %v121_v43 = vsel %vm7943_vm2, 0, %v120_v39 }
  0x17   :  { %123 = vst [vmem:[#allocation2 + $0x88] sm:$0xf] %v7850_v0  ;;  %v128_v42 = vld [vmem:[#allocation2 + $0x94] sm:$0x3]  ;;  %v132_v44 = vld [vmem:[#allocation2 + $0x9c] sm:$0x3]  ;;  %vm7984_vm5 = vmand %vm135_vm3, %vm136_vm4 }
  0x18   :  { %127 = vst [vmem:[#allocation2 + $0x90] sm:$0xf] %v7850_v0  ;;  %v125_v45 = vsel %vm7943_vm2, 0, %v124_v40  ;;  %v138_v47 = vld [vmem:[#allocation3] sm:$0xf]  ;;  %v129_v48 = vsel %vm7943_vm2, 0, %v128_v42 }
  0x19   :  { %131 = vst [vmem:[#allocation2 + $0x98] sm:$0xf] %v7850_v0  ;;  %v141_v49 = vld [vmem:[#allocation3 + $0x4] sm:$0xf]  ;;  %v133_v50 = vsel %vm7943_vm2, 0, %v132_v44  ;;  %v139_v52 = vsel %vm7984_vm5, 0, %v138_v47 }
  0x1a   :  { %58 = vst [vmem:[#allocation2 + $0x4] sm:$0x3] %v57_v11  ;;  %v144_v51 = vld [vmem:[#allocation3 + $0x8] sm:$0xf]  ;;  %v147_v53 = vld [vmem:[#allocation3 + $0xc] sm:$0xf] }
  0x1b   :  { %62 = vst [vmem:[#allocation2 + $0xc] sm:$0x3] %v61_v13  ;;  %v142_v54 = vsel %vm7984_vm5, 0, %v141_v49  ;;  %v150_v55 = vld [vmem:[#allocation3 + $0x10] sm:$0xf]  ;;  %v145_v56 = vsel %vm7984_vm5, 0, %v144_v51 }
  0x1c   :  { %66 = vst [vmem:[#allocation2 + $0x14] sm:$0x3] %v65_v14  ;;  %v153_v57 = vld [vmem:[#allocation3 + $0x14] sm:$0xf]  ;;  %v148_v58 = vsel %vm7984_vm5, 0, %v147_v53  ;;  %v151_v60 = vsel %vm7984_vm5, 0, %v150_v55 }
  0x1d   :  { %70 = vst [vmem:[#allocation2 + $0x1c] sm:$0x3] %v69_v18  ;;  %v156_v59 = vld [vmem:[#allocation3 + $0x18] sm:$0xf]  ;;  %v159_v61 = vld [vmem:[#allocation3 + $0x1c] sm:$0xf] }
  0x1e   :  { %74 = vst [vmem:[#allocation2 + $0x24] sm:$0x3] %v73_v19  ;;  %v154_v62 = vsel %vm7984_vm5, 0, %v153_v57  ;;  %v162_v63 = vld [vmem:[#allocation3 + $0x20] sm:$0xf]  ;;  %v157_v0 = vsel %vm7984_vm5, 0, %v156_v59 }
  0x1f   :  { %78 = vst [vmem:[#allocation2 + $0x2c] sm:$0x3] %v77_v21  ;;  %v165_v7 = vld [vmem:[#allocation3 + $0x24] sm:$0xf]  ;;  %v160_v8 = vsel %vm7984_vm5, 0, %v159_v61  ;;  %v163_v10 = vsel %vm7984_vm5, 0, %v162_v63 }
  0x20   :  { %82 = vst [vmem:[#allocation2 + $0x34] sm:$0x3] %v81_v22  ;;  %v168_v9 = vld [vmem:[#allocation3 + $0x28] sm:$0xf]  ;;  %v171_v11 = vld [vmem:[#allocation3 + $0x2c] sm:$0xf] }
  0x21   :  { %86 = vst [vmem:[#allocation2 + $0x3c] sm:$0x3] %v85_v26  ;;  %v166_v12 = vsel %vm7984_vm5, 0, %v165_v7  ;;  %v169_v13 = vsel %vm7984_vm5, 0, %v168_v9  ;;  %v172_v14 = vsel %vm7984_vm5, 0, %v171_v11  ;;  %v8016_v15 = vmov 0.0  }
  0x22   :  { %90 = vst [vmem:[#allocation2 + $0x44] sm:$0x3] %v89_v27  ;;  %v8018_v16 = vmov 0.0   ;;  %s8020_s1 = smov 0  }
  0x23   :  { %94 = vst [vmem:[#allocation2 + $0x4c] sm:$0x3] %v93_v29 }
  0x24   :  { %98 = vst [vmem:[#allocation2 + $0x54] sm:$0x3] %v97_v30 }
  0x25   :  { %102 = vst [vmem:[#allocation2 + $0x5c] sm:$0x3] %v101_v34 }
  0x26   :  { %106 = vst [vmem:[#allocation2 + $0x64] sm:$0x3] %v105_v35 }
  0x27   :  { %110 = vst [vmem:[#allocation2 + $0x6c] sm:$0x3] %v109_v37 }
  0x28   :  { %114 = vst [vmem:[#allocation2 + $0x74] sm:$0x3] %v113_v38 }
  0x29   :  { %118 = vst [vmem:[#allocation2 + $0x7c] sm:$0x3] %v117_v41 }
  0x2a   :  { %122 = vst [vmem:[#allocation2 + $0x84] sm:$0x3] %v121_v43 }
  0x2b   :  { %126 = vst [vmem:[#allocation2 + $0x8c] sm:$0x3] %v125_v45 }
  0x2c   :  { %130 = vst [vmem:[#allocation2 + $0x94] sm:$0x3] %v129_v48 }
  0x2d   :  { %134 = vst [vmem:[#allocation2 + $0x9c] sm:$0x3] %v133_v50 }
  0x2e   :  { %140 = vst [vmem:[#allocation3] sm:$0xf] %v139_v52 }
  0x2f   :  { %143 = vst [vmem:[#allocation3 + $0x4] sm:$0xf] %v142_v54 }
  0x30   :  { %146 = vst [vmem:[#allocation3 + $0x8] sm:$0xf] %v145_v56 }
  0x31   :  { %149 = vst [vmem:[#allocation3 + $0xc] sm:$0xf] %v148_v58 }
  0x32   :  { %152 = vst [vmem:[#allocation3 + $0x10] sm:$0xf] %v151_v60 }
  0x33   :  { %155 = vst [vmem:[#allocation3 + $0x14] sm:$0xf] %v154_v62 }
  0x34   :  { %158 = vst [vmem:[#allocation3 + $0x18] sm:$0xf] %v157_v0 }
  0x35   :  { %161 = vst [vmem:[#allocation3 + $0x1c] sm:$0xf] %v160_v8 }
  0x36   :  { %164 = vst [vmem:[#allocation3 + $0x20] sm:$0xf] %v163_v10 }
  0x37   :  { %167 = vst [vmem:[#allocation3 + $0x24] sm:$0xf] %v166_v12 }
  0x38   :  { %170 = vst [vmem:[#allocation3 + $0x28] sm:$0xf] %v169_v13 }
  0x39   :  { %173 = vst [vmem:[#allocation3 + $0x2c] sm:$0xf] %v172_v14 }
  0x3a LB: > { %vm210_vm6 = vcmask 1040384   ;;  %s7206_s3 = smul.u32 24, %s7785_s1  ;;  %v7851_v17 = vmov 65535   ;;  %vm206_vm7 = vcmask 154624   ;;  %v5333_v25 = vld [vmem:[%s9614_s2 + $0x2] sm:$0x3]  ;;  %s7785_s1 = sphi %s8020_s1, %s187_s1   ;;  %v7781_v16 = vphi %v8018_v16, %v9628_v16   ;;  %v7777_v15 = vphi %v8016_v15, %v9627_v15  }
  0x3b   : > { %v212_v18 = vsel %vm210_vm6, 4294967295, %v7851_v17  ;;  %v231_v26 = vld [vmem:[%s9614_s2] sm:$0x3]  ;;  %v256_v27 = vsel %vm53_vm0, %v5333_v25, 0  ;;  %vm251_vm8 = vcmask 31744  }
  0x3c   : > { %s8035_s13 = scalar_lea.vmem %s9612_s0, %s7206_s3  ;;  %v8039_v21 = vsel %vm53_vm0, %v212_v18, 0  ;;  %v275_v28 = vsel %vm53_vm0, %v231_v26, 0  ;;  %265 = vmatpush.bf16.msra.mxu2 %v256_v27  ;;  %v5337_v45 = vld [vmem:[%s9614_s2 + $0x4] sm:$0x3]  ;;  %v5352_v47 = vld [vmem:[%s9614_s2 + $0x8] sm:$0x3] }
  0x3d   : > { %v196_v19 = vld [vmem:[%s8035_s13 + $0x8] sm:$0x3]  ;;  %v7207_v24 = vld [vmem:[%s8035_s13] sm:$0xff]  ;;  %284 = vmatpush.bf16.msra.mxu3 %v275_v28  ;;  %v5343_v29 = vld [vmem:[%s8035_s13 + $0x14] sm:$0x3]  ;;  %v313_v46 = vsel %vm53_vm0, %v5337_v45, 0 }
  0x3e   : > { %v202_v20 = vunpack.c.l.b16 %v196_v19  ;;  %v341_v30 = vunpack.c.l.b16 %v5343_v29  ;;  %v7208_v33 = vld [vmem:[%s8035_s13 + $0xc] sm:$0xff]  ;;  %v5361_v38 = vld [vmem:[%s8035_s13 + $0x20] sm:$0x3]  ;;  %v7209_v44 = vld [vmem:[%s8035_s13 + $0x18] sm:$0xff]  ;;  %v404_v49 = vsel %vm53_vm0, %v5352_v47, 0  ;;  %s5375_s3 = sshll.u32 %s7785_s1, 3 }
  0x3f   : > { %v468_v39 = vunpack.c.l.b16 %v5361_v38  ;;  %v5349_v48 = vld [vmem:[%s9614_s2 + $0x6] sm:$0x3]  ;;  %v5355_v57 = vld [vmem:[%s9614_s2 + $0xa] sm:$0x3]  ;;  %v5367_v63 = vld [vmem:[%s9614_s2 + $0xc] sm:$0x3] }
  0x40   : > { %v204_v22 = vpack.c.b16 %v202_v20, %v202_v20  ;;  %v343_v31 = vpack.c.b16 %v341_v30, %v341_v30  ;;  %v368_v50 = vsel %vm53_vm0, %v5349_v48, 0  ;;  %v440_v58 = vsel %vm53_vm0, %v5355_v57, 0  ;;  %v5370_v10 = vld [vmem:[%s9614_s2 + $0xe] sm:$0x3]  ;;  %v5373_v17 = vld [vmem:[%s9614_s2 + $0x10] sm:$0x3] }
  0x41   : > { %v470_v40 = vpack.c.b16 %v468_v39, %v468_v39  ;;  %322 = vmatpush.bf16.msrb.mxu3 %v313_v46  ;;  %v495_v8 = vsel %vm53_vm0, %v5367_v63, 0  ;;  %v531_v11 = vsel %vm53_vm0, %v5370_v10, 0  ;;  %v567_v20 = vsel %vm53_vm0, %v5373_v17, 0  ;;  %s5184_s11 = scalar_lea.vmem [#allocation2], %s5375_s3  ;;  %s187_s1 = sadd.s32 1, %s7785_s1  }
  0x42   : > { %v215_v23 = vand.u32 %v8039_v21, %v204_v22  ;;  %v346_v32 = vand.u32 %v343_v31, %v8039_v21  ;;  %v583_v48 = vperm.slane %v7915_v1, 0  ;;  %p184_p0 = scmp.ge.s32.totalorder %s187_s1, 8  }
  0x43   : > { %v473_v42 = vand.u32 %v470_v40, %v8039_v21  ;;  %s8129_s12 = smov (%p184_p0), 0  }
  0x44   : > { %223 = vmatpush.bf16.msra.mxu0 %v215_v23  ;;  %241 = vmatpush.bf16.msra.mxu1 %v215_v23 }
  0x45   : > { %299 = vmatpush.bf16.msrb.mxu2 %v215_v23 }
  0x48   : > { %224 = vmatpush.bf16.msra.mxu0 %v7207_v24  ;;  %242 = vmatpush.bf16.msra.mxu1 %v7207_v24 }
  0x49   : > { %300 = vmatpush.bf16.msrb.mxu2 %v7207_v24 }
  0x4b   : > { %5331 = vmatmul.msk.bf16.vlgmr.msra.gmra.mxu0 %vm206_vm7, %v7930_v4  ;;  %5332 = vmatmul.msk.bf16.vlgmr.msra.gmra.mxu1 %vm206_vm7, %v7935_v5 }
  0x4c   : > { %354 = vmatpush.bf16.msrb.mxu0 %v346_v32  ;;  %377 = vmatpush.bf16.msrb.mxu1 %v368_v50 }
  0x50   : > { %355 = vmatpush.bf16.msrb.mxu0 %v7208_v33  ;;  %449 = vmatpush.bf16.msra.mxu1 %v440_v58 }
  0x54   : > { %426 = vmatpush.bf16.msra.mxu0 %v346_v32 }
  0x58   : > { %427 = vmatpush.bf16.msra.mxu0 %v7208_v33 }
  0x5b   : > { %5348 = vmatmul.msk.bf16.vlgmr.msrb.gmra.mxu0 %vm206_vm7, %v7930_v4 }
  0x5c   : > { %517 = vmatpush.bf16.msrb.mxu0 %v473_v42 }
  0x60   : > { %518 = vmatpush.bf16.msrb.mxu0 %v7209_v44 }
  0x6b   : > { %5354 = vmatmul.msk.bf16.vlgmr.msra.gmra.mxu0 %vm206_vm7, %v7940_v6 }
  0x7b   : > { %5369 = vmatmul.msk.bf16.vlgmr.msrb.gmra.mxu0 %vm206_vm7, %v7935_v5 }
  0xc8   : > { %v226_v34 = vpop.f32.mrf.mxu0  ;;  %v244_v35 = vpop.f32.mrf.mxu1 }
  0xc9   : > { %v230_v36 = vpack.c.bf16 %v226_v34, %v226_v34  ;;  %v248_v37 = vpack.c.bf16 %v244_v35, %v244_v35 }
  0xcb   : > { %5334 = vmatmul.msk.bf16.vlgmr.msra.gmra.mxu2 %vm251_vm8, %v248_v37  ;;  %5335 = vmatmul.msk.bf16.vlgmr.msra.gmra.mxu3 %vm251_vm8, %v230_v36 }
  0xcc   : > { %390 = vmatpush.bf16.msra.mxu2 %v346_v32  ;;  %413 = vmatpush.bf16.msra.mxu3 %v404_v49 }
  0xd0   : > { %v246_v41 = vpop.f32.mrf.mxu1  ;;  %391 = vmatpush.bf16.msra.mxu2 %v7208_v33  ;;  %v228_v43 = vpop.f32.mrf.mxu0 }
  0xd8   : > { %v357_v51 = vpop.f32.mrf.mxu0 }
  0xd9   : > { %v361_v52 = vpack.c.bf16 %v357_v51, %v357_v51 }
  0xdb   : > { %5336 = vmatmul.msk.bf16.vlgmr.msrb.gmra.mxu2 %vm206_vm7, %v7940_v6  ;;  %5350 = vmatmul.msk.bf16.vlgmr.msrb.gmra.mxu1 %vm251_vm8, %v361_v52 }
  0xdc   : > { %481 = vmatpush.bf16.msrb.mxu2 %v473_v42  ;;  %540 = vmatpush.bf16.msrb.mxu1 %v531_v11 }
  0xe0   : > { %482 = vmatpush.bf16.msrb.mxu2 %v7209_v44  ;;  %v359_v56 = vpop.f32.mrf.mxu0 }
  0xe8   : > { %v429_v61 = vpop.f32.mrf.mxu0 }
  0xe9   : > { %v433_v62 = vpack.c.bf16 %v429_v61, %v429_v61 }
  0xeb   : > { %5351 = vmatmul.msk.bf16.vlgmr.msra.gmra.mxu2 %vm206_vm7, %v7935_v5  ;;  %5356 = vmatmul.msk.bf16.vlgmr.msra.gmra.mxu1 %vm251_vm8, %v433_v62 }
  0xec   : > { %553 = vmatpush.bf16.msra.mxu2 %v473_v42 }
  0xf0   : > { %554 = vmatpush.bf16.msra.mxu2 %v7209_v44  ;;  %v431_v9 = vpop.f32.mrf.mxu0 }
  0xf8   : > { %v520_v13 = vpop.f32.mrf.mxu0 }
  0xf9   : > { %v524_v14 = vpack.c.bf16 %v520_v13, %v520_v13 }
  0xfb   : > { %5366 = vmatmul.msk.bf16.vlgmr.msrb.gmra.mxu2 %vm206_vm7, %v7930_v4  ;;  %5371 = vmatmul.msk.bf16.vlgmr.msrb.gmra.mxu1 %vm251_vm8, %v524_v14 }
 0x100   : > { %v522_v22 = vpop.f32.mrf.mxu0 }
 0x10b   : > { %5372 = vmatmul.msk.bf16.vlgmr.msra.gmra.mxu2 %vm206_vm7, %v7940_v6 }
 0x14e   : > { %v267_v53 = vpop.f32.mrf.mxu2  ;;  %v286_v54 = vpop.f32.mrf.mxu3 }
 0x14f   : > { %v287_v55 = vadd.f32 %v286_v54, %v267_v53 }
 0x156   : > { %v269_v59 = vpop.f32.mrf.mxu2  ;;  %v288_v60 = vpop.f32.mrf.mxu3 }
 0x158   : > { %v379_v30 = vpop.f32.mrf.mxu1 }
 0x15e   : > { %v302_v0 = vpop.f32.mrf.mxu2 }
 0x15f   : > { %v306_v7 = vpack.c.bf16 %v302_v0, %v302_v0 }
 0x160   : > { %v381_v31 = vpop.f32.mrf.mxu1 }
 0x161   : > { %5338 = vmatmul.msk.bf16.vlgmr.msrb.gmra.mxu3 %vm251_vm8, %v306_v7 }
 0x162   : > { %504 = vmatpush.bf16.msrb.mxu3 %v495_v8 }
 0x166   : > { %v304_v12 = vpop.f32.mrf.mxu2 }
 0x168   : > { %v451_v32 = vpop.f32.mrf.mxu1 }
 0x16e   : > { %v393_v18 = vpop.f32.mrf.mxu2 }
 0x16f   : > { %v397_v19 = vpack.c.bf16 %v393_v18, %v393_v18 }
 0x170   : > { %v453_v33 = vpop.f32.mrf.mxu1 }
 0x171   : > { %5353 = vmatmul.msk.bf16.vlgmr.msra.gmra.mxu3 %vm251_vm8, %v397_v19 }
 0x172   : > { %576 = vmatpush.bf16.msra.mxu3 %v567_v20 }
 0x176   : > { %v395_v23 = vpop.f32.mrf.mxu2 }
 0x178   : > { %v542_v37 = vpop.f32.mrf.mxu1 }
 0x17e   : > { %v484_v24 = vpop.f32.mrf.mxu2 }
 0x17f   : > { %v488_v25 = vpack.c.bf16 %v484_v24, %v484_v24 }
 0x180   : > { %v544_v39 = vpop.f32.mrf.mxu1 }
 0x181   : > { %5368 = vmatmul.msk.bf16.vlgmr.msrb.gmra.mxu3 %vm251_vm8, %v488_v25 }
 0x186   : > { %v486_v26 = vpop.f32.mrf.mxu2 }
 0x18e   : > { %v556_v27 = vpop.f32.mrf.mxu2 }
 0x18f   : > { %v560_v28 = vpack.c.bf16 %v556_v27, %v556_v27 }
 0x191   : > { %5374 = vmatmul.msk.bf16.vlgmr.msra.gmra.mxu3 %vm251_vm8, %v560_v28 }
 0x196   : > { %v558_v29 = vpop.f32.mrf.mxu2 }
 0x1e4   : > { %v324_v34 = vpop.f32.mrf.mxu3 }
 0x1e5   : > { %v328_v35 = vadd.f32 %v324_v34, %v287_v55 }
 0x1e7   : > { %v383_v36 = vadd.f32 %v379_v30, %v328_v35 }
 0x1ec   : > { %v326_v38 = vpop.f32.mrf.mxu3 }
 0x1f4   : > { %v415_v40 = vpop.f32.mrf.mxu3 }
 0x1f5   : > { %v419_v43 = vadd.f32 %v415_v40, %v383_v36 }
 0x1f7   : > { %v455_v45 = vadd.f32 %v451_v32, %v419_v43 }
 0x1fc   : > { %v417_v41 = vpop.f32.mrf.mxu3 }
 0x204   : > { %v506_v42 = vpop.f32.mrf.mxu3 }
 0x205   : > { %v510_v46 = vadd.f32 %v506_v42, %v455_v45 }
 0x207   : > { %v546_v47 = vadd.f32 %v542_v37, %v510_v46 }
 0x20c   : > { %v508_v44 = vpop.f32.mrf.mxu3 }
 0x214   : > { %v578_v49 = vpop.f32.mrf.mxu3 }
 0x215   : > { %v582_v50 = vadd.f32 %v578_v49, %v546_v47 }
 0x217   : > { %v584_v51 = vadd.f32 %v583_v48, %v582_v50 }
 0x219   : > { %v585_v52 = vrot.slane %v584_v51, 4  ;;  %v592_v53 = vmul.f32 %v584_v51, %v584_v51  ;;  %v600_v54 = vpack.c.bf16 %v584_v51, %v584_v51 }
 0x21b   : > { %v586_v55 = vadd.f32 %v585_v52, %v584_v51  ;;  %v593_v56 = vrot.slane %v592_v53, 4  ;;  %v603_v57 = vrot.slane %v600_v54, 7 }
 0x21c   : > { %v580_v58 = vpop.f32.mrf.mxu3 }
 0x21d   : > { %v587_v59 = vrot.slane %v586_v55, 2  ;;  %v594_v60 = vadd.f32 %v593_v56, %v592_v53  ;;  %v604_v61 = vrot.slane %v603_v57, 4  ;;  %5376 = vst [vmem:[%s5184_s11 + $0x8] sm:$0xe] %v603_v57 }
 0x21f   : > { %v588_v62 = vadd.f32 %v587_v59, %v586_v55  ;;  %v595_v63 = vrot.slane %v594_v60, 2  ;;  %5377 = vst [vmem:[%s5184_s11 + $0xc] sm:$0x1] %v604_v61 }
 0x221   : > { %v589_v0 = vrot.slane %v588_v62, 1  ;;  %v596_v7 = vadd.f32 %v595_v63, %v594_v60 }
 0x223   : > { %v590_v8 = vadd.f32 %v589_v0, %v588_v62  ;;  %v597_v9 = vrot.slane %v596_v7, 1 }
 0x225   : > { %v591_v10 = vadd.f32 %v7781_v16, %v590_v8   ;;  %v598_v11 = vadd.f32 %v597_v9, %v596_v7  ;;  %186 = sbr.rel (!%p184_p0) target bundleno = 58 (0x3a), region = 188 }
 0x227   : > { %v599_v12 = vadd.f32 %v7777_v15, %v598_v11   ;;  %v9628_v16 = vmov %v591_v10 }
 0x229   : > { %v9627_v15 = vmov %v599_v12 }
 0x22a LB: > { %s5379_s1 = smul.u32 24, %s7797_s12  ;;  %v5389_v18 = vld [vmem:[%s9614_s2 + $0x2] sm:$0x3]  ;;  %v662_v19 = vld [vmem:[%s9614_s2] sm:$0x3]  ;;  %s7797_s12 = sphi %s8129_s12, %s617_s12   ;;  %v7793_v10 = vphi %v591_v10, %v9630_v10   ;;  %v7789_v12 = vphi %v599_v12, %v9629_v12  }
 0x22b   : > { %v687_v20 = vsel %vm53_vm0, %v5389_v18, 0  ;;  %v706_v22 = vsel %vm53_vm0, %v662_v19, 0  ;;  %v5393_v39 = vld [vmem:[%s9614_s2 + $0x4] sm:$0x3]  ;;  %v5408_v41 = vld [vmem:[%s9614_s2 + $0x8] sm:$0x3] }
 0x22c   : > { %s8144_s15 = scalar_lea.vmem %s9612_s0, %s5379_s1  ;;  %696 = vmatpush.bf16.msra.mxu2 %v687_v20  ;;  %715 = vmatpush.bf16.msra.mxu3 %v706_v22  ;;  %v744_v40 = vsel %vm53_vm0, %v5393_v39, 0  ;;  %v5405_v42 = vld [vmem:[%s9614_s2 + $0x6] sm:$0x3]  ;;  %v835_v43 = vsel %vm53_vm0, %v5408_v41, 0  ;;  %v5411_v52 = vld [vmem:[%s9614_s2 + $0xa] sm:$0x3] }
 0x22d   : > { %v5382_v15 = vld [vmem:[%s8144_s15 + $0xe0] sm:$0x3]  ;;  %v7210_v17 = vld [vmem:[%s8144_s15 + $0xd8] sm:$0xff]  ;;  %v5399_v23 = vld [vmem:[%s8144_s15 + $0xec] sm:$0x3]  ;;  %v799_v44 = vsel %vm53_vm0, %v5405_v42, 0 }
 0x22e   : > { %v633_v16 = vunpack.c.l.b16 %v5382_v15  ;;  %v772_v24 = vunpack.c.l.b16 %v5399_v23  ;;  %v7211_v27 = vld [vmem:[%s8144_s15 + $0xe4] sm:$0xff]  ;;  %v5417_v32 = vld [vmem:[%s8144_s15 + $0xf8] sm:$0x3]  ;;  %v7212_v38 = vld [vmem:[%s8144_s15 + $0xf0] sm:$0xff]  ;;  %v871_v53 = vsel %vm53_vm0, %v5411_v52, 0  ;;  %s5431_s1 = sshll.u32 %s7797_s12, 3 }
 0x22f   : > { %v899_v33 = vunpack.c.l.b16 %v5417_v32  ;;  %v5423_v58 = vld [vmem:[%s9614_s2 + $0xc] sm:$0x3]  ;;  %v5426_v63 = vld [vmem:[%s9614_s2 + $0xe] sm:$0x3]  ;;  %v5429_v11 = vld [vmem:[%s9614_s2 + $0x10] sm:$0x3] }
 0x230   : > { %v635_v13 = vpack.c.b16 %v633_v16, %v633_v16  ;;  %v774_v25 = vpack.c.b16 %v772_v24, %v772_v24  ;;  %753 = vmatpush.bf16.msrb.mxu3 %v744_v40  ;;  %v926_v61 = vsel %vm53_vm0, %v5423_v58, 0  ;;  %v962_v0 = vsel %vm53_vm0, %v5426_v63, 0  ;;  %s5199_s13 = scalar_lea.vmem [#allocation2], %s5431_s1  ;;  %s617_s12 = sadd.s32 1, %s7797_s12  }
 0x231   : > { %v901_v34 = vpack.c.b16 %v899_v33, %v899_v33  ;;  %p614_p1 = scmp.ge.s32.totalorder %s617_s12, 8  }
 0x232   : > { %v646_v14 = vand.u32 %v635_v13, %v8039_v21  ;;  %v777_v26 = vand.u32 %v774_v25, %v8039_v21  ;;  %v998_v13 = vsel %vm53_vm0, %v5429_v11, 0 }
 0x233   : > { %v904_v36 = vand.u32 %v901_v34, %v8039_v21 }
 0x234   : > { %654 = vmatpush.bf16.msra.mxu0 %v646_v14  ;;  %672 = vmatpush.bf16.msra.mxu1 %v646_v14 }
 0x235   : > { %730 = vmatpush.bf16.msrb.mxu2 %v646_v14 }
 0x238   : > { %655 = vmatpush.bf16.msra.mxu0 %v7210_v17  ;;  %673 = vmatpush.bf16.msra.mxu1 %v7210_v17 }
 0x239   : > { %731 = vmatpush.bf16.msrb.mxu2 %v7210_v17 }
 0x23b   : > { %5387 = vmatmul.msk.bf16.vlgmr.msra.gmra.mxu0 %vm206_vm7, %v7930_v4  ;;  %5388 = vmatmul.msk.bf16.vlgmr.msra.gmra.mxu1 %vm206_vm7, %v7935_v5 }
 0x23c   : > { %785 = vmatpush.bf16.msrb.mxu0 %v777_v26  ;;  %808 = vmatpush.bf16.msrb.mxu1 %v799_v44 }
 0x240   : > { %786 = vmatpush.bf16.msrb.mxu0 %v7211_v27  ;;  %880 = vmatpush.bf16.msra.mxu1 %v871_v53 }
 0x244   : > { %857 = vmatpush.bf16.msra.mxu0 %v777_v26 }
 0x248   : > { %858 = vmatpush.bf16.msra.mxu0 %v7211_v27 }
 0x24b   : > { %5404 = vmatmul.msk.bf16.vlgmr.msrb.gmra.mxu0 %vm206_vm7, %v7930_v4 }
 0x24c   : > { %948 = vmatpush.bf16.msrb.mxu0 %v904_v36 }
 0x250   : > { %949 = vmatpush.bf16.msrb.mxu0 %v7212_v38 }
 0x25b   : > { %5410 = vmatmul.msk.bf16.vlgmr.msra.gmra.mxu0 %vm206_vm7, %v7940_v6 }
 0x26b   : > { %5425 = vmatmul.msk.bf16.vlgmr.msrb.gmra.mxu0 %vm206_vm7, %v7935_v5 }
 0x2b8   : > { %v657_v28 = vpop.f32.mrf.mxu0  ;;  %v675_v29 = vpop.f32.mrf.mxu1 }
 0x2b9   : > { %v661_v30 = vpack.c.bf16 %v657_v28, %v657_v28  ;;  %v679_v31 = vpack.c.bf16 %v675_v29, %v675_v29 }
 0x2bb   : > { %5390 = vmatmul.msk.bf16.vlgmr.msra.gmra.mxu2 %vm251_vm8, %v679_v31  ;;  %5391 = vmatmul.msk.bf16.vlgmr.msra.gmra.mxu3 %vm251_vm8, %v661_v30 }
 0x2bc   : > { %821 = vmatpush.bf16.msra.mxu2 %v777_v26  ;;  %844 = vmatpush.bf16.msra.mxu3 %v835_v43 }
 0x2c0   : > { %v677_v35 = vpop.f32.mrf.mxu1  ;;  %822 = vmatpush.bf16.msra.mxu2 %v7211_v27  ;;  %v659_v37 = vpop.f32.mrf.mxu0 }
 0x2c8   : > { %v788_v45 = vpop.f32.mrf.mxu0 }
 0x2c9   : > { %v792_v46 = vpack.c.bf16 %v788_v45, %v788_v45 }
 0x2cb   : > { %5392 = vmatmul.msk.bf16.vlgmr.msrb.gmra.mxu2 %vm206_vm7, %v7940_v6  ;;  %5406 = vmatmul.msk.bf16.vlgmr.msrb.gmra.mxu1 %vm251_vm8, %v792_v46 }
 0x2cc   : > { %912 = vmatpush.bf16.msrb.mxu2 %v904_v36  ;;  %971 = vmatpush.bf16.msrb.mxu1 %v962_v0 }
 0x2d0   : > { %913 = vmatpush.bf16.msrb.mxu2 %v7212_v38  ;;  %v790_v51 = vpop.f32.mrf.mxu0 }
 0x2d8   : > { %v860_v56 = vpop.f32.mrf.mxu0 }
 0x2d9   : > { %v864_v57 = vpack.c.bf16 %v860_v56, %v860_v56 }
 0x2db   : > { %5407 = vmatmul.msk.bf16.vlgmr.msra.gmra.mxu2 %vm206_vm7, %v7935_v5  ;;  %5412 = vmatmul.msk.bf16.vlgmr.msra.gmra.mxu1 %vm251_vm8, %v864_v57 }
 0x2dc   : > { %984 = vmatpush.bf16.msra.mxu2 %v904_v36 }
 0x2e0   : > { %985 = vmatpush.bf16.msra.mxu2 %v7212_v38  ;;  %v862_v62 = vpop.f32.mrf.mxu0 }
 0x2e8   : > { %v951_v8 = vpop.f32.mrf.mxu0 }
 0x2e9   : > { %v955_v9 = vpack.c.bf16 %v951_v8, %v951_v8 }
 0x2eb   : > { %5422 = vmatmul.msk.bf16.vlgmr.msrb.gmra.mxu2 %vm206_vm7, %v7930_v4  ;;  %5427 = vmatmul.msk.bf16.vlgmr.msrb.gmra.mxu1 %vm251_vm8, %v955_v9 }
 0x2f0   : > { %v953_v14 = vpop.f32.mrf.mxu0 }
 0x2fb   : > { %5428 = vmatmul.msk.bf16.vlgmr.msra.gmra.mxu2 %vm206_vm7, %v7940_v6 }
 0x33e   : > { %v698_v47 = vpop.f32.mrf.mxu2  ;;  %v717_v49 = vpop.f32.mrf.mxu3 }
 0x33f   : > { %v718_v50 = vadd.f32 %v717_v49, %v698_v47 }
 0x346   : > { %v700_v54 = vpop.f32.mrf.mxu2  ;;  %v719_v55 = vpop.f32.mrf.mxu3 }
 0x348   : > { %v810_v25 = vpop.f32.mrf.mxu1 }
 0x34e   : > { %v733_v59 = vpop.f32.mrf.mxu2 }
 0x34f   : > { %v737_v60 = vpack.c.bf16 %v733_v59, %v733_v59 }
 0x350   : > { %v812_v26 = vpop.f32.mrf.mxu1 }
 0x351   : > { %5394 = vmatmul.msk.bf16.vlgmr.msrb.gmra.mxu3 %vm251_vm8, %v737_v60 }
 0x352   : > { %935 = vmatpush.bf16.msrb.mxu3 %v926_v61 }
 0x356   : > { %v735_v7 = vpop.f32.mrf.mxu2 }
 0x358   : > { %v882_v27 = vpop.f32.mrf.mxu1 }
 0x35e   : > { %v824_v15 = vpop.f32.mrf.mxu2 }
 0x35f   : > { %v828_v16 = vpack.c.bf16 %v824_v15, %v824_v15 }
 0x360   : > { %v884_v28 = vpop.f32.mrf.mxu1 }
 0x361   : > { %5409 = vmatmul.msk.bf16.vlgmr.msra.gmra.mxu3 %vm251_vm8, %v828_v16 }
 0x362   : > { %1007 = vmatpush.bf16.msra.mxu3 %v998_v13 }
 0x366   : > { %v826_v17 = vpop.f32.mrf.mxu2 }
 0x368   : > { %v973_v32 = vpop.f32.mrf.mxu1 }
 0x36e   : > { %v915_v18 = vpop.f32.mrf.mxu2 }
 0x36f   : > { %v919_v19 = vpack.c.bf16 %v915_v18, %v915_v18 }
 0x370   : > { %v975_v34 = vpop.f32.mrf.mxu1 }
 0x371   : > { %5424 = vmatmul.msk.bf16.vlgmr.msrb.gmra.mxu3 %vm251_vm8, %v919_v19 }
 0x376   : > { %v917_v20 = vpop.f32.mrf.mxu2 }
 0x37e   : > { %v987_v22 = vpop.f32.mrf.mxu2 }
 0x37f   : > { %v991_v23 = vpack.c.bf16 %v987_v22, %v987_v22 }
 0x381   : > { %5430 = vmatmul.msk.bf16.vlgmr.msra.gmra.mxu3 %vm251_vm8, %v991_v23 }
 0x386   : > { %v989_v24 = vpop.f32.mrf.mxu2 }
 0x3d4   : > { %v755_v29 = vpop.f32.mrf.mxu3 }
 0x3d5   : > { %v759_v30 = vadd.f32 %v755_v29, %v718_v50 }
 0x3d7   : > { %v814_v31 = vadd.f32 %v810_v25, %v759_v30 }
 0x3dc   : > { %v757_v33 = vpop.f32.mrf.mxu3 }
 0x3e4   : > { %v846_v35 = vpop.f32.mrf.mxu3 }
 0x3e5   : > { %v850_v38 = vadd.f32 %v846_v35, %v814_v31 }
 0x3e7   : > { %v886_v40 = vadd.f32 %v882_v27, %v850_v38 }
 0x3ec   : > { %v848_v36 = vpop.f32.mrf.mxu3 }
 0x3f4   : > { %v937_v37 = vpop.f32.mrf.mxu3 }
 0x3f5   : > { %v941_v41 = vadd.f32 %v937_v37, %v886_v40 }
 0x3f7   : > { %v977_v42 = vadd.f32 %v973_v32, %v941_v41 }
 0x3fc   : > { %v939_v39 = vpop.f32.mrf.mxu3 }
 0x404   : > { %v1009_v43 = vpop.f32.mrf.mxu3 }
 0x405   : > { %v1013_v44 = vadd.f32 %v1009_v43, %v977_v42 }
 0x407   : > { %v1015_v45 = vadd.f32 %v1013_v44, %v583_v48 }
 0x409   : > { %v1016_v46 = vrot.slane %v1015_v45, 4  ;;  %v1023_v47 = vmul.f32 %v1015_v45, %v1015_v45  ;;  %v1031_v49 = vpack.c.bf16 %v1015_v45, %v1015_v45 }
 0x40b   : > { %v1017_v50 = vadd.f32 %v1016_v46, %v1015_v45  ;;  %v1024_v51 = vrot.slane %v1023_v47, 4  ;;  %v1034_v52 = vrot.slane %v1031_v49, 7 }
 0x40c   : > { %v1011_v53 = vpop.f32.mrf.mxu3 }
 0x40d   : > { %v1018_v54 = vrot.slane %v1017_v50, 2  ;;  %v1025_v55 = vadd.f32 %v1024_v51, %v1023_v47  ;;  %v1035_v56 = vrot.slane %v1034_v52, 4  ;;  %5432 = vst [vmem:[%s5199_s13 + $0x58] sm:$0xe] %v1034_v52 }
 0x40f   : > { %v1019_v57 = vadd.f32 %v1018_v54, %v1017_v50  ;;  %v1026_v58 = vrot.slane %v1025_v55, 2  ;;  %5433 = vst [vmem:[%s5199_s13 + $0x5c] sm:$0x1] %v1035_v56 }
 0x411   : > { %v1020_v59 = vrot.slane %v1019_v57, 1  ;;  %v1027_v60 = vadd.f32 %v1026_v58, %v1025_v55 }
 0x413   : > { %v1021_v61 = vadd.f32 %v1020_v59, %v1019_v57  ;;  %v1028_v62 = vrot.slane %v1027_v60, 1 }
 0x415   : > { %v1022_v63 = vadd.f32 %v7793_v10, %v1021_v61   ;;  %v1029_v0 = vadd.f32 %v1028_v62, %v1027_v60  ;;  %616 = sbr.rel (!%p614_p1) target bundleno = 554 (0x22a), region = 199 }
 0x416   :  { %v8234_v18 = vld [vmem:[#allocation2 + $0x8] sm:$0xe] (%p614_p1)  ;;  %v8236_v19 = vld [vmem:[#allocation2 + $0xc] sm:$0x1] (%p614_p1)  ;;  %v8238_v20 = vld [vmem:[#allocation2 + $0x10] sm:$0xe] (%p614_p1) }
 0x417   : > { %v1030_v7 = vadd.f32 %v7789_v12, %v1029_v0   ;;  %v9630_v10 = vmov %v1022_v63  ;;  %v8230_v8 = vmul.f32 (%p614_p1), 0.0078125, %v1022_v63  ;;  %v8240_v22 = vld [vmem:[#allocation2 + $0x14] sm:$0x1] (%p614_p1)  ;;  %v8242_v1 = vld [vmem:[#allocation2 + $0x18] sm:$0xe] (%p614_p1)  ;;  %v1079_v27 = vunpack.c.l.bf16 (%p614_p1), %v8234_v18 }
 0x418   :  { %v1068_v5 = vld [vmem:[#allocation2 + $0x1c] sm:$0x1] (%p614_p1)  ;;  %v1069_v6 = vld [vmem:[#allocation2 + $0x20] sm:$0xe] (%p614_p1)  ;;  %v1070_v21 = vld [vmem:[#allocation2 + $0x24] sm:$0x1] (%p614_p1)  ;;  %v1080_v28 = vunpack.c.l.bf16 (%p614_p1), %v8236_v19  ;;  %v1081_v29 = vunpack.c.l.bf16 (%p614_p1), %v8238_v20  ;;  %v1082_v33 = vunpack.c.l.bf16 (%p614_p1), %v8240_v22  ;;  %v1083_v34 = vunpack.c.l.bf16 (%p614_p1), %v8242_v1 }
 0x419   : > { %v9629_v12 = vmov %v1030_v7  ;;  %v1044_v9 = vmul.f32 (%p614_p1), 0.0078125, %v1030_v7  ;;  %v1045_v11 = vmul.f32 (%p614_p1), %v8230_v8, %v8230_v8  ;;  %v1071_v48 = vld [vmem:[#allocation2 + $0x28] sm:$0xe] (%p614_p1)  ;;  %v1073_v24 = vld [vmem:[#allocation2 + $0x30] sm:$0xe] (%p614_p1)  ;;  %v1084_v35 = vunpack.c.l.bf16 (%p614_p1), %v1068_v5 }
 0x41a   :  { %v1072_v12 = vld [vmem:[#allocation2 + $0x2c] sm:$0x1]  ;;  %v1074_v25 = vld [vmem:[#allocation2 + $0x34] sm:$0x1]  ;;  %v1075_v30 = vld [vmem:[#allocation2 + $0x38] sm:$0xe]  ;;  %v1085_v39 = vunpack.c.l.bf16 %v1069_v6  ;;  %v1086_v40 = vunpack.c.l.bf16 %v1070_v21  ;;  %v1087_v41 = vunpack.c.l.bf16 %v1071_v48  ;;  %v1089_v47 = vunpack.c.l.bf16 %v1073_v24 }
 0x41b   :  { %v1046_v10 = vsub.f32 %v1044_v9, %v1045_v11  ;;  %v1076_v31 = vld [vmem:[#allocation2 + $0x3c] sm:$0x1]  ;;  %v8253_v36 = vld [vmem:[#allocation2 + $0x40] sm:$0xe]  ;;  %v8255_v37 = vld [vmem:[#allocation2 + $0x44] sm:$0x1]  ;;  %v1088_v42 = vunpack.c.l.bf16 %v1072_v12  ;;  %v1090_v49 = vunpack.c.l.bf16 %v1074_v25  ;;  %v1091_v50 = vunpack.c.l.bf16 %v1075_v30 }
 0x41c   :  { %v8257_v38 = vld [vmem:[#allocation2 + $0x58] sm:$0xe]  ;;  %v8259_v43 = vld [vmem:[#allocation2 + $0x5c] sm:$0x1]  ;;  %v8261_v44 = vld [vmem:[#allocation2 + $0x60] sm:$0xe]  ;;  %v1092_v54 = vunpack.c.l.bf16 %v1076_v31  ;;  %v1093_v55 = vunpack.c.l.bf16 %v8253_v36  ;;  %v1094_v56 = vunpack.c.l.bf16 %v8255_v37 }
 0x41d   :  { %v1047_v15 = vmax.f32 %v1046_v10, 0.0  ;;  %v8263_v45 = vld [vmem:[#allocation2 + $0x64] sm:$0x1]  ;;  %v8267_v51 = vld [vmem:[#allocation2 + $0x68] sm:$0xe]  ;;  %v1226_v59 = vunpack.c.l.bf16 %v8257_v38  ;;  %v1227_v60 = vunpack.c.l.bf16 %v8259_v43  ;;  %v1228_v61 = vunpack.c.l.bf16 %v8261_v44 }
 0x41e   :  { %v8269_v52 = vld [vmem:[#allocation2 + $0x6c] sm:$0x1]  ;;  %v8274_v57 = vld [vmem:[#allocation2 + $0x70] sm:$0xe]  ;;  %v8276_v58 = vld [vmem:[#allocation2 + $0x74] sm:$0x1]  ;;  %v1229_v62 = vunpack.c.l.bf16 %v8263_v45  ;;  %v1230_v7 = vunpack.c.l.bf16 %v8267_v51 }
 0x41f   :  { %v1048_v16 = vadd.f32 1e-05, %v1047_v15  ;;  %v8282_v63 = vld [vmem:[#allocation2 + $0x78] sm:$0xe]  ;;  %v1231_v9 = vunpack.c.l.bf16 %v8269_v52  ;;  %v8289_v11 = vld [vmem:[#allocation2 + $0x7c] sm:$0x1]  ;;  %v1232_v10 = vunpack.c.l.bf16 %v8274_v57  ;;  %v1233_v15 = vunpack.c.l.bf16 %v8276_v58 }
 0x420   :  { %v8353_v45 = vld [vmem:[%s9618_s6] sm:$0x1] }
 0x421   :  { %7671 = vrsqrt.f32 %v1048_v16  ;;  %vm1055_vm9 = vweird.f32 %v1048_v16 }
 0x427   :  { %v7672_v13 = vpop.eup %7671 }
 0x428   :  { %v1050_v14 = vmul.f32 %v7672_v13, %v1048_v16  ;;  %vm1056_vm10 = vweird.f32 %v7672_v13  ;;  %v1234_v16 = vunpack.c.l.bf16 %v8282_v63 }
 0x429   :  { %vm8244_vm11 = vmor %vm1055_vm9, %vm1056_vm10 }
 0x42a   :  { %v1051_v17 = vmul.f32 %v7672_v13, %v1050_v14 }
 0x42c   :  { %v1052_v4 = vmul.f32 0.5, %v1051_v17 }
 0x42e   :  { %v1053_v23 = vsub.f32 1.5, %v1052_v4 }
 0x430   :  { %v1054_v32 = vmul.f32 %v7672_v13, %v1053_v23 }
 0x432   :  { %v1058_v46 = vsel %vm8244_vm11, %v7672_v13, %v1054_v32  ;;  %v1235_v13 = vunpack.c.l.bf16 %v8289_v11  ;;  %v1222_v11 = vld [vmem:[#allocation2 + $0x88] sm:$0xe] }
 0x433   :  { %v1059_v53 = vmul.f32 %v1058_v46, %v7920_v2 }
 0x435   :  { %v1060_v2 = vmul.f32 %v1059_v53, %v8230_v8  ;;  %v8285_v0 = vperm.slane %v1059_v53, 0 }
 0x437   :  { %v1061_v14 = vsub.f32 %v7925_v3, %v1060_v2  ;;  %v1096_v8 = vmul.f32 %v8285_v0, %v1079_v27  ;;  %v1097_v17 = vmul.f32 %v8285_v0, %v1080_v28  ;;  %v1098_v18 = vmul.f32 %v8285_v0, %v1081_v29 }
 0x438   :  { %v1099_v19 = vmul.f32 %v8285_v0, %v1082_v33  ;;  %v1100_v20 = vmul.f32 %v8285_v0, %v1083_v34  ;;  %v1101_v22 = vmul.f32 %v8285_v0, %v1084_v35  ;;  %v1102_v1 = vmul.f32 %v8285_v0, %v1085_v39 }
 0x439   :  { %v8303_v4 = vperm.slane %v1061_v14, 0  ;;  %v1103_v5 = vmul.f32 %v8285_v0, %v1086_v40  ;;  %v1104_v3 = vmul.f32 %v8285_v0, %v1087_v41  ;;  %v1105_v6 = vmul.f32 %v8285_v0, %v1088_v42 }
 0x43a   :  { %v1106_v21 = vmul.f32 %v8285_v0, %v1089_v47  ;;  %v1107_v48 = vmul.f32 %v8285_v0, %v1090_v49  ;;  %v1108_v12 = vmul.f32 %v8285_v0, %v1091_v50  ;;  %v1109_v23 = vmul.f32 %v8285_v0, %v1092_v54 }
 0x43b   :  { %v1113_v24 = vadd.f32 %v8303_v4, %v1096_v8  ;;  %v1114_v25 = vadd.f32 %v8303_v4, %v1097_v17  ;;  %v1115_v26 = vadd.f32 %v8303_v4, %v1098_v18  ;;  %v1116_v27 = vadd.f32 %v8303_v4, %v1099_v19 }
 0x43c   :  { %v1117_v28 = vadd.f32 %v8303_v4, %v1100_v20  ;;  %v1118_v29 = vadd.f32 %v8303_v4, %v1101_v22  ;;  %v1119_v30 = vadd.f32 %v8303_v4, %v1102_v1  ;;  %v1120_v31 = vadd.f32 %v8303_v4, %v1103_v5 }
 0x43d   :  { %vm1129_vm12 = vcmp.gt.f32.partialorder %v1113_v24, 0.0  ;;  %v1145_v32 = vmul.f32 0.01, %v1113_v24  ;;  %vm1130_vm13 = vcmp.gt.f32.partialorder %v1114_v25, 0.0  ;;  %v1146_v33 = vmul.f32 0.01, %v1114_v25 }
 0x43e   :  { %vm1131_vm14 = vcmp.gt.f32.partialorder %v1115_v26, 0.0  ;;  %v1147_v34 = vmul.f32 0.01, %v1115_v26  ;;  %vm1132_vm15 = vcmp.gt.f32.partialorder %v1116_v27, 0.0  ;;  %v1148_v35 = vmul.f32 0.01, %v1116_v27 }
 0x43f   :  { %v1161_v39 = vsel %vm1129_vm12, %v1113_v24, %v1145_v32  ;;  %v1162_v40 = vsel %vm1130_vm13, %v1114_v25, %v1146_v33  ;;  %vm1133_vm1 = vcmp.gt.f32.partialorder %v1117_v28, 0.0  ;;  %v1149_v41 = vmul.f32 0.01, %v1117_v28 }
 0x440   :  { %v1177_v42 = vpack.c.bf16 %v1161_v39, %v1161_v39  ;;  %v1178_v46 = vpack.c.bf16 %v1162_v40, %v1162_v40  ;;  %v1163_v47 = vsel %vm1131_vm14, %v1115_v26, %v1147_v34  ;;  %v1164_v49 = vsel %vm1132_vm15, %v1116_v27, %v1148_v35 }
 0x441   :  { %v1179_v50 = vpack.c.bf16 %v1163_v47, %v1163_v47  ;;  %v1180_v53 = vpack.c.bf16 %v1164_v49, %v1164_v49  ;;  %v1165_v54 = vsel %vm1133_vm1, %v1117_v28, %v1149_v41  ;;  %vm1134_vm2 = vcmp.gt.f32.partialorder %v1118_v29, 0.0 }
 0x442   :  { %1193 = vst [vmem:[#allocation2 + $0x8] sm:$0xe] %v1177_v42  ;;  %v1181_v2 = vpack.c.bf16 %v1165_v54, %v1165_v54  ;;  %v1150_v14 = vmul.f32 0.01, %v1118_v29  ;;  %vm1135_vm4 = vcmp.gt.f32.partialorder %v1119_v30, 0.0  ;;  %vm1136_vm5 = vcmp.gt.f32.partialorder %v1120_v31, 0.0 }
 0x443   :  { %1194 = vst [vmem:[#allocation2 + $0xc] sm:$0x1] %v1178_v46  ;;  %v1151_v8 = vmul.f32 0.01, %v1119_v30  ;;  %v1152_v17 = vmul.f32 0.01, %v1120_v31  ;;  %v1121_v18 = vadd.f32 %v8303_v4, %v1104_v3  ;;  %v1122_v19 = vadd.f32 %v8303_v4, %v1105_v6 }
 0x444   :  { %1195 = vst [vmem:[#allocation2 + $0x10] sm:$0xe] %v1179_v50  ;;  %v1166_v20 = vsel %vm1134_vm2, %v1118_v29, %v1150_v14  ;;  %v1123_v22 = vadd.f32 %v8303_v4, %v1106_v21  ;;  %v1124_v1 = vadd.f32 %v8303_v4, %v1107_v48  ;;  %v1125_v5 = vadd.f32 %v8303_v4, %v1108_v12 }
 0x445   :  { %1196 = vst [vmem:[#allocation2 + $0x14] sm:$0x1] %v1180_v53  ;;  %v1182_v24 = vpack.c.bf16 %v1166_v20, %v1166_v20  ;;  %v1167_v25 = vsel %vm1135_vm4, %v1119_v30, %v1151_v8  ;;  %v1168_v26 = vsel %vm1136_vm5, %v1120_v31, %v1152_v17  ;;  %vm1137_vm6 = vcmp.gt.f32.partialorder %v1121_v18, 0.0 }
 0x446   :  { %1197 = vst [vmem:[#allocation2 + $0x18] sm:$0xe] %v1181_v2  ;;  %v1183_v27 = vpack.c.bf16 %v1167_v25, %v1167_v25  ;;  %v1184_v28 = vpack.c.bf16 %v1168_v26, %v1168_v26  ;;  %v1153_v32 = vmul.f32 0.01, %v1121_v18  ;;  %vm1138_vm7 = vcmp.gt.f32.partialorder %v1122_v19, 0.0 }
 0x447   :  { %1198 = vst [vmem:[#allocation2 + $0x1c] sm:$0x1] %v1182_v24  ;;  %v1154_v3 = vmul.f32 0.01, %v1122_v19  ;;  %vm1139_vm8 = vcmp.gt.f32.partialorder %v1123_v22, 0.0  ;;  %vm1140_vm9 = vcmp.gt.f32.partialorder %v1124_v1, 0.0  ;;  %v1126_v6 = vadd.f32 %v8303_v4, %v1109_v23 }
 0x448   :  { %1199 = vst [vmem:[#allocation2 + $0x20] sm:$0xe] %v1183_v27  ;;  %v1169_v21 = vsel %vm1137_vm6, %v1121_v18, %v1153_v32  ;;  %v1155_v48 = vmul.f32 0.01, %v1123_v22  ;;  %v1156_v12 = vmul.f32 0.01, %v1124_v1  ;;  %v1110_v29 = vmul.f32 %v8285_v0, %v1093_v55 }
 0x449   :  { %1200 = vst [vmem:[#allocation2 + $0x24] sm:$0x1] %v1184_v28  ;;  %v1185_v30 = vpack.c.bf16 %v1169_v21, %v1169_v21  ;;  %v1170_v31 = vsel %vm1138_vm7, %v1122_v19, %v1154_v3  ;;  %vm1141_vm10 = vcmp.gt.f32.partialorder %v1125_v5, 0.0  ;;  %v1157_v33 = vmul.f32 0.01, %v1125_v5 }
 0x44a   :  { %v1186_v34 = vpack.c.bf16 %v1170_v31, %v1170_v31  ;;  %v1171_v35 = vsel %vm1139_vm8, %v1123_v22, %v1155_v48  ;;  %v1172_v39 = vsel %vm1140_vm9, %v1124_v1, %v1156_v12  ;;  %vm1142_vm11 = vcmp.gt.f32.partialorder %v1126_v6, 0.0  ;;  %v8366_v18 = vld [vmem:[%s9618_s6 + $0x2] sm:$0x1]  ;;  %v8372_v27 = vld [vmem:[%s9616_s4] sm:$0x3] }
 0x44b   :  { %1201 = vst [vmem:[#allocation2 + $0x28] sm:$0xe] %v1185_v30  ;;  %v1187_v40 = vpack.c.bf16 %v1171_v35, %v1171_v35  ;;  %v1188_v23 = vpack.c.bf16 %v1172_v39, %v1172_v39  ;;  %v1173_v41 = vsel %vm1141_vm10, %v1125_v5, %v1157_v33  ;;  %v1158_v42 = vmul.f32 0.01, %v1126_v6  ;;  %v8377_v28 = vld [vmem:[%s9616_s4 + $0x2] sm:$0x3] }
 0x44c   :  { %1202 = vst [vmem:[#allocation2 + $0x2c] sm:$0x1] %v1186_v34  ;;  %v1189_v46 = vpack.c.bf16 %v1173_v41, %v1173_v41  ;;  %v1127_v36 = vadd.f32 %v8303_v4, %v1110_v29  ;;  %v1111_v55 = vmul.f32 %v8285_v0, %v1094_v56  ;;  %v1242_v47 = vmul.f32 %v1226_v59, %v8285_v0  ;;  %v8382_v32 = vld [vmem:[%s9616_s4 + $0x4] sm:$0x3]  ;;  %v1220_v12 = vld [vmem:[#allocation2 + $0x80] sm:$0xe] }
 0x44d   :  { %1203 = vst [vmem:[#allocation2 + $0x30] sm:$0xe] %v1187_v40  ;;  %v1174_v49 = vsel %vm1142_vm11, %v1126_v6, %v1158_v42  ;;  %v1243_v50 = vmul.f32 %v1227_v60, %v8285_v0  ;;  %v1244_v53 = vmul.f32 %v1228_v61, %v8285_v0  ;;  %v1245_v37 = vmul.f32 %v1229_v62, %v8285_v0  ;;  %v8358_v61 = vld [vmem:[%s9618_s6 + $0x1] sm:$0x1]  ;;  %v1221_v29 = vld [vmem:[#allocation2 + $0x84] sm:$0x1] }
 0x44e   :  { %1204 = vst [vmem:[#allocation2 + $0x34] sm:$0x1] %v1188_v23  ;;  %v1190_v56 = vpack.c.bf16 %v1174_v49, %v1174_v49  ;;  %vm1143_vm12 = vcmp.gt.f32.partialorder %v1127_v36, 0.0  ;;  %v1159_v54 = vmul.f32 0.01, %v1127_v36  ;;  %v1128_v38 = vadd.f32 %v8303_v4, %v1111_v55  ;;  %s8420_s4 = smov 0  }
 0x44f   :  { %1205 = vst [vmem:[#allocation2 + $0x38] sm:$0xe] %v1189_v46  ;;  %v1258_v59 = vadd.f32 %v1242_v47, %v8303_v4  ;;  %v1259_v43 = vadd.f32 %v1243_v50, %v8303_v4  ;;  %v1260_v60 = vadd.f32 %v1244_v53, %v8303_v4  ;;  %v1261_v44 = vadd.f32 %v1245_v37, %v8303_v4  ;;  %v1223_v49 = vld [vmem:[#allocation2 + $0x8c] sm:$0x1] }
 0x450   :  { %1206 = vst [vmem:[#allocation2 + $0x3c] sm:$0x1] %v1190_v56  ;;  %v1175_v62 = vsel %vm1143_vm12, %v1127_v36, %v1159_v54  ;;  %vm1144_vm13 = vcmp.gt.f32.partialorder %v1128_v38, 0.0  ;;  %v1160_v2 = vmul.f32 0.01, %v1128_v38  ;;  %v1246_v14 = vmul.f32 %v1230_v7, %v8285_v0 }
 0x451   :  { %v1191_v8 = vpack.c.bf16 %v1175_v62, %v1175_v62  ;;  %vm1274_vm14 = vcmp.gt.f32.partialorder %v1258_v59, 0.0  ;;  %v1290_v17 = vmul.f32 0.01, %v1258_v59  ;;  %vm1275_vm15 = vcmp.gt.f32.partialorder %v1259_v43, 0.0 }
 0x452   :  { %v1176_v19 = vsel %vm1144_vm13, %v1128_v38, %v1160_v2  ;;  %v1291_v20 = vmul.f32 0.01, %v1259_v43  ;;  %vm1276_vm1 = vcmp.gt.f32.partialorder %v1260_v60, 0.0  ;;  %v1292_v22 = vmul.f32 0.01, %v1260_v60 }
 0x453   :  { %1207 = vst [vmem:[#allocation2 + $0x40] sm:$0xe] %v1191_v8  ;;  %v1192_v1 = vpack.c.bf16 %v1176_v19, %v1176_v19  ;;  %v1306_v5 = vsel %vm1274_vm14, %v1258_v59, %v1290_v17  ;;  %vm1277_vm2 = vcmp.gt.f32.partialorder %v1261_v44, 0.0  ;;  %v1293_v24 = vmul.f32 0.01, %v1261_v44 }
 0x454   :  { %v1322_v51 = vpack.c.bf16 %v1306_v5, %v1306_v5  ;;  %v1307_v7 = vsel %vm1275_vm15, %v1259_v43, %v1291_v20  ;;  %v1308_v25 = vsel %vm1276_vm1, %v1260_v60, %v1292_v22  ;;  %v1262_v26 = vadd.f32 %v1246_v14, %v8303_v4  ;;  %v1224_v43 = vld [vmem:[#allocation2 + $0x90] sm:$0xe]  ;;  %v1225_v60 = vld [vmem:[#allocation2 + $0x94] sm:$0x1] }
 0x455   :  { %1208 = vst [vmem:[#allocation2 + $0x44] sm:$0x1] %v1192_v1  ;;  %v1323_v3 = vpack.c.bf16 %v1307_v7, %v1307_v7  ;;  %v1324_v6 = vpack.c.bf16 %v1308_v25, %v1308_v25  ;;  %v1309_v21 = vsel %vm1277_vm2, %v1261_v44, %v1293_v24  ;;  %v1247_v48 = vmul.f32 %v1231_v9, %v8285_v0 }
 0x456   :  { %1338 = vst [vmem:[#allocation2 + $0x58] sm:$0xe] %v1322_v51  ;;  %v1325_v30 = vpack.c.bf16 %v1309_v21, %v1309_v21  ;;  %vm1278_vm4 = vcmp.gt.f32.partialorder %v1262_v26, 0.0  ;;  %v1294_v31 = vmul.f32 0.01, %v1262_v26  ;;  %v1248_v33 = vmul.f32 %v1232_v10, %v8285_v0 }
 0x457   :  { %1339 = vst [vmem:[#allocation2 + $0x5c] sm:$0x1] %v1323_v3  ;;  %v1263_v34 = vadd.f32 %v1247_v48, %v8303_v4  ;;  %v1249_v35 = vmul.f32 %v1233_v15, %v8285_v0  ;;  %v1250_v52 = vmul.f32 %v1234_v16, %v8285_v0  ;;  %v1251_v9 = vmul.f32 %v1235_v13, %v8285_v0 }
 0x458   :  { %1340 = vst [vmem:[#allocation2 + $0x60] sm:$0xe] %v1324_v6  ;;  %v1310_v39 = vsel %vm1278_vm4, %v1262_v26, %v1294_v31  ;;  %v1264_v57 = vadd.f32 %v1248_v33, %v8303_v4  ;;  %v1236_v10 = vunpack.c.l.bf16 %v1220_v12  ;;  %v1237_v40 = vunpack.c.l.bf16 %v1221_v29 }
 0x459   :  { %1341 = vst [vmem:[#allocation2 + $0x64] sm:$0x1] %v1325_v30  ;;  %v1326_v23 = vpack.c.bf16 %v1310_v39, %v1310_v39  ;;  %vm1279_vm5 = vcmp.gt.f32.partialorder %v1263_v34, 0.0  ;;  %v1295_v41 = vmul.f32 0.01, %v1263_v34  ;;  %v1265_v58 = vadd.f32 %v1249_v35, %v8303_v4 }
 0x45a   :  { %vm1280_vm6 = vcmp.gt.f32.partialorder %v1264_v57, 0.0  ;;  %v1296_v15 = vmul.f32 0.01, %v1264_v57  ;;  %v1266_v63 = vadd.f32 %v1250_v52, %v8303_v4  ;;  %v1267_v16 = vadd.f32 %v1251_v9, %v8303_v4 }
 0x45b   :  { %1342 = vst [vmem:[#allocation2 + $0x68] sm:$0xe] %v1326_v23  ;;  %v1311_v13 = vsel %vm1279_vm5, %v1263_v34, %v1295_v41  ;;  %vm1281_vm7 = vcmp.gt.f32.partialorder %v1265_v58, 0.0  ;;  %v1297_v42 = vmul.f32 0.01, %v1265_v58  ;;  %v1252_v46 = vmul.f32 %v1236_v10, %v8285_v0 }
 0x45c   :  { %v1327_v36 = vpack.c.bf16 %v1311_v13, %v1311_v13  ;;  %v1312_v55 = vsel %vm1280_vm6, %v1264_v57, %v1296_v15  ;;  %vm1282_vm8 = vcmp.gt.f32.partialorder %v1266_v63, 0.0  ;;  %v1298_v47 = vmul.f32 0.01, %v1266_v63 }
 0x45d   :  { %v1328_v50 = vpack.c.bf16 %v1312_v55, %v1312_v55  ;;  %v1313_v53 = vsel %vm1281_vm7, %v1265_v58, %v1297_v42  ;;  %vm1283_vm9 = vcmp.gt.f32.partialorder %v1267_v16, 0.0  ;;  %v1299_v37 = vmul.f32 0.01, %v1267_v16 }
 0x45e   :  { %1343 = vst [vmem:[#allocation2 + $0x6c] sm:$0x1] %v1327_v36  ;;  %v1329_v56 = vpack.c.bf16 %v1313_v53, %v1313_v53  ;;  %v1314_v54 = vsel %vm1282_vm8, %v1266_v63, %v1298_v47  ;;  %v1268_v38 = vadd.f32 %v1252_v46, %v8303_v4  ;;  %v1253_v59 = vmul.f32 %v1237_v40, %v8285_v0 }
 0x45f   :  { %1344 = vst [vmem:[#allocation2 + $0x70] sm:$0xe] %v1328_v50  ;;  %v1330_v44 = vpack.c.bf16 %v1314_v54, %v1314_v54  ;;  %v1315_v62 = vsel %vm1283_vm9, %v1267_v16, %v1299_v37  ;;  %v1238_v2 = vunpack.c.l.bf16 %v1222_v11  ;;  %v1239_v14 = vunpack.c.l.bf16 %v1223_v49 }
 0x460   :  { %1345 = vst [vmem:[#allocation2 + $0x74] sm:$0x1] %v1329_v56  ;;  %v1331_v8 = vpack.c.bf16 %v1315_v62, %v1315_v62  ;;  %vm1284_vm10 = vcmp.gt.f32.partialorder %v1268_v38, 0.0  ;;  %v1300_v17 = vmul.f32 0.01, %v1268_v38  ;;  %v1269_v19 = vadd.f32 %v1253_v59, %v8303_v4 }
 0x461   :  { %1346 = vst [vmem:[#allocation2 + $0x78] sm:$0xe] %v1330_v44  ;;  %v1254_v20 = vmul.f32 %v1238_v2, %v8285_v0  ;;  %v1255_v22 = vmul.f32 %v1239_v14, %v8285_v0  ;;  %v1240_v1 = vunpack.c.l.bf16 %v1224_v43  ;;  %v1241_v5 = vunpack.c.l.bf16 %v1225_v60 }
 0x462   :  { %1347 = vst [vmem:[#allocation2 + $0x7c] sm:$0x1] %v1331_v8  ;;  %v1316_v24 = vsel %vm1284_vm10, %v1268_v38, %v1300_v17  ;;  %vm1285_vm11 = vcmp.gt.f32.partialorder %v1269_v19, 0.0  ;;  %v1301_v51 = vmul.f32 0.01, %v1269_v19  ;;  %v8416_v23 = vmov 0.0  }
 0x463   :  { %v1332_v7 = vpack.c.bf16 %v1316_v24, %v1316_v24  ;;  %v1270_v25 = vadd.f32 %v1254_v20, %v8303_v4  ;;  %v1271_v26 = vadd.f32 %v1255_v22, %v8303_v4  ;;  %v1256_v3 = vmul.f32 %v1240_v1, %v8285_v0 }
 0x464   :  { %v1317_v6 = vsel %vm1285_vm11, %v1269_v19, %v1301_v51  ;;  %v1257_v21 = vmul.f32 %v1241_v5, %v8285_v0 }
 0x465   :  { %1348 = vst [vmem:[#allocation2 + $0x80] sm:$0xe] %v1332_v7  ;;  %v1333_v48 = vpack.c.bf16 %v1317_v6, %v1317_v6  ;;  %vm1286_vm12 = vcmp.gt.f32.partialorder %v1270_v25, 0.0  ;;  %v1302_v12 = vmul.f32 0.01, %v1270_v25  ;;  %vm1287_vm13 = vcmp.gt.f32.partialorder %v1271_v26, 0.0 }
 0x466   :  { %v1303_v29 = vmul.f32 0.01, %v1271_v26  ;;  %v1272_v30 = vadd.f32 %v1256_v3, %v8303_v4  ;;  %v1273_v31 = vadd.f32 %v1257_v21, %v8303_v4  ;;  %v8418_v4 = vmov 0.0  }
 0x467   :  { %1349 = vst [vmem:[#allocation2 + $0x84] sm:$0x1] %v1333_v48  ;;  %v1318_v33 = vsel %vm1286_vm12, %v1270_v25, %v1302_v12 }
 0x468   :  { %v1334_v34 = vpack.c.bf16 %v1318_v33, %v1318_v33  ;;  %v1319_v35 = vsel %vm1287_vm13, %v1271_v26, %v1303_v29  ;;  %vm1288_vm14 = vcmp.gt.f32.partialorder %v1272_v30, 0.0  ;;  %v1304_v52 = vmul.f32 0.01, %v1272_v30 }
 0x469   :  { %v1335_v9 = vpack.c.bf16 %v1319_v35, %v1319_v35  ;;  %vm1289_vm15 = vcmp.gt.f32.partialorder %v1273_v31, 0.0  ;;  %v1305_v39 = vmul.f32 0.01, %v1273_v31 }
 0x46a   :  { %1350 = vst [vmem:[#allocation2 + $0x88] sm:$0xe] %v1334_v34  ;;  %v1320_v0 = vsel %vm1288_vm14, %v1272_v30, %v1304_v52 }
 0x46b   :  { %1351 = vst [vmem:[#allocation2 + $0x8c] sm:$0x1] %v1335_v9  ;;  %v1336_v57 = vpack.c.bf16 %v1320_v0, %v1320_v0  ;;  %v1321_v10 = vsel %vm1289_vm15, %v1273_v31, %v1305_v39 }
 0x46c   :  { %v1337_v40 = vpack.c.bf16 %v1321_v10, %v1321_v10 }
 0x46d   :  { %1352 = vst [vmem:[#allocation2 + $0x90] sm:$0xe] %v1336_v57 }
 0x46e   :  { %1353 = vst [vmem:[#allocation2 + $0x94] sm:$0x1] %v1337_v40 }
 0x46f LB: > { %vm1385_vm1 = vcmask 1044480   ;;  %vm1386_vm2 = vcmask 1045504   ;;  %v7852_v41 = vmov 65535   ;;  %s7214_s7 = sshll.u32 %s7809_s4, 4  ;;  %v7223_v15 = vld [vmem:[%s9617_s5 + $0x38] sm:$0xff]  ;;  %v7222_v16 = vld [vmem:[%s9617_s5 + $0x30] sm:$0xff]  ;;  %s7809_s4 = sphi %s8420_s4, %s1367_s4   ;;  %v7805_v4 = vphi %v8418_v4, %v9634_v4   ;;  %v7801_v23 = vphi %v8416_v23, %v9633_v23  }
 0x470   : > { %v1387_v58 = vsel %vm1385_vm1, 4294967295, %v7852_v41  ;;  %s8440_s26 = scalar_lea.vmem [#allocation2], %s7214_s7  ;;  %1565 = vmatpush.bf16.msra.mxu3 %v7223_v15  ;;  %v7231_v47 = vld [vmem:[%s9617_s5 + $0x78] sm:$0xff]  ;;  %vm1381_vm4 = vcmask 89088   ;;  %v7221_v37 = vld [vmem:[%s9617_s5 + $0x28] sm:$0xff]  ;;  %v7230_v56 = vld [vmem:[%s9617_s5 + $0x70] sm:$0xff] }
 0x471   : > { %v8435_v63 = vsel %vm1386_vm2, %v1387_v58, 0  ;;  %v7239_v50 = vld [vmem:[%s9617_s5 + $0xb8] sm:$0xff]  ;;  %v7238_v54 = vld [vmem:[%s9617_s5 + $0xb0] sm:$0xff]  ;;  %v7220_v38 = vld [vmem:[%s9617_s5 + $0x20] sm:$0xff] }
 0x472   : > { %v7229_v59 = vld [vmem:[%s9617_s5 + $0x68] sm:$0xff]  ;;  %v7219_v60 = vld [vmem:[%s9617_s5 + $0x18] sm:$0xff]  ;;  %v7228_v44 = vld [vmem:[%s9617_s5 + $0x60] sm:$0xff] }
 0x473   : > { %v7237_v43 = vld [vmem:[%s9617_s5 + $0xa8] sm:$0xff]  ;;  %v7236_v62 = vld [vmem:[%s9617_s5 + $0xa0] sm:$0xff]  ;;  %v7218_v2 = vld [vmem:[%s9617_s5 + $0x10] sm:$0xff] }
 0x474   : > { %1566 = vmatpush.bf16.msra.mxu3 %v7222_v16  ;;  %v7227_v14 = vld [vmem:[%s9617_s5 + $0x58] sm:$0xff]  ;;  %v7226_v17 = vld [vmem:[%s9617_s5 + $0x50] sm:$0xff]  ;;  %v7225_v20 = vld [vmem:[%s9617_s5 + $0x48] sm:$0xff] }
 0x475   : > { %v5441_v11 = vld [vmem:[%s8440_s26] sm:$0xf]  ;;  %v7215_v13 = vld [vmem:[%s8440_s26] sm:$0x30]  ;;  %v5580_v42 = vld [vmem:[%s8440_s26 + $0x8] sm:$0xf] }
 0x476   : > { %v5442_v46 = vor.u32 %v7215_v13, %v5441_v11  ;;  %v7241_v36 = vld [vmem:[%s8440_s26 + $0x8] sm:$0x30]  ;;  %v7235_v8 = vld [vmem:[%s9617_s5 + $0x98] sm:$0xff]  ;;  %v7234_v19 = vld [vmem:[%s9617_s5 + $0x90] sm:$0xff] }
 0x477   : > { %v5581_v55 = vor.u32 %v7241_v36, %v5580_v42  ;;  %v7233_v22 = vld [vmem:[%s9617_s5 + $0x88] sm:$0xff]  ;;  %v7224_v1 = vld [vmem:[%s9617_s5 + $0x40] sm:$0xff]  ;;  %v7249_v5 = vld [vmem:[%s9617_s5 + $0xf8] sm:$0xff] }
 0x478   : > { %v1390_v49 = vand.u32 %v5442_v46, %v8435_v63  ;;  %1567 = vmatpush.bf16.msra.mxu3 %v7221_v37  ;;  %v7248_v24 = vld [vmem:[%s9617_s5 + $0xf0] sm:$0xff]  ;;  %v7247_v51 = vld [vmem:[%s9617_s5 + $0xe8] sm:$0xff]  ;;  %v7232_v7 = vld [vmem:[%s9617_s5 + $0x80] sm:$0xff] }
 0x479   : > { %v8454_v53 = vand.u32 %v5581_v55, %v8435_v63  ;;  %v7246_v25 = vld [vmem:[%s9617_s5 + $0xe0] sm:$0xff]  ;;  %v7217_v26 = vld [vmem:[%s9617_s5 + $0x8] sm:$0xff]  ;;  %v7245_v3 = vld [vmem:[%s9617_s5 + $0xd8] sm:$0xff] }
 0x47a   : > { %1399 = vmatpush.bf16.msra.mxu2 %v1390_v49  ;;  %1432 = vmatpush.bf16.msra.mxu1 %v1390_v49  ;;  %v7216_v6 = vld [vmem:[%s9617_s5] sm:$0xff]  ;;  %v7244_v21 = vld [vmem:[%s9617_s5 + $0xd0] sm:$0xff]  ;;  %v7243_v48 = vld [vmem:[%s9617_s5 + $0xc8] sm:$0xff] }
 0x47b   : > { %1588 = vmatpush.bf16.msra.mxu0 %v1390_v49  ;;  %v7242_v12 = vld [vmem:[%s9617_s5 + $0xc0] sm:$0xff]  ;;  %v5735_v29 = vld [vmem:[%s8440_s26 + $0x10] sm:$0xf]  ;;  %v7267_v30 = vld [vmem:[%s8440_s26 + $0x10] sm:$0x30]  ;;  %s5884_s26 = sshll.u32 %s7809_s4, 2 }
 0x47c   : > { %1568 = vmatpush.bf16.msra.mxu3 %v7220_v38  ;;  %v5736_v31 = vor.u32 %v7267_v30, %v5735_v29  ;;  %v7265_v0 = vld [vmem:[%s9617_s5 + $0x178] sm:$0xff]  ;;  %v7264_v41 = vld [vmem:[%s9617_s5 + $0x170] sm:$0xff]  ;;  %v7263_v15 = vld [vmem:[%s9617_s5 + $0x168] sm:$0xff]  ;;  %s5212_s15 = scalar_lea.vmem [#allocation3], %s5884_s26  ;;  %s1367_s4 = sadd.s32 1, %s7809_s4  }
 0x47d   : > { %5443 = vmatmul.msk.bf16.vlgmr.msra.gmra.mxu2 %vm1381_vm4, %v8372_v27  ;;  %5444 = vmatmul.msk.bf16.vlgmr.msra.gmra.mxu1 %vm1381_vm4, %v8377_v28  ;;  %v7257_v42 = vld [vmem:[%s9617_s5 + $0x138] sm:$0xff]  ;;  %v7262_v46 = vld [vmem:[%s9617_s5 + $0x160] sm:$0xff]  ;;  %v7256_v36 = vld [vmem:[%s9617_s5 + $0x130] sm:$0xff]  ;;  %p1364_p2 = scmp.ge.s32.totalorder %s1367_s4, 4  }
 0x47e   : > { %1504 = vmatpush.bf16.msrb.mxu2 %v7231_v47  ;;  %1660 = vmatpush.bf16.msrb.mxu1 %v7239_v50  ;;  %v8554_v52 = vand.u32 %v5736_v31, %v8435_v63  ;;  %v7261_v55 = vld [vmem:[%s9617_s5 + $0x158] sm:$0xff]  ;;  %v7255_v49 = vld [vmem:[%s9617_s5 + $0x128] sm:$0xff]  ;;  %v7260_v50 = vld [vmem:[%s9617_s5 + $0x150] sm:$0xff]  ;;  %s8708_s16 = smov (%p1364_p2), 0  }
 0x47f   : > { %1695 = vmatpush.bf16.msrb.mxu0 %v8454_v53  ;;  %v7275_v47 = vld [vmem:[%s9617_s5 + $0x1b8] sm:$0xff]  ;;  %v7254_v37 = vld [vmem:[%s9617_s5 + $0x120] sm:$0xff] }
 0x480   : > { %5525 = vmatmul.msk.bf16.vlgmr.msra.gmra.mxu0 %vm1381_vm4, %v8382_v32  ;;  %1569 = vmatpush.bf16.msra.mxu3 %v7219_v60  ;;  %v7253_v38 = vld [vmem:[%s9617_s5 + $0x118] sm:$0xff]  ;;  %v7252_v60 = vld [vmem:[%s9617_s5 + $0x110] sm:$0xff] }
 0x481   : > { %v7291_v30 = vld [vmem:[%s9617_s5 + $0x238] sm:$0xff] }
 0x482   : > { %1505 = vmatpush.bf16.msrb.mxu2 %v7230_v56  ;;  %1661 = vmatpush.bf16.msrb.mxu1 %v7238_v54  ;;  %v7259_v56 = vld [vmem:[%s9617_s5 + $0x148] sm:$0xff] }
 0x483   : > { %1860 = vmatpush.bf16.msra.mxu0 %v7257_v42  ;;  %v7273_v54 = vld [vmem:[%s9617_s5 + $0x1a8] sm:$0xff] }
 0x484   : > { %1570 = vmatpush.bf16.msra.mxu3 %v7218_v2  ;;  %v7270_v2 = vld [vmem:[%s9617_s5 + $0x190] sm:$0xff]  ;;  %v7277_v42 = vld [vmem:[%s9617_s5 + $0x1c8] sm:$0xff] }
 0x486   : > { %1506 = vmatpush.bf16.msrb.mxu2 %v7229_v59  ;;  %1662 = vmatpush.bf16.msrb.mxu1 %v7237_v43  ;;  %v7258_v59 = vld [vmem:[%s9617_s5 + $0x140] sm:$0xff] }
 0x487   : > { %1861 = vmatpush.bf16.msra.mxu0 %v7256_v36  ;;  %v7272_v43 = vld [vmem:[%s9617_s5 + $0x1a0] sm:$0xff] }
 0x488   : > { %1571 = vmatpush.bf16.msra.mxu3 %v7217_v26  ;;  %v7282_v26 = vld [vmem:[%s9617_s5 + $0x1f0] sm:$0xff] }
 0x48a   : > { %1507 = vmatpush.bf16.msrb.mxu2 %v7228_v44  ;;  %1663 = vmatpush.bf16.msrb.mxu1 %v7236_v62  ;;  %v7271_v44 = vld [vmem:[%s9617_s5 + $0x198] sm:$0xff]  ;;  %v7251_v62 = vld [vmem:[%s9617_s5 + $0x108] sm:$0xff] }
 0x48b   : > { %1862 = vmatpush.bf16.msra.mxu0 %v7255_v49 }
 0x48c   : > { %1572 = vmatpush.bf16.msra.mxu3 %v7216_v6 }
 0x48e   : > { %1508 = vmatpush.bf16.msrb.mxu2 %v7227_v14  ;;  %1664 = vmatpush.bf16.msrb.mxu1 %v7235_v8  ;;  %v7250_v14 = vld [vmem:[%s9617_s5 + $0x100] sm:$0xff]  ;;  %v7269_v8 = vld [vmem:[%s9617_s5 + $0x188] sm:$0xff] }
 0x48f   : > { %1863 = vmatpush.bf16.msra.mxu0 %v7254_v37 }
 0x490   : > { %5582 = vmatmul.msk.bf16.vlgmr.msrb.gmra.mxu0 %vm1381_vm4, %v8372_v27  ;;  %1788 = vmatpush.bf16.msrb.mxu3 %v8454_v53 }
 0x492   : > { %1509 = vmatpush.bf16.msrb.mxu2 %v7226_v17  ;;  %1665 = vmatpush.bf16.msrb.mxu1 %v7234_v19  ;;  %v7268_v17 = vld [vmem:[%s9617_s5 + $0x180] sm:$0xff] }
 0x493   : > { %1864 = vmatpush.bf16.msra.mxu0 %v7253_v38 }
 0x496   : > { %1510 = vmatpush.bf16.msrb.mxu2 %v7225_v20  ;;  %1666 = vmatpush.bf16.msrb.mxu1 %v7233_v22 }
 0x497   : > { %1865 = vmatpush.bf16.msra.mxu0 %v7252_v60 }
 0x49a   : > { %1511 = vmatpush.bf16.msrb.mxu2 %v7224_v1  ;;  %1667 = vmatpush.bf16.msrb.mxu1 %v7232_v7  ;;  %v7283_v7 = vld [vmem:[%s9617_s5 + $0x1f8] sm:$0xff] }
 0x49b   : > { %1866 = vmatpush.bf16.msra.mxu0 %v7251_v62 }
 0x49e   : > { %1767 = vmatpush.bf16.msra.mxu2 %v7249_v5  ;;  %1881 = vmatpush.bf16.msra.mxu1 %v8454_v53  ;;  %v7274_v53 = vld [vmem:[%s9617_s5 + $0x1b0] sm:$0xff] }
 0x49f   : > { %1867 = vmatpush.bf16.msra.mxu0 %v7250_v14 }
 0x4a2   : > { %1768 = vmatpush.bf16.msra.mxu2 %v7248_v24 }
 0x4a3   : > { %2081 = vmatpush.bf16.msrb.mxu0 %v8554_v52 }
 0x4a6   : > { %1769 = vmatpush.bf16.msra.mxu2 %v7247_v51 }
 0x4aa   : > { %1770 = vmatpush.bf16.msra.mxu2 %v7246_v25 }
 0x4ae   : > { %1771 = vmatpush.bf16.msra.mxu2 %v7245_v3 }
 0x4b2   : > { %1772 = vmatpush.bf16.msra.mxu2 %v7244_v21 }
 0x4b6   : > { %1773 = vmatpush.bf16.msra.mxu2 %v7243_v48 }
 0x4ba   : > { %1774 = vmatpush.bf16.msra.mxu2 %v7242_v12 }
 0x4fa   : > { %v1434_v33 = vpop.f32.mrf.mxu1 }
 0x4fb   : > { %v1438_v34 = vpack.c.bf16 %v1434_v33, %v1434_v33 }
 0x4fd   : > { %v1590_v35 = vpop.f32.mrf.mxu0  ;;  %1512 = vmatmul.bf16.vlgmr.msrb.gmra.mxu2 %v1438_v34 }
 0x4fe   : > { %v1594_v9 = vpack.c.bf16 %v1590_v35, %v1590_v35  ;;  %2060 = vmatpush.bf16.msrb.mxu2 %v7275_v47  ;;  %v7290_v35 = vld [vmem:[%s9617_s5 + $0x230] sm:$0xff] }
 0x500   : > { %1668 = vmatmul.bf16.vlgmr.msrb.gmra.mxu1 %v1594_v9  ;;  %v1401_v39 = vpop.f32.mrf.mxu2 }
 0x501   : > { %1988 = vmatpush.bf16.msrb.mxu1 %v8554_v52  ;;  %v1405_v57 = vpack.c.bf16 %v1401_v39, %v1401_v39  ;;  %v7289_v39 = vld [vmem:[%s9617_s5 + $0x228] sm:$0xff] }
 0x502   : > { %v1436_v10 = vpop.f32.mrf.mxu1  ;;  %2061 = vmatpush.bf16.msrb.mxu2 %v7274_v53 }
 0x503   : > { %1573 = vmatmul.bf16.vlgmr.msra.gmra.mxu3 %v1405_v57  ;;  %v7288_v57 = vld [vmem:[%s9617_s5 + $0x220] sm:$0xff]  ;;  %v7281_v10 = vld [vmem:[%s9617_s5 + $0x1e8] sm:$0xff] }
 0x504   : > { %1953 = vmatpush.bf16.msra.mxu3 %v7265_v0 }
 0x505   : > { %v1592_v40 = vpop.f32.mrf.mxu0 }
 0x506   : > { %2062 = vmatpush.bf16.msrb.mxu2 %v7273_v54  ;;  %v7287_v40 = vld [vmem:[%s9617_s5 + $0x218] sm:$0xff] }
 0x508   : > { %v1403_v58 = vpop.f32.mrf.mxu2  ;;  %1954 = vmatpush.bf16.msra.mxu3 %v7264_v41  ;;  %v7280_v41 = vld [vmem:[%s9617_s5 + $0x1e0] sm:$0xff] }
 0x509   : > { %v7286_v58 = vld [vmem:[%s9617_s5 + $0x210] sm:$0xff] }
 0x50a   : > { %2063 = vmatpush.bf16.msrb.mxu2 %v7272_v43 }
 0x50c   : > { %1955 = vmatpush.bf16.msra.mxu3 %v7263_v15  ;;  %v7279_v15 = vld [vmem:[%s9617_s5 + $0x1d8] sm:$0xff] }
 0x50d   : > { %v1697_v16 = vpop.f32.mrf.mxu0 }
 0x50e   : > { %v1701_v11 = vpack.c.bf16 %v1697_v16, %v1697_v16  ;;  %2064 = vmatpush.bf16.msrb.mxu2 %v7271_v44  ;;  %v7285_v16 = vld [vmem:[%s9617_s5 + $0x208] sm:$0xff] }
 0x510   : > { %1775 = vmatmul.bf16.vlgmr.msra.gmra.mxu2 %v1701_v11  ;;  %5680 = vmatmul.msk.bf16.vlgmr.msra.gmra.mxu1 %vm1381_vm4, %v8382_v32  ;;  %v7278_v11 = vld [vmem:[%s9617_s5 + $0x1d0] sm:$0xff] }
 0x511   : > { %1956 = vmatpush.bf16.msra.mxu3 %v7262_v46  ;;  %2153 = vmatpush.bf16.msra.mxu1 %v7283_v7  ;;  %v7276_v46 = vld [vmem:[%s9617_s5 + $0x1c0] sm:$0xff] }
 0x512   : > { %2065 = vmatpush.bf16.msrb.mxu2 %v7270_v2 }
 0x513   : > { %5631 = vmatmul.msk.bf16.vlgmr.msrb.gmra.mxu3 %vm1381_vm4, %v8377_v28 }
 0x515   : > { %v1699_v13 = vpop.f32.mrf.mxu0  ;;  %1957 = vmatpush.bf16.msra.mxu3 %v7261_v55  ;;  %2154 = vmatpush.bf16.msra.mxu1 %v7282_v26 }
 0x516   : > { %2066 = vmatpush.bf16.msrb.mxu2 %v7269_v8  ;;  %v7284_v13 = vld [vmem:[%s9617_s5 + $0x200] sm:$0xff] }
 0x519   : > { %1958 = vmatpush.bf16.msra.mxu3 %v7260_v50  ;;  %2155 = vmatpush.bf16.msra.mxu1 %v7281_v10 }
 0x51a   : > { %2067 = vmatpush.bf16.msrb.mxu2 %v7268_v17  ;;  %v2260_v17 = vperm.slane %v8353_v45, 0 }
 0x51d   : > { %1959 = vmatpush.bf16.msra.mxu3 %v7259_v56  ;;  %2156 = vmatpush.bf16.msra.mxu1 %v7280_v41 }
 0x520   : > { %5737 = vmatmul.msk.bf16.vlgmr.msrb.gmra.mxu1 %vm1381_vm4, %v8372_v27 }
 0x521   : > { %1960 = vmatpush.bf16.msra.mxu3 %v7258_v59  ;;  %2157 = vmatpush.bf16.msra.mxu1 %v7279_v15 }
 0x525   : > { %2174 = vmatpush.bf16.msrb.mxu3 %v8554_v52  ;;  %2158 = vmatpush.bf16.msra.mxu1 %v7278_v11 }
 0x529   : > { %2159 = vmatpush.bf16.msra.mxu1 %v7277_v42 }
 0x52d   : > { %2160 = vmatpush.bf16.msra.mxu1 %v7276_v46 }
 0x57d   : > { %v1669_v19 = vpop.f32.mrf.mxu1 }
 0x580   : > { %v1513_v20 = vpop.f32.mrf.mxu2 }
 0x585   : > { %v1671_v22 = vpop.f32.mrf.mxu1 }
 0x586   : > { %v1574_v1 = vpop.f32.mrf.mxu3 }
 0x587   : > { %v1575_v5 = vadd.f32 %v1574_v1, %v1513_v20 }
 0x588   : > { %v1515_v24 = vpop.f32.mrf.mxu2 }
 0x589   : > { %v1673_v51 = vadd.f32 %v1669_v19, %v1575_v5 }
 0x58d   : > { %v1883_v25 = vpop.f32.mrf.mxu1 }
 0x58e   : > { %v1887_v3 = vpack.c.bf16 %v1883_v25, %v1883_v25  ;;  %v1576_v6 = vpop.f32.mrf.mxu3 }
 0x590   : > { %1961 = vmatmul.bf16.vlgmr.msra.gmra.mxu3 %v1887_v3 }
 0x593   : > { %v1776_v21 = vpop.f32.mrf.mxu2 }
 0x594   : > { %v1780_v48 = vadd.f32 %v1776_v21, %v1673_v51 }
 0x595   : > { %v1885_v12 = vpop.f32.mrf.mxu1 }
 0x596   : > { %v1790_v29 = vpop.f32.mrf.mxu3 }
 0x597   : > { %v1794_v31 = vpack.c.bf16 %v1790_v29, %v1790_v29 }
 0x599   : > { %1868 = vmatmul.bf16.vlgmr.msra.gmra.mxu0 %v1794_v31 }
 0x59a   : > { %2246 = vmatpush.bf16.msra.mxu0 %v7291_v30 }
 0x59b   : > { %v1778_v33 = vpop.f32.mrf.mxu2 }
 0x59d   : > { %v1990_v34 = vpop.f32.mrf.mxu1 }
 0x59e   : > { %v1994_v52 = vpack.c.bf16 %v1990_v34, %v1990_v34  ;;  %v1792_v9 = vpop.f32.mrf.mxu3  ;;  %2247 = vmatpush.bf16.msra.mxu0 %v7290_v35 }
 0x5a0   : > { %2068 = vmatmul.bf16.vlgmr.msrb.gmra.mxu2 %v1994_v52  ;;  %5835 = vmatmul.msk.bf16.vlgmr.msrb.gmra.mxu3 %vm1381_vm4, %v8382_v32 }
 0x5a2   : > { %2248 = vmatpush.bf16.msra.mxu0 %v7289_v39 }
 0x5a5   : > { %v1992_v0 = vpop.f32.mrf.mxu1 }
 0x5a6   : > { %2249 = vmatpush.bf16.msra.mxu0 %v7288_v57 }
 0x5a9   : > { %5786 = vmatmul.msk.bf16.vlgmr.msrb.gmra.mxu0 %vm1381_vm4, %v8377_v28 }
 0x5aa   : > { %2250 = vmatpush.bf16.msra.mxu0 %v7287_v40 }
 0x5ae   : > { %2251 = vmatpush.bf16.msra.mxu0 %v7286_v58 }
 0x5b2   : > { %2252 = vmatpush.bf16.msra.mxu0 %v7285_v16 }
 0x5b6   : > { %2253 = vmatpush.bf16.msra.mxu0 %v7284_v13 }
 0x613   : > { %v1962_v36 = vpop.f32.mrf.mxu3 }
 0x616   : > { %v1869_v55 = vpop.f32.mrf.mxu0 }
 0x617   : > { %v1873_v47 = vadd.f32 %v1869_v55, %v1780_v48 }
 0x619   : > { %v1966_v50 = vadd.f32 %v1962_v36, %v1873_v47 }
 0x61b   : > { %v1964_v49 = vpop.f32.mrf.mxu3 }
 0x61e   : > { %v1871_v53 = vpop.f32.mrf.mxu0 }
 0x623   : > { %v2069_v37 = vpop.f32.mrf.mxu2  ;;  %v2176_v56 = vpop.f32.mrf.mxu3 }
 0x624   : > { %v2073_v54 = vadd.f32 %v2069_v37, %v1966_v50  ;;  %v2180_v38 = vpack.c.bf16 %v2176_v56, %v2176_v56 }
 0x626   : > { %2254 = vmatmul.bf16.vlgmr.msra.gmra.mxu0 %v2180_v38  ;;  %v2083_v59 = vpop.f32.mrf.mxu0 }
 0x627   : > { %v2087_v43 = vpack.c.bf16 %v2083_v59, %v2083_v59 }
 0x629   : > { %2161 = vmatmul.bf16.vlgmr.msra.gmra.mxu1 %v2087_v43 }
 0x62b   : > { %v2178_v60 = vpop.f32.mrf.mxu3  ;;  %v2071_v44 = vpop.f32.mrf.mxu2 }
 0x62e   : > { %v2085_v62 = vpop.f32.mrf.mxu0 }
 0x6a3   : > { %v2255_v2 = vpop.f32.mrf.mxu0 }
 0x6a6   : > { %v2162_v14 = vpop.f32.mrf.mxu1 }
 0x6a7   : > { %v2166_v8 = vadd.f32 %v2162_v14, %v2073_v54 }
 0x6a9   : > { %v2259_v19 = vadd.f32 %v2255_v2, %v2166_v8 }
 0x6ab   : > { %v2257_v20 = vpop.f32.mrf.mxu0  ;;  %v2261_v22 = vadd.f32 %v2260_v17, %v2259_v19 }
 0x6ad   : > { %v2263_v1 = vsel %vm135_vm3, %v2261_v22, 0.0  ;;  %v2271_v5 = vmul.f32 %v2261_v22, %v2261_v22  ;;  %v2280_v24 = vpack.c.bf16 %v2261_v22, %v2261_v22 }
 0x6ae   : > { %v2264_v51 = vrot.slane %v2263_v1, 4  ;;  %v2164_v7 = vpop.f32.mrf.mxu1 }
 0x6af   : > { %v2272_v25 = vsel %vm135_vm3, %v2271_v5, 0.0  ;;  %v2283_v26 = vrot.slane %v2280_v24, 7 }
 0x6b0   : > { %v2265_v3 = vadd.f32 %v2264_v51, %v2263_v1  ;;  %v2273_v6 = vrot.slane %v2272_v25, 4 }
 0x6b1   : > { %5885 = vst [vmem:[%s5212_s15 + $0x4] sm:$0x6] %v2283_v26 }
 0x6b2   : > { %v2266_v21 = vrot.slane %v2265_v3, 2  ;;  %v2274_v48 = vadd.f32 %v2273_v6, %v2272_v25 }
 0x6b4   : > { %v2267_v12 = vadd.f32 %v2266_v21, %v2265_v3  ;;  %v2275_v29 = vrot.slane %v2274_v48, 2 }
 0x6b6   : > { %v2268_v30 = vrot.slane %v2267_v12, 1  ;;  %v2276_v31 = vadd.f32 %v2275_v29, %v2274_v48 }
 0x6b8   : > { %v2269_v33 = vadd.f32 %v2268_v30, %v2267_v12  ;;  %v2277_v34 = vrot.slane %v2276_v31, 1 }
 0x6ba   : > { %v2270_v35 = vadd.f32 %v7805_v4, %v2269_v33   ;;  %v2278_v52 = vadd.f32 %v2277_v34, %v2276_v31  ;;  %1366 = sbr.rel (!%p1364_p2) target bundleno = 1135 (0x46f), region = 210 }
 0x6bc   : > { %v2279_v9 = vadd.f32 %v7801_v23, %v2278_v52   ;;  %v9634_v4 = vmov %v2270_v35 }
 0x6be   : > { %v9633_v23 = vmov %v2279_v9 }
 0x6bf LB: > { %s7292_s4 = sshll.u32 %s7821_s16, 4  ;;  %v7301_v23 = vld [vmem:[%s9617_s5 + $0x38] sm:$0xff]  ;;  %v7300_v4 = vld [vmem:[%s9617_s5 + $0x30] sm:$0xff]  ;;  %v7299_v13 = vld [vmem:[%s9617_s5 + $0x28] sm:$0xff]  ;;  %s7821_s16 = sphi %s8708_s16, %s2293_s16   ;;  %v7817_v35 = vphi %v2270_v35, %v9636_v35   ;;  %v7813_v9 = vphi %v2279_v9, %v9635_v9  }
 0x6c0   : > { %s8726_s20 = scalar_lea.vmem [#allocation2], %s7292_s4  ;;  %2492 = vmatpush.bf16.msra.mxu3 %v7301_v23  ;;  %v7309_v58 = vld [vmem:[%s9617_s5 + $0x78] sm:$0xff]  ;;  %v7308_v42 = vld [vmem:[%s9617_s5 + $0x70] sm:$0xff]  ;;  %v7298_v36 = vld [vmem:[%s9617_s5 + $0x20] sm:$0xff] }
 0x6c1   : > { %v5892_v39 = vld [vmem:[%s8726_s20 + $0x50] sm:$0xf]  ;;  %v7293_v0 = vld [vmem:[%s8726_s20 + $0x50] sm:$0x30]  ;;  %v6031_v57 = vld [vmem:[%s8726_s20 + $0x58] sm:$0xf] }
 0x6c2   : > { %v5893_v10 = vor.u32 %v7293_v0, %v5892_v39  ;;  %v7319_v40 = vld [vmem:[%s8726_s20 + $0x58] sm:$0x30]  ;;  %v7316_v46 = vld [vmem:[%s9617_s5 + $0xb0] sm:$0xff]  ;;  %v7307_v55 = vld [vmem:[%s9617_s5 + $0x68] sm:$0xff] }
 0x6c3   : > { %v6032_v41 = vor.u32 %v7319_v40, %v6031_v57  ;;  %v7317_v16 = vld [vmem:[%s9617_s5 + $0xb8] sm:$0xff]  ;;  %v7315_v47 = vld [vmem:[%s9617_s5 + $0xa8] sm:$0xff]  ;;  %v7306_v50 = vld [vmem:[%s9617_s5 + $0x60] sm:$0xff] }
 0x6c4   : > { %v2317_v15 = vand.u32 %v5893_v10, %v8435_v63  ;;  %2493 = vmatpush.bf16.msra.mxu3 %v7300_v4  ;;  %v7297_v49 = vld [vmem:[%s9617_s5 + $0x18] sm:$0xff]  ;;  %v7314_v53 = vld [vmem:[%s9617_s5 + $0xa0] sm:$0xff]  ;;  %v7296_v37 = vld [vmem:[%s9617_s5 + $0x10] sm:$0xff] }
 0x6c5   : > { %v8740_v11 = vand.u32 %v6032_v41, %v8435_v63  ;;  %v7305_v56 = vld [vmem:[%s9617_s5 + $0x58] sm:$0xff]  ;;  %v7304_v38 = vld [vmem:[%s9617_s5 + $0x50] sm:$0xff]  ;;  %v7303_v43 = vld [vmem:[%s9617_s5 + $0x48] sm:$0xff] }
 0x6c6   : > { %2326 = vmatpush.bf16.msra.mxu2 %v2317_v15  ;;  %2359 = vmatpush.bf16.msra.mxu1 %v2317_v15  ;;  %v7313_v54 = vld [vmem:[%s9617_s5 + $0x98] sm:$0xff]  ;;  %v7312_v59 = vld [vmem:[%s9617_s5 + $0x90] sm:$0xff]  ;;  %v7311_v60 = vld [vmem:[%s9617_s5 + $0x88] sm:$0xff] }
 0x6c7   : > { %2515 = vmatpush.bf16.msra.mxu0 %v2317_v15  ;;  %v7302_v44 = vld [vmem:[%s9617_s5 + $0x40] sm:$0xff]  ;;  %v7327_v62 = vld [vmem:[%s9617_s5 + $0xf8] sm:$0xff]  ;;  %v7326_v2 = vld [vmem:[%s9617_s5 + $0xf0] sm:$0xff] }
 0x6c8   : > { %2494 = vmatpush.bf16.msra.mxu3 %v7299_v13  ;;  %v7325_v14 = vld [vmem:[%s9617_s5 + $0xe8] sm:$0xff]  ;;  %v7310_v8 = vld [vmem:[%s9617_s5 + $0x80] sm:$0xff]  ;;  %v7323_v22 = vld [vmem:[%s9617_s5 + $0xd8] sm:$0xff] }
 0x6c9   : > { %5894 = vmatmul.msk.bf16.vlgmr.msra.gmra.mxu2 %vm1381_vm4, %v8372_v27  ;;  %5895 = vmatmul.msk.bf16.vlgmr.msra.gmra.mxu1 %vm1381_vm4, %v8377_v28  ;;  %v7324_v19 = vld [vmem:[%s9617_s5 + $0xe0] sm:$0xff]  ;;  %v7295_v20 = vld [vmem:[%s9617_s5 + $0x8] sm:$0xff]  ;;  %v7322_v5 = vld [vmem:[%s9617_s5 + $0xd0] sm:$0xff] }
 0x6ca   : > { %2431 = vmatpush.bf16.msrb.mxu2 %v7309_v58  ;;  %2587 = vmatpush.bf16.msrb.mxu1 %v7317_v16  ;;  %v7294_v1 = vld [vmem:[%s9617_s5] sm:$0xff]  ;;  %v7321_v24 = vld [vmem:[%s9617_s5 + $0xc8] sm:$0xff]  ;;  %v7343_v30 = vld [vmem:[%s9617_s5 + $0x178] sm:$0xff] }
 0x6cb   : > { %2622 = vmatpush.bf16.msrb.mxu0 %v8740_v11  ;;  %v7320_v51 = vld [vmem:[%s9617_s5 + $0xc0] sm:$0xff]  ;;  %v7342_v52 = vld [vmem:[%s9617_s5 + $0x170] sm:$0xff]  ;;  %v7341_v4 = vld [vmem:[%s9617_s5 + $0x168] sm:$0xff] }
 0x6cc   : > { %5976 = vmatmul.msk.bf16.vlgmr.msra.gmra.mxu0 %vm1381_vm4, %v8382_v32  ;;  %2495 = vmatpush.bf16.msra.mxu3 %v7298_v36  ;;  %v6186_v7 = vld [vmem:[%s8726_s20 + $0x60] sm:$0xf]  ;;  %v7345_v25 = vld [vmem:[%s8726_s20 + $0x60] sm:$0x30]  ;;  %v7335_v10 = vld [vmem:[%s9617_s5 + $0x138] sm:$0xff]  ;;  %s6335_s20 = sshll.u32 %s7821_s16, 2 }
 0x6cd   : > { %v6187_v26 = vor.u32 %v7345_v25, %v6186_v7  ;;  %v7340_v40 = vld [vmem:[%s9617_s5 + $0x160] sm:$0xff]  ;;  %v7334_v41 = vld [vmem:[%s9617_s5 + $0x130] sm:$0xff]  ;;  %v7339_v58 = vld [vmem:[%s9617_s5 + $0x158] sm:$0xff]  ;;  %s5227_s1 = scalar_lea.vmem [#allocation3], %s6335_s20  ;;  %s2293_s16 = sadd.s32 1, %s7821_s16  }
 0x6ce   : > { %2432 = vmatpush.bf16.msrb.mxu2 %v7308_v42  ;;  %2588 = vmatpush.bf16.msrb.mxu1 %v7316_v46  ;;  %v7353_v15 = vld [vmem:[%s9617_s5 + $0x1b8] sm:$0xff]  ;;  %v7333_v16 = vld [vmem:[%s9617_s5 + $0x128] sm:$0xff]  ;;  %v7352_v13 = vld [vmem:[%s9617_s5 + $0x1b0] sm:$0xff]  ;;  %p2290_p3 = scmp.ge.s32.totalorder %s2293_s16, 4  }
 0x6cf   : > { %v8840_v48 = vand.u32 %v6187_v26, %v8435_v63  ;;  %2787 = vmatpush.bf16.msra.mxu0 %v7335_v10  ;;  %v7332_v42 = vld [vmem:[%s9617_s5 + $0x120] sm:$0xff]  ;;  %v7337_v46 = vld [vmem:[%s9617_s5 + $0x148] sm:$0xff]  ;;  %v7369_v26 = vld [vmem:[%s9617_s5 + $0x238] sm:$0xff] }
 0x6d0   : > { %2496 = vmatpush.bf16.msra.mxu3 %v7297_v49  ;;  %v7351_v36 = vld [vmem:[%s9617_s5 + $0x1a8] sm:$0xff]  ;;  %v7350_v49 = vld [vmem:[%s9617_s5 + $0x1a0] sm:$0xff] }
 0x6d1   : > { %v7362_v10 = vld [vmem:[%s9617_s5 + $0x200] sm:$0xff] }
 0x6d2   : > { %2433 = vmatpush.bf16.msrb.mxu2 %v7307_v55  ;;  %2589 = vmatpush.bf16.msrb.mxu1 %v7315_v47  ;;  %v7331_v55 = vld [vmem:[%s9617_s5 + $0x118] sm:$0xff]  ;;  %v7336_v47 = vld [vmem:[%s9617_s5 + $0x140] sm:$0xff] }
 0x6d3   : > { %2788 = vmatpush.bf16.msra.mxu0 %v7334_v41  ;;  %v7354_v41 = vld [vmem:[%s9617_s5 + $0x1c0] sm:$0xff] }
 0x6d4   : > { %2497 = vmatpush.bf16.msra.mxu3 %v7296_v37  ;;  %v7329_v37 = vld [vmem:[%s9617_s5 + $0x108] sm:$0xff]  ;;  %v9002_v45 = vld [vmem:[%s9621_s9 + $0x2] sm:$0x1] (%p2290_p3) }
 0x6d6   : > { %2434 = vmatpush.bf16.msrb.mxu2 %v7306_v50  ;;  %2590 = vmatpush.bf16.msrb.mxu1 %v7314_v53  ;;  %v7330_v50 = vld [vmem:[%s9617_s5 + $0x110] sm:$0xff]  ;;  %v7349_v53 = vld [vmem:[%s9617_s5 + $0x198] sm:$0xff] }
 0x6d7   : > { %2789 = vmatpush.bf16.msra.mxu0 %v7333_v16 }
 0x6d8   : > { %2498 = vmatpush.bf16.msra.mxu3 %v7295_v20 }
 0x6da   : > { %2435 = vmatpush.bf16.msrb.mxu2 %v7305_v56  ;;  %2591 = vmatpush.bf16.msrb.mxu1 %v7313_v54  ;;  %v7348_v56 = vld [vmem:[%s9617_s5 + $0x190] sm:$0xff]  ;;  %v7328_v54 = vld [vmem:[%s9617_s5 + $0x100] sm:$0xff] }
 0x6db   : > { %2790 = vmatpush.bf16.msra.mxu0 %v7332_v42 }
 0x6dc   : > { %6033 = vmatmul.msk.bf16.vlgmr.msrb.gmra.mxu0 %vm1381_vm4, %v8372_v27  ;;  %2499 = vmatpush.bf16.msra.mxu3 %v7294_v1 }
 0x6de   : > { %2436 = vmatpush.bf16.msrb.mxu2 %v7304_v38  ;;  %2592 = vmatpush.bf16.msrb.mxu1 %v7312_v59  ;;  %v7347_v38 = vld [vmem:[%s9617_s5 + $0x188] sm:$0xff]  ;;  %v7346_v59 = vld [vmem:[%s9617_s5 + $0x180] sm:$0xff] }
 0x6df   : > { %2791 = vmatpush.bf16.msra.mxu0 %v7331_v55 }
 0x6e0   : > { %2715 = vmatpush.bf16.msrb.mxu3 %v8740_v11 }
 0x6e2   : > { %2437 = vmatpush.bf16.msrb.mxu2 %v7303_v43  ;;  %2593 = vmatpush.bf16.msrb.mxu1 %v7311_v60 }
 0x6e3   : > { %2792 = vmatpush.bf16.msra.mxu0 %v7330_v50 }
 0x6e6   : > { %2438 = vmatpush.bf16.msrb.mxu2 %v7302_v44  ;;  %2594 = vmatpush.bf16.msrb.mxu1 %v7310_v8 }
 0x6e7   : > { %2793 = vmatpush.bf16.msra.mxu0 %v7329_v37 }
 0x6ea   : > { %2694 = vmatpush.bf16.msra.mxu2 %v7327_v62  ;;  %2808 = vmatpush.bf16.msra.mxu1 %v8740_v11  ;;  %v7338_v11 = vld [vmem:[%s9617_s5 + $0x150] sm:$0xff] }
 0x6eb   : > { %2794 = vmatpush.bf16.msra.mxu0 %v7328_v54 }
 0x6ee   : > { %2695 = vmatpush.bf16.msra.mxu2 %v7326_v2 }
 0x6ef   : > { %3008 = vmatpush.bf16.msrb.mxu0 %v8840_v48 }
 0x6f2   : > { %2696 = vmatpush.bf16.msra.mxu2 %v7325_v14 }
 0x6f6   : > { %2697 = vmatpush.bf16.msra.mxu2 %v7324_v19  ;;  %v7361_v19 = vld [vmem:[%s9617_s5 + $0x1f8] sm:$0xff] }
 0x6fa   : > { %2698 = vmatpush.bf16.msra.mxu2 %v7323_v22  ;;  %v7360_v22 = vld [vmem:[%s9617_s5 + $0x1f0] sm:$0xff] }
 0x6fe   : > { %2699 = vmatpush.bf16.msra.mxu2 %v7322_v5 }
 0x702   : > { %2700 = vmatpush.bf16.msra.mxu2 %v7321_v24 }
 0x706   : > { %2701 = vmatpush.bf16.msra.mxu2 %v7320_v51 }
 0x746   : > { %v2361_v3 = vpop.f32.mrf.mxu1 }
 0x747   : > { %v2365_v6 = vpack.c.bf16 %v2361_v3, %v2361_v3 }
 0x749   : > { %v2517_v21 = vpop.f32.mrf.mxu0  ;;  %2439 = vmatmul.bf16.vlgmr.msrb.gmra.mxu2 %v2365_v6 }
 0x74a   : > { %v2521_v12 = vpack.c.bf16 %v2517_v21, %v2517_v21  ;;  %2987 = vmatpush.bf16.msrb.mxu2 %v7353_v15 }
 0x74c   : > { %2595 = vmatmul.bf16.vlgmr.msrb.gmra.mxu1 %v2521_v12  ;;  %v2328_v29 = vpop.f32.mrf.mxu2 }
 0x74d   : > { %2915 = vmatpush.bf16.msrb.mxu1 %v8840_v48  ;;  %v2332_v31 = vpack.c.bf16 %v2328_v29, %v2328_v29 }
 0x74e   : > { %v2363_v33 = vpop.f32.mrf.mxu1  ;;  %2988 = vmatpush.bf16.msrb.mxu2 %v7352_v13 }
 0x74f   : > { %2500 = vmatmul.bf16.vlgmr.msra.gmra.mxu3 %v2332_v31  ;;  %v7366_v33 = vld [vmem:[%s9617_s5 + $0x220] sm:$0xff] }
 0x750   : > { %2880 = vmatpush.bf16.msra.mxu3 %v7343_v30  ;;  %v7367_v30 = vld [vmem:[%s9617_s5 + $0x228] sm:$0xff] }
 0x751   : > { %v2519_v34 = vpop.f32.mrf.mxu0 }
 0x752   : > { %2989 = vmatpush.bf16.msrb.mxu2 %v7351_v36  ;;  %v7359_v34 = vld [vmem:[%s9617_s5 + $0x1e8] sm:$0xff] }
 0x754   : > { %v2330_v23 = vpop.f32.mrf.mxu2  ;;  %2881 = vmatpush.bf16.msra.mxu3 %v7342_v52  ;;  %v7365_v52 = vld [vmem:[%s9617_s5 + $0x218] sm:$0xff] }
 0x755   : > { %v7358_v23 = vld [vmem:[%s9617_s5 + $0x1e0] sm:$0xff] }
 0x756   : > { %2990 = vmatpush.bf16.msrb.mxu2 %v7350_v49 }
 0x758   : > { %2882 = vmatpush.bf16.msra.mxu3 %v7341_v4  ;;  %v7364_v4 = vld [vmem:[%s9617_s5 + $0x210] sm:$0xff] }
 0x759   : > { %v2624_v39 = vpop.f32.mrf.mxu0 }
 0x75a   : > { %v2628_v0 = vpack.c.bf16 %v2624_v39, %v2624_v39  ;;  %2991 = vmatpush.bf16.msrb.mxu2 %v7349_v53  ;;  %v7357_v39 = vld [vmem:[%s9617_s5 + $0x1d8] sm:$0xff] }
 0x75c   : > { %2702 = vmatmul.bf16.vlgmr.msra.gmra.mxu2 %v2628_v0  ;;  %6131 = vmatmul.msk.bf16.vlgmr.msra.gmra.mxu1 %vm1381_vm4, %v8382_v32  ;;  %v7363_v0 = vld [vmem:[%s9617_s5 + $0x208] sm:$0xff] }
 0x75d   : > { %2883 = vmatpush.bf16.msra.mxu3 %v7340_v40  ;;  %3080 = vmatpush.bf16.msra.mxu1 %v7361_v19  ;;  %v7355_v40 = vld [vmem:[%s9617_s5 + $0x1c8] sm:$0xff] }
 0x75e   : > { %2992 = vmatpush.bf16.msrb.mxu2 %v7348_v56 }
 0x75f   : > { %6082 = vmatmul.msk.bf16.vlgmr.msrb.gmra.mxu3 %vm1381_vm4, %v8377_v28 }
 0x761   : > { %v2626_v57 = vpop.f32.mrf.mxu0  ;;  %2884 = vmatpush.bf16.msra.mxu3 %v7339_v58  ;;  %3081 = vmatpush.bf16.msra.mxu1 %v7360_v22 }
 0x762   : > { %2993 = vmatpush.bf16.msrb.mxu2 %v7347_v38  ;;  %v7356_v57 = vld [vmem:[%s9617_s5 + $0x1d0] sm:$0xff] }
 0x765   : > { %2885 = vmatpush.bf16.msra.mxu3 %v7338_v11  ;;  %3082 = vmatpush.bf16.msra.mxu1 %v7359_v34 }
 0x766   : > { %2994 = vmatpush.bf16.msrb.mxu2 %v7346_v59 }
 0x769   : > { %2886 = vmatpush.bf16.msra.mxu3 %v7337_v46  ;;  %3083 = vmatpush.bf16.msra.mxu1 %v7358_v23 }
 0x76c   : > { %6188 = vmatmul.msk.bf16.vlgmr.msrb.gmra.mxu1 %vm1381_vm4, %v8372_v27  ;;  %v9004_v27 = vld [vmem:[#allocation4] sm:$0x1] (%p2290_p3) }
 0x76d   : > { %2887 = vmatpush.bf16.msra.mxu3 %v7336_v47  ;;  %3084 = vmatpush.bf16.msra.mxu1 %v7357_v39  ;;  %v8992_v39 = vld [vmem:[%s9621_s9] sm:$0x1] (%p2290_p3) }
 0x771   : > { %3101 = vmatpush.bf16.msrb.mxu3 %v8840_v48  ;;  %v7368_v48 = vld [vmem:[%s9617_s5 + $0x230] sm:$0xff]  ;;  %3085 = vmatpush.bf16.msra.mxu1 %v7356_v57 }
 0x775   : > { %3086 = vmatpush.bf16.msra.mxu1 %v7355_v40 }
 0x779   : > { %3087 = vmatpush.bf16.msra.mxu1 %v7354_v41 }
 0x7c9   : > { %v2596_v43 = vpop.f32.mrf.mxu1 }
 0x7cc   : > { %v2440_v60 = vpop.f32.mrf.mxu2 }
 0x7d1   : > { %v2598_v44 = vpop.f32.mrf.mxu1 }
 0x7d2   : > { %v2501_v62 = vpop.f32.mrf.mxu3 }
 0x7d3   : > { %v2502_v2 = vadd.f32 %v2501_v62, %v2440_v60 }
 0x7d4   : > { %v2442_v14 = vpop.f32.mrf.mxu2 }
 0x7d5   : > { %v2600_v8 = vadd.f32 %v2596_v43, %v2502_v2 }
 0x7d9   : > { %v2810_v20 = vpop.f32.mrf.mxu1 }
 0x7da   : > { %v2814_v1 = vpack.c.bf16 %v2810_v20, %v2810_v20  ;;  %v2503_v5 = vpop.f32.mrf.mxu3 }
 0x7dc   : > { %2888 = vmatmul.bf16.vlgmr.msra.gmra.mxu3 %v2814_v1 }
 0x7df   : > { %v2703_v24 = vpop.f32.mrf.mxu2 }
 0x7e0   : > { %v2707_v51 = vadd.f32 %v2703_v24, %v2600_v8 }
 0x7e1   : > { %v2812_v7 = vpop.f32.mrf.mxu1 }
 0x7e2   : > { %v2717_v25 = vpop.f32.mrf.mxu3 }
 0x7e3   : > { %v2721_v3 = vpack.c.bf16 %v2717_v25, %v2717_v25 }
 0x7e5   : > { %2795 = vmatmul.bf16.vlgmr.msra.gmra.mxu0 %v2721_v3 }
 0x7e6   : > { %3173 = vmatpush.bf16.msra.mxu0 %v7369_v26 }
 0x7e7   : > { %v2705_v6 = vpop.f32.mrf.mxu2 }
 0x7e9   : > { %v2917_v21 = vpop.f32.mrf.mxu1 }
 0x7ea   : > { %v2921_v12 = vpack.c.bf16 %v2917_v21, %v2917_v21  ;;  %v2719_v29 = vpop.f32.mrf.mxu3  ;;  %3174 = vmatpush.bf16.msra.mxu0 %v7368_v48 }
 0x7ec   : > { %2995 = vmatmul.bf16.vlgmr.msrb.gmra.mxu2 %v2921_v12  ;;  %6286 = vmatmul.msk.bf16.vlgmr.msrb.gmra.mxu3 %vm1381_vm4, %v8382_v32  ;;  %v9008_v32 = vld [vmem:[#allocation4 + $0x2] sm:$0x1] (%p2290_p3) }
 0x7ee   : > { %3175 = vmatpush.bf16.msra.mxu0 %v7367_v30 }
 0x7f1   : > { %v2919_v31 = vpop.f32.mrf.mxu1 }
 0x7f2   : > { %3176 = vmatpush.bf16.msra.mxu0 %v7366_v33 }
 0x7f5   : > { %6237 = vmatmul.msk.bf16.vlgmr.msrb.gmra.mxu0 %vm1381_vm4, %v8377_v28  ;;  %v9006_v28 = vld [vmem:[#allocation4 + $0x1] sm:$0x1] (%p2290_p3) }
 0x7f6   : > { %3177 = vmatpush.bf16.msra.mxu0 %v7365_v52 }
 0x7fa   : > { %3178 = vmatpush.bf16.msra.mxu0 %v7364_v4 }
 0x7fe   : > { %3179 = vmatpush.bf16.msra.mxu0 %v7363_v0  ;;  %v8997_v0 = vld [vmem:[%s9621_s9 + $0x1] sm:$0x1] (%p2290_p3)  ;;  %s9016_s9 = smov (%p2290_p3), 0  }
 0x802   : > { %3180 = vmatpush.bf16.msra.mxu0 %v7362_v10 }
 0x85f   : > { %v2889_v58 = vpop.f32.mrf.mxu3 }
 0x862   : > { %v2796_v15 = vpop.f32.mrf.mxu0 }
 0x863   : > { %v2800_v16 = vadd.f32 %v2796_v15, %v2707_v51 }
 0x865   : > { %v2893_v13 = vadd.f32 %v2889_v58, %v2800_v16 }
 0x867   : > { %v2891_v11 = vpop.f32.mrf.mxu3 }
 0x86a   : > { %v2798_v42 = vpop.f32.mrf.mxu0 }
 0x86f   : > { %v2996_v46 = vpop.f32.mrf.mxu2  ;;  %v3103_v36 = vpop.f32.mrf.mxu3 }
 0x870   : > { %v3000_v55 = vadd.f32 %v2996_v46, %v2893_v13  ;;  %v3107_v47 = vpack.c.bf16 %v3103_v36, %v3103_v36 }
 0x872   : > { %3181 = vmatmul.bf16.vlgmr.msra.gmra.mxu0 %v3107_v47  ;;  %v3010_v49 = vpop.f32.mrf.mxu0 }
 0x873   : > { %v3014_v50 = vpack.c.bf16 %v3010_v49, %v3010_v49 }
 0x875   : > { %3088 = vmatmul.bf16.vlgmr.msra.gmra.mxu1 %v3014_v50 }
 0x877   : > { %v3105_v53 = vpop.f32.mrf.mxu3  ;;  %v2998_v37 = vpop.f32.mrf.mxu2 }
 0x87a   : > { %v3012_v56 = vpop.f32.mrf.mxu0 }
 0x8ef   : > { %v3182_v54 = vpop.f32.mrf.mxu0 }
 0x8f2   : > { %v3089_v38 = vpop.f32.mrf.mxu1 }
 0x8f3   : > { %v3093_v59 = vadd.f32 %v3089_v38, %v3000_v55 }
 0x8f5   : > { %v3186_v43 = vadd.f32 %v3182_v54, %v3093_v59 }
 0x8f7   : > { %v3184_v60 = vpop.f32.mrf.mxu0  ;;  %v3188_v44 = vadd.f32 %v3186_v43, %v2260_v17 }
 0x8f9   : > { %v3190_v62 = vsel %vm135_vm3, %v3188_v44, 0.0  ;;  %v3198_v2 = vmul.f32 %v3188_v44, %v3188_v44  ;;  %v3207_v14 = vpack.c.bf16 %v3188_v44, %v3188_v44 }
 0x8fa   : > { %v3191_v8 = vrot.slane %v3190_v62, 4  ;;  %v3091_v19 = vpop.f32.mrf.mxu1 }
 0x8fb   : > { %v3199_v20 = vsel %vm135_vm3, %v3198_v2, 0.0  ;;  %v3210_v22 = vrot.slane %v3207_v14, 7 }
 0x8fc   : > { %v3192_v1 = vadd.f32 %v3191_v8, %v3190_v62  ;;  %v3200_v5 = vrot.slane %v3199_v20, 4 }
 0x8fd   : > { %6336 = vst [vmem:[%s5227_s1 + $0x1c] sm:$0x6] %v3210_v22 }
 0x8fe   : > { %v3193_v24 = vrot.slane %v3192_v1, 2  ;;  %v3201_v51 = vadd.f32 %v3200_v5, %v3199_v20 }
 0x900   : > { %v3194_v7 = vadd.f32 %v3193_v24, %v3192_v1  ;;  %v3202_v25 = vrot.slane %v3201_v51, 2 }
 0x902   : > { %v3195_v26 = vrot.slane %v3194_v7, 1  ;;  %v3203_v3 = vadd.f32 %v3202_v25, %v3201_v51 }
 0x904   : > { %v3196_v6 = vadd.f32 %v3195_v26, %v3194_v7  ;;  %v3204_v21 = vrot.slane %v3203_v3, 1  ;;  %v3236_v40 = vld [vmem:[#allocation3 + $0x8] sm:$0x6] (%p2290_p3)  ;;  %v3237_v41 = vld [vmem:[#allocation3 + $0xc] sm:$0x6] (%p2290_p3) }
 0x905   :  { %v3238_v58 = vld [vmem:[#allocation3 + $0x10] sm:$0x6] (%p2290_p3)  ;;  %v3274_v15 = vld [vmem:[#allocation3 + $0x1c] sm:$0x6] (%p2290_p3)  ;;  %v3275_v16 = vld [vmem:[#allocation3 + $0x20] sm:$0x6] (%p2290_p3)  ;;  %v3240_v55 = vunpack.c.l.bf16 (%p2290_p3), %v3236_v40  ;;  %v3241_v47 = vunpack.c.l.bf16 (%p2290_p3), %v3237_v41 }
 0x906   : > { %v3197_v48 = vadd.f32 %v7817_v35, %v3196_v6   ;;  %v3205_v12 = vadd.f32 %v3204_v21, %v3203_v3  ;;  %2292 = sbr.rel (!%p2290_p3) target bundleno = 1727 (0x6bf), region = 221  ;;  %v3276_v11 = vld [vmem:[#allocation3 + $0x24] sm:$0x6] (%p2290_p3)  ;;  %v3277_v42 = vld [vmem:[#allocation3 + $0x28] sm:$0x6] (%p2290_p3)  ;;  %v3242_v49 = vunpack.c.l.bf16 (%p2290_p3), %v3238_v58  ;;  %v3278_v50 = vunpack.c.l.bf16 (%p2290_p3), %v3274_v15 }
 0x907   :  { %v3279_v53 = vunpack.c.l.bf16 (%p2290_p3), %v3275_v16  ;;  %v3280_v37 = vunpack.c.l.bf16 (%p2290_p3), %v3276_v11  ;;  %v3281_v38 = vunpack.c.l.bf16 (%p2290_p3), %v3277_v42  ;;  %v9012_v15 = vmov (%p2290_p3), 0.0  }
 0x908   : > { %v3206_v29 = vadd.f32 %v7813_v9, %v3205_v12   ;;  %v9636_v35 = vmov %v3197_v48  ;;  %v3215_v30 = vmul.f32 (%p2290_p3), 0.03125, %v3197_v48  ;;  %v9014_v16 = vmov (%p2290_p3), 0.0  }
 0x90a   : > { %v9635_v9 = vmov %v3206_v29  ;;  %v3216_v31 = vmul.f32 (%p2290_p3), 0.03125, %v3206_v29  ;;  %v3217_v33 = vmul.f32 (%p2290_p3), %v3215_v30, %v3215_v30 }
 0x90b   :  { %v3235_v9 = vld [vmem:[#allocation3 + $0x4] sm:$0x6] }
 0x90c   :  { %v3218_v34 = vsub.f32 %v3216_v31, %v3217_v33  ;;  %v3239_v36 = vunpack.c.l.bf16 %v3235_v9 }
 0x90e   :  { %v3219_v52 = vmax.f32 %v3218_v34, 0.0 }
 0x910   :  { %v3220_v23 = vadd.f32 1e-05, %v3219_v52 }
 0x912   :  { %7673 = vrsqrt.f32 %v3220_v23  ;;  %vm3227_vm5 = vweird.f32 %v3220_v23 }
 0x918   :  { %v7674_v35 = vpop.eup %7673 }
 0x919   :  { %v3222_v4 = vmul.f32 %v7674_v35, %v3220_v23  ;;  %vm3228_vm6 = vweird.f32 %v7674_v35 }
 0x91a   :  { %vm3229_vm7 = vmor %vm3227_vm5, %vm3228_vm6 }
 0x91b   :  { %v3223_v57 = vmul.f32 %v7674_v35, %v3222_v4 }
 0x91d   :  { %v3224_v63 = vmul.f32 0.5, %v3223_v57 }
 0x91f   :  { %v3225_v17 = vsub.f32 1.5, %v3224_v63 }
 0x921   :  { %v3226_v10 = vmul.f32 %v7674_v35, %v3225_v17 }
 0x923   :  { %v3230_v13 = vsel %vm3229_vm7, %v7674_v35, %v3226_v10 }
 0x924   :  { %v3231_v46 = vmul.f32 %v3230_v13, %v8358_v61 }
 0x926   :  { %v3232_v56 = vmul.f32 %v3231_v46, %v3215_v30  ;;  %v3243_v54 = vperm.slane %v3231_v46, 0 }
 0x928   :  { %v3233_v59 = vsub.f32 %v8366_v18, %v3232_v56  ;;  %v3244_v43 = vmul.f32 %v3243_v54, %v3239_v36  ;;  %v3245_v60 = vmul.f32 %v3243_v54, %v3240_v55  ;;  %v3246_v44 = vmul.f32 %v3243_v54, %v3241_v47 }
 0x929   :  { %v3247_v62 = vmul.f32 %v3243_v54, %v3242_v49  ;;  %v3282_v2 = vmul.f32 %v3278_v50, %v3243_v54  ;;  %v3283_v14 = vmul.f32 %v3279_v53, %v3243_v54  ;;  %v3284_v8 = vmul.f32 %v3280_v37, %v3243_v54 }
 0x92a   :  { %v3248_v61 = vperm.slane %v3233_v59, 0  ;;  %v3285_v19 = vmul.f32 %v3281_v38, %v3243_v54 }
 0x92c   :  { %v3249_v20 = vadd.f32 %v3248_v61, %v3244_v43  ;;  %v3250_v22 = vadd.f32 %v3248_v61, %v3245_v60  ;;  %v3251_v1 = vadd.f32 %v3248_v61, %v3246_v44  ;;  %v3252_v5 = vadd.f32 %v3248_v61, %v3247_v62 }
 0x92d   :  { %v3286_v24 = vadd.f32 %v3282_v2, %v3248_v61  ;;  %v3287_v51 = vadd.f32 %v3283_v14, %v3248_v61  ;;  %v3288_v7 = vadd.f32 %v3284_v8, %v3248_v61  ;;  %v3289_v25 = vadd.f32 %v3285_v19, %v3248_v61 }
 0x92e   :  { %vm3253_vm8 = vcmp.gt.f32.partialorder %v3249_v20, 0.0  ;;  %v3257_v26 = vmul.f32 0.01, %v3249_v20  ;;  %vm3254_vm9 = vcmp.gt.f32.partialorder %v3250_v22, 0.0  ;;  %v3258_v18 = vmul.f32 0.01, %v3250_v22 }
 0x92f   :  { %vm3255_vm10 = vcmp.gt.f32.partialorder %v3251_v1, 0.0  ;;  %v3259_v3 = vmul.f32 0.01, %v3251_v1  ;;  %vm3256_vm11 = vcmp.gt.f32.partialorder %v3252_v5, 0.0  ;;  %v3260_v6 = vmul.f32 0.01, %v3252_v5 }
 0x930   :  { %v3261_v21 = vsel %vm3253_vm8, %v3249_v20, %v3257_v26  ;;  %v3262_v48 = vsel %vm3254_vm9, %v3250_v22, %v3258_v18  ;;  %vm3290_vm12 = vcmp.gt.f32.partialorder %v3286_v24, 0.0  ;;  %v3294_v12 = vmul.f32 0.01, %v3286_v24 }
 0x931   :  { %v3265_v29 = vpack.c.bf16 %v3261_v21, %v3261_v21  ;;  %v3266_v30 = vpack.c.bf16 %v3262_v48, %v3262_v48  ;;  %v3263_v31 = vsel %vm3255_vm10, %v3251_v1, %v3259_v3  ;;  %v3264_v33 = vsel %vm3256_vm11, %v3252_v5, %v3260_v6 }
 0x932   :  { %v3267_v34 = vpack.c.bf16 %v3263_v31, %v3263_v31  ;;  %v3268_v52 = vpack.c.bf16 %v3264_v33, %v3264_v33  ;;  %v3298_v23 = vsel %vm3290_vm12, %v3286_v24, %v3294_v12  ;;  %vm3291_vm13 = vcmp.gt.f32.partialorder %v3287_v51, 0.0 }
 0x933   :  { %3269 = vst [vmem:[#allocation3 + $0x4] sm:$0x6] %v3265_v29  ;;  %v3302_v35 = vpack.c.bf16 %v3298_v23, %v3298_v23  ;;  %v3295_v4 = vmul.f32 0.01, %v3287_v51  ;;  %vm3292_vm14 = vcmp.gt.f32.partialorder %v3288_v7, 0.0  ;;  %vm3293_vm15 = vcmp.gt.f32.partialorder %v3289_v25, 0.0 }
 0x934   :  { %3270 = vst [vmem:[#allocation3 + $0x8] sm:$0x6] %v3266_v30  ;;  %v3296_v57 = vmul.f32 0.01, %v3288_v7  ;;  %v3297_v63 = vmul.f32 0.01, %v3289_v25 }
 0x935   :  { %3271 = vst [vmem:[#allocation3 + $0xc] sm:$0x6] %v3267_v34  ;;  %v3299_v17 = vsel %vm3291_vm13, %v3287_v51, %v3295_v4 }
 0x936   :  { %3272 = vst [vmem:[#allocation3 + $0x10] sm:$0x6] %v3268_v52  ;;  %v3303_v9 = vpack.c.bf16 %v3299_v17, %v3299_v17  ;;  %v3300_v10 = vsel %vm3292_vm14, %v3288_v7, %v3296_v57  ;;  %v3301_v40 = vsel %vm3293_vm15, %v3289_v25, %v3297_v63 }
 0x937   :  { %3306 = vst [vmem:[#allocation3 + $0x1c] sm:$0x6] %v3302_v35  ;;  %v3304_v41 = vpack.c.bf16 %v3300_v10, %v3300_v10  ;;  %v3305_v58 = vpack.c.bf16 %v3301_v40, %v3301_v40 }
 0x938   :  { %3307 = vst [vmem:[#allocation3 + $0x20] sm:$0x6] %v3303_v9 }
 0x939   :  { %3308 = vst [vmem:[#allocation3 + $0x24] sm:$0x6] %v3304_v41 }
 0x93a   :  { %3309 = vst [vmem:[#allocation3 + $0x28] sm:$0x6] %v3305_v58 }
 0x93b LB: > { %vm3334_vm1 = vcmask 1042432   ;;  %v7853_v11 = vmov 65535   ;;  %s7370_s14 = sshll.u32 %s7833_s9, 3  ;;  %v7378_v46 = vld [vmem:[%s9620_s8 + $0x38] sm:$0xff]  ;;  %vm3330_vm2 = vcmask 56320   ;;  %v7377_v37 = vld [vmem:[%s9620_s8 + $0x30] sm:$0xff]  ;;  %s7833_s9 = sphi %s9016_s9, %s3323_s9   ;;  %v7829_v16 = vphi %v9014_v16, %v9638_v16   ;;  %v7825_v15 = vphi %v9012_v15, %v9637_v15  }
 0x93c   : > { %v3336_v13 = vsel %vm3334_vm1, 4294967295, %v7853_v11  ;;  %s9034_s4 = scalar_lea.vmem [#allocation3], %s7370_s14  ;;  %v7386_v47 = vld [vmem:[%s9620_s8 + $0x78] sm:$0xff]  ;;  %3514 = vmatpush.bf16.msra.mxu3 %v7378_v46  ;;  %v7385_v56 = vld [vmem:[%s9620_s8 + $0x70] sm:$0xff]  ;;  %v7376_v38 = vld [vmem:[%s9620_s8 + $0x28] sm:$0xff]  ;;  %s6337_s21 = sshll.u32 %s7833_s9, 1 }
 0x93d   : > { %v9029_v42 = vsel %vm135_vm3, %v3336_v13, 0  ;;  %v7394_v53 = vld [vmem:[%s9620_s8 + $0xb8] sm:$0xff]  ;;  %v7393_v54 = vld [vmem:[%s9620_s8 + $0xb0] sm:$0xff]  ;;  %v7384_v59 = vld [vmem:[%s9620_s8 + $0x68] sm:$0xff]  ;;  %s4215_s23 = scalar_lea.vmem %s9622_s10, %s6337_s21  ;;  %s3323_s9 = sadd.s32 1, %s7833_s9  }
 0x93e   : > { %v7392_v43 = vld [vmem:[%s9620_s8 + $0xa8] sm:$0xff]  ;;  %v7375_v60 = vld [vmem:[%s9620_s8 + $0x20] sm:$0xff]  ;;  %v7374_v2 = vld [vmem:[%s9620_s8 + $0x18] sm:$0xff]  ;;  %p3320_p4 = scmp.ge.s32.totalorder %s3323_s9, 2  }
 0x93f   : > { %v7383_v44 = vld [vmem:[%s9620_s8 + $0x60] sm:$0xff]  ;;  %v7382_v14 = vld [vmem:[%s9620_s8 + $0x58] sm:$0xff]  ;;  %v7373_v61 = vld [vmem:[%s9620_s8 + $0x10] sm:$0xff]  ;;  %s9305_s24 = smov (%p3320_p4), 0  }
 0x940   : > { %3515 = vmatpush.bf16.msra.mxu3 %v7377_v37  ;;  %v7391_v62 = vld [vmem:[%s9620_s8 + $0xa0] sm:$0xff]  ;;  %v7390_v8 = vld [vmem:[%s9620_s8 + $0x98] sm:$0xff]  ;;  %v7381_v19 = vld [vmem:[%s9620_s8 + $0x50] sm:$0xff] }
 0x941   : > { %v3329_v36 = vld [vmem:[%s9034_s4] sm:$0xf]  ;;  %v6472_v55 = vld [vmem:[%s9034_s4 + $0x4] sm:$0xf]  ;;  %v7389_v20 = vld [vmem:[%s9620_s8 + $0x90] sm:$0xff] }
 0x942   : > { %v3339_v49 = vand.u32 %v9029_v42, %v3329_v36  ;;  %v9043_v50 = vand.u32 %v6472_v55, %v9029_v42  ;;  %v7380_v22 = vld [vmem:[%s9620_s8 + $0x48] sm:$0xff]  ;;  %v7379_v5 = vld [vmem:[%s9620_s8 + $0x40] sm:$0xff]  ;;  %v7403_v24 = vld [vmem:[%s9620_s8 + $0xf8] sm:$0xff] }
 0x943   : > { %v7388_v1 = vld [vmem:[%s9620_s8 + $0x88] sm:$0xff]  ;;  %v7402_v51 = vld [vmem:[%s9620_s8 + $0xf0] sm:$0xff]  ;;  %v7387_v25 = vld [vmem:[%s9620_s8 + $0x80] sm:$0xff] }
 0x944   : > { %3348 = vmatpush.bf16.msra.mxu2 %v3339_v49  ;;  %3381 = vmatpush.bf16.msra.mxu1 %v3339_v49  ;;  %v7401_v7 = vld [vmem:[%s9620_s8 + $0xe8] sm:$0xff]  ;;  %v7400_v26 = vld [vmem:[%s9620_s8 + $0xe0] sm:$0xff]  ;;  %v7399_v3 = vld [vmem:[%s9620_s8 + $0xd8] sm:$0xff] }
 0x945   : > { %3537 = vmatpush.bf16.msra.mxu0 %v3339_v49  ;;  %3516 = vmatpush.bf16.msra.mxu3 %v7376_v38  ;;  %v7372_v18 = vld [vmem:[%s9620_s8 + $0x8] sm:$0xff]  ;;  %v7371_v6 = vld [vmem:[%s9620_s8] sm:$0xff]  ;;  %v7398_v21 = vld [vmem:[%s9620_s8 + $0xd0] sm:$0xff] }
 0x946   : > { %v7397_v48 = vld [vmem:[%s9620_s8 + $0xc8] sm:$0xff]  ;;  %v7396_v12 = vld [vmem:[%s9620_s8 + $0xc0] sm:$0xff]  ;;  %v7419_v35 = vld [vmem:[%s9620_s8 + $0x178] sm:$0xff] }
 0x947   : > { %6339 = vmatmul.msk.bf16.vlgmr.msra.gmra.mxu2 %vm3330_vm2, %v9004_v27  ;;  %6340 = vmatmul.msk.bf16.vlgmr.msra.gmra.mxu1 %vm3330_vm2, %v9006_v28  ;;  %v6622_v29 = vld [vmem:[%s9034_s4 + $0x8] sm:$0xf]  ;;  %v7418_v17 = vld [vmem:[%s9620_s8 + $0x170] sm:$0xff]  ;;  %v7411_v11 = vld [vmem:[%s9620_s8 + $0x138] sm:$0xff] }
 0x948   : > { %3453 = vmatpush.bf16.msrb.mxu2 %v7386_v47  ;;  %3609 = vmatpush.bf16.msrb.mxu1 %v7394_v53  ;;  %v9148_v34 = vand.u32 %v6622_v29, %v9029_v42  ;;  %v7417_v10 = vld [vmem:[%s9620_s8 + $0x168] sm:$0xff]  ;;  %v7416_v13 = vld [vmem:[%s9620_s8 + $0x160] sm:$0xff]  ;;  %v7410_v46 = vld [vmem:[%s9620_s8 + $0x130] sm:$0xff] }
 0x949   : > { %3637 = vmatpush.bf16.msrb.mxu0 %v9043_v50  ;;  %3517 = vmatpush.bf16.msra.mxu3 %v7375_v60  ;;  %v7415_v36 = vld [vmem:[%s9620_s8 + $0x158] sm:$0xff]  ;;  %v7409_v47 = vld [vmem:[%s9620_s8 + $0x128] sm:$0xff]  ;;  %v7414_v49 = vld [vmem:[%s9620_s8 + $0x150] sm:$0xff] }
 0x94a   : > { %6421 = vmatmul.msk.bf16.vlgmr.msra.gmra.mxu0 %vm3330_vm2, %v9008_v32  ;;  %v7428_v55 = vld [vmem:[%s9620_s8 + $0x1b8] sm:$0xff]  ;;  %v7408_v53 = vld [vmem:[%s9620_s8 + $0x120] sm:$0xff]  ;;  %v7413_v37 = vld [vmem:[%s9620_s8 + $0x148] sm:$0xff] }
 0x94b   : > { %v7412_v38 = vld [vmem:[%s9620_s8 + $0x140] sm:$0xff]  ;;  %v7424_v60 = vld [vmem:[%s9620_s8 + $0x198] sm:$0xff] }
 0x94c   : > { %3454 = vmatpush.bf16.msrb.mxu2 %v7385_v56  ;;  %3610 = vmatpush.bf16.msrb.mxu1 %v7393_v54  ;;  %v7426_v56 = vld [vmem:[%s9620_s8 + $0x1a8] sm:$0xff]  ;;  %v7407_v54 = vld [vmem:[%s9620_s8 + $0x118] sm:$0xff] }
 0x94d   : > { %3518 = vmatpush.bf16.msra.mxu3 %v7374_v2  ;;  %3802 = vmatpush.bf16.msra.mxu0 %v7411_v11  ;;  %v7404_v2 = vld [vmem:[%s9620_s8 + $0x100] sm:$0xff]  ;;  %v7430_v11 = vld [vmem:[%s9620_s8 + $0x1c8] sm:$0xff] }
 0x950   : > { %3455 = vmatpush.bf16.msrb.mxu2 %v7384_v59  ;;  %3611 = vmatpush.bf16.msrb.mxu1 %v7392_v43  ;;  %v7425_v59 = vld [vmem:[%s9620_s8 + $0x1a0] sm:$0xff]  ;;  %v7406_v43 = vld [vmem:[%s9620_s8 + $0x110] sm:$0xff] }
 0x951   : > { %3519 = vmatpush.bf16.msra.mxu3 %v7373_v61  ;;  %3803 = vmatpush.bf16.msra.mxu0 %v7410_v46 }
 0x954   : > { %3456 = vmatpush.bf16.msrb.mxu2 %v7383_v44  ;;  %3612 = vmatpush.bf16.msrb.mxu1 %v7391_v62  ;;  %v7405_v44 = vld [vmem:[%s9620_s8 + $0x108] sm:$0xff]  ;;  %v7423_v62 = vld [vmem:[%s9620_s8 + $0x190] sm:$0xff] }
 0x955   : > { %3520 = vmatpush.bf16.msra.mxu3 %v7372_v18  ;;  %3804 = vmatpush.bf16.msra.mxu0 %v7409_v47 }
 0x958   : > { %3457 = vmatpush.bf16.msrb.mxu2 %v7382_v14  ;;  %3613 = vmatpush.bf16.msrb.mxu1 %v7390_v8  ;;  %v7422_v14 = vld [vmem:[%s9620_s8 + $0x188] sm:$0xff]  ;;  %v7421_v8 = vld [vmem:[%s9620_s8 + $0x180] sm:$0xff] }
 0x959   : > { %3521 = vmatpush.bf16.msra.mxu3 %v7371_v6  ;;  %3805 = vmatpush.bf16.msra.mxu0 %v7408_v53 }
 0x95a   : > { %6473 = vmatmul.msk.bf16.vlgmr.msrb.gmra.mxu0 %vm3330_vm2, %v9004_v27 }
 0x95c   : > { %3458 = vmatpush.bf16.msrb.mxu2 %v7381_v19  ;;  %3614 = vmatpush.bf16.msrb.mxu1 %v7389_v20 }
 0x95d   : > { %3730 = vmatpush.bf16.msrb.mxu3 %v9043_v50  ;;  %3806 = vmatpush.bf16.msra.mxu0 %v7407_v54 }
 0x960   : > { %3459 = vmatpush.bf16.msrb.mxu2 %v7380_v22  ;;  %3615 = vmatpush.bf16.msrb.mxu1 %v7388_v1 }
 0x961   : > { %3807 = vmatpush.bf16.msra.mxu0 %v7406_v43 }
 0x964   : > { %3460 = vmatpush.bf16.msrb.mxu2 %v7379_v5  ;;  %3616 = vmatpush.bf16.msrb.mxu1 %v7387_v25  ;;  %v7435_v25 = vld [vmem:[%s9620_s8 + $0x1f0] sm:$0xff] }
 0x965   : > { %3808 = vmatpush.bf16.msra.mxu0 %v7405_v44 }
 0x968   : > { %3709 = vmatpush.bf16.msra.mxu2 %v7403_v24  ;;  %3823 = vmatpush.bf16.msra.mxu1 %v9043_v50  ;;  %v7427_v50 = vld [vmem:[%s9620_s8 + $0x1b0] sm:$0xff] }
 0x969   : > { %3809 = vmatpush.bf16.msra.mxu0 %v7404_v2 }
 0x96c   : > { %3710 = vmatpush.bf16.msra.mxu2 %v7402_v51  ;;  %v7436_v51 = vld [vmem:[%s9620_s8 + $0x1f8] sm:$0xff] }
 0x96d   : > { %4016 = vmatpush.bf16.msrb.mxu0 %v9148_v34 }
 0x970   : > { %3711 = vmatpush.bf16.msra.mxu2 %v7401_v7 }
 0x974   : > { %3712 = vmatpush.bf16.msra.mxu2 %v7400_v26 }
 0x978   : > { %3713 = vmatpush.bf16.msra.mxu2 %v7399_v3 }
 0x97c   : > { %3714 = vmatpush.bf16.msra.mxu2 %v7398_v21 }
 0x980   : > { %3715 = vmatpush.bf16.msra.mxu2 %v7397_v48 }
 0x984   : > { %3716 = vmatpush.bf16.msra.mxu2 %v7396_v12  ;;  %v7444_v12 = vld [vmem:[%s9620_s8 + $0x238] sm:$0xff] }
 0x9c4   : > { %v3383_v30 = vpop.f32.mrf.mxu1 }
 0x9c5   : > { %v3387_v31 = vpack.c.bf16 %v3383_v30, %v3383_v30 }
 0x9c7   : > { %v3539_v33 = vpop.f32.mrf.mxu0  ;;  %3461 = vmatmul.bf16.vlgmr.msrb.gmra.mxu2 %v3387_v31 }
 0x9c8   : > { %v3543_v52 = vpack.c.bf16 %v3539_v33, %v3539_v33  ;;  %3995 = vmatpush.bf16.msrb.mxu2 %v7428_v55  ;;  %v7443_v33 = vld [vmem:[%s9620_s8 + $0x230] sm:$0xff] }
 0x9ca   : > { %3617 = vmatmul.bf16.vlgmr.msrb.gmra.mxu1 %v3543_v52  ;;  %v3350_v23 = vpop.f32.mrf.mxu2 }
 0x9cb   : > { %3923 = vmatpush.bf16.msrb.mxu1 %v9148_v34  ;;  %v3354_v4 = vpack.c.bf16 %v3350_v23, %v3350_v23  ;;  %v7442_v23 = vld [vmem:[%s9620_s8 + $0x228] sm:$0xff] }
 0x9cc   : > { %v3385_v57 = vpop.f32.mrf.mxu1  ;;  %3996 = vmatpush.bf16.msrb.mxu2 %v7427_v50 }
 0x9cd   : > { %3522 = vmatmul.bf16.vlgmr.msra.gmra.mxu3 %v3354_v4  ;;  %v7441_v4 = vld [vmem:[%s9620_s8 + $0x220] sm:$0xff]  ;;  %v7434_v57 = vld [vmem:[%s9620_s8 + $0x1e8] sm:$0xff] }
 0x9ce   : > { %3895 = vmatpush.bf16.msra.mxu3 %v7419_v35 }
 0x9cf   : > { %v3541_v63 = vpop.f32.mrf.mxu0 }
 0x9d0   : > { %3997 = vmatpush.bf16.msrb.mxu2 %v7426_v56  ;;  %v7440_v63 = vld [vmem:[%s9620_s8 + $0x218] sm:$0xff] }
 0x9d2   : > { %v3352_v9 = vpop.f32.mrf.mxu2  ;;  %3896 = vmatpush.bf16.msra.mxu3 %v7418_v17  ;;  %v7433_v17 = vld [vmem:[%s9620_s8 + $0x1e0] sm:$0xff] }
 0x9d3   : > { %v7439_v9 = vld [vmem:[%s9620_s8 + $0x210] sm:$0xff] }
 0x9d4   : > { %3998 = vmatpush.bf16.msrb.mxu2 %v7425_v59 }
 0x9d6   : > { %3897 = vmatpush.bf16.msra.mxu3 %v7417_v10  ;;  %v7432_v10 = vld [vmem:[%s9620_s8 + $0x1d8] sm:$0xff] }
 0x9d7   : > { %v3639_v40 = vpop.f32.mrf.mxu0 }
 0x9d8   : > { %v3643_v41 = vpack.c.bf16 %v3639_v40, %v3639_v40  ;;  %3999 = vmatpush.bf16.msrb.mxu2 %v7424_v60  ;;  %v7438_v40 = vld [vmem:[%s9620_s8 + $0x208] sm:$0xff] }
 0x9da   : > { %3717 = vmatmul.bf16.vlgmr.msra.gmra.mxu2 %v3643_v41  ;;  %6571 = vmatmul.msk.bf16.vlgmr.msra.gmra.mxu1 %vm3330_vm2, %v9008_v32  ;;  %v7431_v41 = vld [vmem:[%s9620_s8 + $0x1d0] sm:$0xff] }
 0x9db   : > { %3898 = vmatpush.bf16.msra.mxu3 %v7416_v13  ;;  %4088 = vmatpush.bf16.msra.mxu1 %v7436_v51  ;;  %v7429_v13 = vld [vmem:[%s9620_s8 + $0x1c0] sm:$0xff] }
 0x9dc   : > { %4000 = vmatpush.bf16.msrb.mxu2 %v7423_v62 }
 0x9dd   : > { %6522 = vmatmul.msk.bf16.vlgmr.msrb.gmra.mxu3 %vm3330_vm2, %v9006_v28 }
 0x9df   : > { %v3641_v58 = vpop.f32.mrf.mxu0  ;;  %3899 = vmatpush.bf16.msra.mxu3 %v7415_v36  ;;  %4089 = vmatpush.bf16.msra.mxu1 %v7435_v25 }
 0x9e0   : > { %4001 = vmatpush.bf16.msrb.mxu2 %v7422_v14  ;;  %v7437_v58 = vld [vmem:[%s9620_s8 + $0x200] sm:$0xff] }
 0x9e3   : > { %3900 = vmatpush.bf16.msra.mxu3 %v7414_v49  ;;  %4090 = vmatpush.bf16.msra.mxu1 %v7434_v57 }
 0x9e4   : > { %4002 = vmatpush.bf16.msrb.mxu2 %v7421_v8  ;;  %v4195_v8 = vperm.slane %v8992_v39, 0 }
 0x9e7   : > { %3901 = vmatpush.bf16.msra.mxu3 %v7413_v37  ;;  %4091 = vmatpush.bf16.msra.mxu1 %v7433_v17 }
 0x9ea   : > { %6623 = vmatmul.msk.bf16.vlgmr.msrb.gmra.mxu1 %vm3330_vm2, %v9004_v27 }
 0x9eb   : > { %3902 = vmatpush.bf16.msra.mxu3 %v7412_v38  ;;  %4092 = vmatpush.bf16.msra.mxu1 %v7432_v10 }
 0x9ef   : > { %4109 = vmatpush.bf16.msrb.mxu3 %v9148_v34  ;;  %4093 = vmatpush.bf16.msra.mxu1 %v7431_v41 }
 0x9f3   : > { %4094 = vmatpush.bf16.msra.mxu1 %v7430_v11 }
 0x9f7   : > { %4095 = vmatpush.bf16.msra.mxu1 %v7429_v13 }
 0xa47   : > { %v3618_v61 = vpop.f32.mrf.mxu1 }
 0xa4a   : > { %v3462_v19 = vpop.f32.mrf.mxu2 }
 0xa4f   : > { %v3620_v20 = vpop.f32.mrf.mxu1 }
 0xa50   : > { %v3523_v22 = vpop.f32.mrf.mxu3 }
 0xa51   : > { %v3524_v1 = vadd.f32 %v3523_v22, %v3462_v19 }
 0xa52   : > { %v3464_v5 = vpop.f32.mrf.mxu2 }
 0xa53   : > { %v3622_v24 = vadd.f32 %v3618_v61, %v3524_v1 }
 0xa57   : > { %v3825_v7 = vpop.f32.mrf.mxu1 }
 0xa58   : > { %v3829_v26 = vpack.c.bf16 %v3825_v7, %v3825_v7  ;;  %v3525_v18 = vpop.f32.mrf.mxu3 }
 0xa5a   : > { %3903 = vmatmul.bf16.vlgmr.msra.gmra.mxu3 %v3829_v26 }
 0xa5d   : > { %v3718_v3 = vpop.f32.mrf.mxu2 }
 0xa5e   : > { %v3722_v6 = vadd.f32 %v3718_v3, %v3622_v24 }
 0xa5f   : > { %v3827_v21 = vpop.f32.mrf.mxu1 }
 0xa60   : > { %v3732_v48 = vpop.f32.mrf.mxu3 }
 0xa61   : > { %v3736_v29 = vpack.c.bf16 %v3732_v48, %v3732_v48 }
 0xa63   : > { %3810 = vmatmul.bf16.vlgmr.msra.gmra.mxu0 %v3736_v29 }
 0xa64   : > { %4181 = vmatpush.bf16.msra.mxu0 %v7444_v12 }
 0xa65   : > { %v3720_v30 = vpop.f32.mrf.mxu2 }
 0xa67   : > { %v3925_v31 = vpop.f32.mrf.mxu1 }
 0xa68   : > { %v3929_v34 = vpack.c.bf16 %v3925_v31, %v3925_v31  ;;  %v3734_v52 = vpop.f32.mrf.mxu3  ;;  %4182 = vmatpush.bf16.msra.mxu0 %v7443_v33 }
 0xa6a   : > { %4003 = vmatmul.bf16.vlgmr.msrb.gmra.mxu2 %v3929_v34  ;;  %6721 = vmatmul.msk.bf16.vlgmr.msrb.gmra.mxu3 %vm3330_vm2, %v9008_v32 }
 0xa6c   : > { %4183 = vmatpush.bf16.msra.mxu0 %v7442_v23 }
 0xa6f   : > { %v3927_v35 = vpop.f32.mrf.mxu1 }
 0xa70   : > { %4184 = vmatpush.bf16.msra.mxu0 %v7441_v4 }
 0xa73   : > { %6672 = vmatmul.msk.bf16.vlgmr.msrb.gmra.mxu0 %vm3330_vm2, %v9006_v28 }
 0xa74   : > { %4185 = vmatpush.bf16.msra.mxu0 %v7440_v63 }
 0xa78   : > { %4186 = vmatpush.bf16.msra.mxu0 %v7439_v9 }
 0xa7c   : > { %4187 = vmatpush.bf16.msra.mxu0 %v7438_v40 }
 0xa80   : > { %4188 = vmatpush.bf16.msra.mxu0 %v7437_v58 }
 0xadd   : > { %v3904_v46 = vpop.f32.mrf.mxu3 }
 0xae0   : > { %v3811_v36 = vpop.f32.mrf.mxu0 }
 0xae1   : > { %v3815_v55 = vadd.f32 %v3811_v36, %v3722_v6 }
 0xae3   : > { %v3908_v49 = vadd.f32 %v3904_v46, %v3815_v55 }
 0xae5   : > { %v3906_v47 = vpop.f32.mrf.mxu3 }
 0xae8   : > { %v3813_v50 = vpop.f32.mrf.mxu0 }
 0xaed   : > { %v4004_v53 = vpop.f32.mrf.mxu2  ;;  %v4111_v37 = vpop.f32.mrf.mxu3 }
 0xaee   : > { %v4008_v56 = vadd.f32 %v4004_v53, %v3908_v49  ;;  %v4115_v54 = vpack.c.bf16 %v4111_v37, %v4111_v37 }
 0xaf0   : > { %4189 = vmatmul.bf16.vlgmr.msra.gmra.mxu0 %v4115_v54  ;;  %v4018_v38 = vpop.f32.mrf.mxu0 }
 0xaf1   : > { %v4022_v59 = vpack.c.bf16 %v4018_v38, %v4018_v38 }
 0xaf3   : > { %4096 = vmatmul.bf16.vlgmr.msra.gmra.mxu1 %v4022_v59 }
 0xaf5   : > { %v4113_v43 = vpop.f32.mrf.mxu3  ;;  %v4006_v60 = vpop.f32.mrf.mxu2 }
 0xaf8   : > { %v4020_v44 = vpop.f32.mrf.mxu0 }
 0xb6d   : > { %v4190_v62 = vpop.f32.mrf.mxu0 }
 0xb70   : > { %v4097_v2 = vpop.f32.mrf.mxu1 }
 0xb71   : > { %v4101_v14 = vadd.f32 %v4097_v2, %v4008_v56 }
 0xb73   : > { %v4194_v61 = vadd.f32 %v4190_v62, %v4101_v14 }
 0xb75   : > { %v4192_v19 = vpop.f32.mrf.mxu0  ;;  %v4196_v20 = vadd.f32 %v4195_v8, %v4194_v61 }
 0xb77   : > { %v4198_v22 = vsel %vm53_vm0, %v4196_v20, 0.0  ;;  %v4206_v1 = vmul.f32 %v4196_v20, %v4196_v20  ;;  %4216 = vst [vmem:[%s4215_s23] sm:$0x3] %v4196_v20 }
 0xb78   : > { %v4199_v5 = vrot.slane %v4198_v22, 4  ;;  %v4099_v24 = vpop.f32.mrf.mxu1 }
 0xb79   : > { %v4207_v51 = vsel %vm53_vm0, %v4206_v1, 0.0 }
 0xb7a   : > { %v4200_v7 = vadd.f32 %v4199_v5, %v4198_v22  ;;  %v4208_v25 = vrot.slane %v4207_v51, 4 }
 0xb7c   : > { %v4201_v26 = vrot.slane %v4200_v7, 2  ;;  %v4209_v18 = vadd.f32 %v4208_v25, %v4207_v51 }
 0xb7e   : > { %v4202_v3 = vadd.f32 %v4201_v26, %v4200_v7  ;;  %v4210_v6 = vrot.slane %v4209_v18, 2 }
 0xb80   : > { %v4203_v21 = vrot.slane %v4202_v3, 1  ;;  %v4211_v48 = vadd.f32 %v4210_v6, %v4209_v18 }
 0xb82   : > { %v4204_v12 = vadd.f32 %v4203_v21, %v4202_v3  ;;  %v4212_v29 = vrot.slane %v4211_v48, 1 }
 0xb84   : > { %v4205_v30 = vadd.f32 %v7829_v16, %v4204_v12   ;;  %v4213_v31 = vadd.f32 %v4212_v29, %v4211_v48  ;;  %3322 = sbr.rel (!%p3320_p4) target bundleno = 2363 (0x93b), region = 232 }
 0xb86   : > { %v4214_v33 = vadd.f32 %v7825_v15, %v4213_v31   ;;  %v9638_v16 = vmov %v4205_v30 }
 0xb88   : > { %v9637_v15 = vmov %v4214_v33 }
 0xb89 LB: > { %s7445_s9 = sshll.u32 %s7845_s24, 3  ;;  %v7453_v15 = vld [vmem:[%s9620_s8 + $0x38] sm:$0xff]  ;;  %v7452_v57 = vld [vmem:[%s9620_s8 + $0x30] sm:$0xff]  ;;  %v7451_v9 = vld [vmem:[%s9620_s8 + $0x28] sm:$0xff]  ;;  %s7204_s11 = sshll.u32 %s7845_s24, 1  ;;  %s7845_s24 = sphi %s9305_s24, %s4222_s24   ;;  %v7841_v30 = vphi %v4205_v30, %v9640_v30   ;;  %v7837_v33 = vphi %v4214_v33, %v9639_v33  }
 0xb8a   : > { %s9320_s27 = scalar_lea.vmem [#allocation3], %s7445_s9  ;;  %v7461_v52 = vld [vmem:[%s9620_s8 + $0x78] sm:$0xff]  ;;  %4414 = vmatpush.bf16.msra.mxu3 %v7453_v15  ;;  %v7460_v63 = vld [vmem:[%s9620_s8 + $0x70] sm:$0xff]  ;;  %v7459_v10 = vld [vmem:[%s9620_s8 + $0x68] sm:$0xff]  ;;  %s5254_s13 = scalar_lea.vmem %s9622_s10, %s7204_s11 }
 0xb8b   : > { %v6772_v16 = vld [vmem:[%s9320_s27 + $0x18] sm:$0xf]  ;;  %v6906_v34 = vld [vmem:[%s9320_s27 + $0x1c] sm:$0xf]  ;;  %v7468_v17 = vld [vmem:[%s9620_s8 + $0xb0] sm:$0xff]  ;;  %s4222_s24 = sadd.s32 1, %s7845_s24  }
 0xb8c   : > { %v4239_v23 = vand.u32 %v6772_v16, %v9029_v42  ;;  %v9329_v35 = vand.u32 %v6906_v34, %v9029_v42  ;;  %v7469_v4 = vld [vmem:[%s9620_s8 + $0xb8] sm:$0xff]  ;;  %v7467_v40 = vld [vmem:[%s9620_s8 + $0xa8] sm:$0xff]  ;;  %v7450_v41 = vld [vmem:[%s9620_s8 + $0x20] sm:$0xff]  ;;  %p4219_p5 = scmp.ge.s32.totalorder %s4222_s24, 2  }
 0xb8d   : > { %v7458_v58 = vld [vmem:[%s9620_s8 + $0x60] sm:$0xff]  ;;  %v7449_v13 = vld [vmem:[%s9620_s8 + $0x18] sm:$0xff]  ;;  %v7448_v55 = vld [vmem:[%s9620_s8 + $0x10] sm:$0xff] }
 0xb8e   : > { %4248 = vmatpush.bf16.msra.mxu2 %v4239_v23  ;;  %4281 = vmatpush.bf16.msra.mxu1 %v4239_v23  ;;  %v7466_v11 = vld [vmem:[%s9620_s8 + $0xa0] sm:$0xff]  ;;  %v7457_v46 = vld [vmem:[%s9620_s8 + $0x58] sm:$0xff]  ;;  %v7456_v47 = vld [vmem:[%s9620_s8 + $0x50] sm:$0xff] }
 0xb8f   : > { %4437 = vmatpush.bf16.msra.mxu0 %v4239_v23  ;;  %4415 = vmatpush.bf16.msra.mxu3 %v7452_v57  ;;  %v7465_v36 = vld [vmem:[%s9620_s8 + $0x98] sm:$0xff]  ;;  %v7464_v49 = vld [vmem:[%s9620_s8 + $0x90] sm:$0xff]  ;;  %v7455_v50 = vld [vmem:[%s9620_s8 + $0x48] sm:$0xff] }
 0xb90   : > { %v7463_v53 = vld [vmem:[%s9620_s8 + $0x88] sm:$0xff]  ;;  %v7454_v37 = vld [vmem:[%s9620_s8 + $0x40] sm:$0xff]  ;;  %v7478_v56 = vld [vmem:[%s9620_s8 + $0xf8] sm:$0xff] }
 0xb91   : > { %6773 = vmatmul.msk.bf16.vlgmr.msra.gmra.mxu2 %vm3330_vm2, %v9004_v27  ;;  %6774 = vmatmul.msk.bf16.vlgmr.msra.gmra.mxu1 %vm3330_vm2, %v9006_v28  ;;  %v7477_v54 = vld [vmem:[%s9620_s8 + $0xf0] sm:$0xff]  ;;  %v7476_v38 = vld [vmem:[%s9620_s8 + $0xe8] sm:$0xff]  ;;  %v7462_v59 = vld [vmem:[%s9620_s8 + $0x80] sm:$0xff] }
 0xb92   : > { %4353 = vmatpush.bf16.msrb.mxu2 %v7461_v52  ;;  %4509 = vmatpush.bf16.msrb.mxu1 %v7469_v4  ;;  %v7475_v43 = vld [vmem:[%s9620_s8 + $0xe0] sm:$0xff]  ;;  %v7447_v60 = vld [vmem:[%s9620_s8 + $0x8] sm:$0xff]  ;;  %v7474_v44 = vld [vmem:[%s9620_s8 + $0xd8] sm:$0xff] }
 0xb93   : > { %4537 = vmatpush.bf16.msrb.mxu0 %v9329_v35  ;;  %4416 = vmatpush.bf16.msra.mxu3 %v7451_v9  ;;  %v7446_v62 = vld [vmem:[%s9620_s8] sm:$0xff]  ;;  %v7473_v2 = vld [vmem:[%s9620_s8 + $0xd0] sm:$0xff]  ;;  %v7472_v14 = vld [vmem:[%s9620_s8 + $0xc8] sm:$0xff] }
 0xb94   : > { %6855 = vmatmul.msk.bf16.vlgmr.msra.gmra.mxu0 %vm3330_vm2, %v9008_v32  ;;  %v7471_v61 = vld [vmem:[%s9620_s8 + $0xc0] sm:$0xff]  ;;  %v7494_v7 = vld [vmem:[%s9620_s8 + $0x178] sm:$0xff]  ;;  %v7493_v3 = vld [vmem:[%s9620_s8 + $0x170] sm:$0xff] }
 0xb95   : > { %v7056_v19 = vld [vmem:[%s9320_s27 + $0x20] sm:$0xf]  ;;  %v7492_v21 = vld [vmem:[%s9620_s8 + $0x168] sm:$0xff]  ;;  %v7486_v31 = vld [vmem:[%s9620_s8 + $0x138] sm:$0xff] }
 0xb96   : > { %4354 = vmatpush.bf16.msrb.mxu2 %v7460_v63  ;;  %4510 = vmatpush.bf16.msrb.mxu1 %v7468_v17  ;;  %v9434_v5 = vand.u32 %v7056_v19, %v9029_v42  ;;  %v7491_v15 = vld [vmem:[%s9620_s8 + $0x160] sm:$0xff]  ;;  %v7485_v16 = vld [vmem:[%s9620_s8 + $0x130] sm:$0xff]  ;;  %v7490_v34 = vld [vmem:[%s9620_s8 + $0x158] sm:$0xff] }
 0xb97   : > { %4417 = vmatpush.bf16.msra.mxu3 %v7450_v41  ;;  %4702 = vmatpush.bf16.msra.mxu0 %v7486_v31  ;;  %v7503_v52 = vld [vmem:[%s9620_s8 + $0x1b8] sm:$0xff]  ;;  %v7484_v23 = vld [vmem:[%s9620_s8 + $0x128] sm:$0xff]  ;;  %v7502_v4 = vld [vmem:[%s9620_s8 + $0x1b0] sm:$0xff] }
 0xb98   : > { %v7483_v57 = vld [vmem:[%s9620_s8 + $0x120] sm:$0xff]  ;;  %v7488_v63 = vld [vmem:[%s9620_s8 + $0x148] sm:$0xff]  ;;  %v7482_v9 = vld [vmem:[%s9620_s8 + $0x118] sm:$0xff] }
 0xb99   : > { %v7501_v17 = vld [vmem:[%s9620_s8 + $0x1a8] sm:$0xff]  ;;  %v7481_v41 = vld [vmem:[%s9620_s8 + $0x110] sm:$0xff]  ;;  %v7519_v19 = vld [vmem:[%s9620_s8 + $0x238] sm:$0xff] }
 0xb9a   : > { %4355 = vmatpush.bf16.msrb.mxu2 %v7459_v10  ;;  %4511 = vmatpush.bf16.msrb.mxu1 %v7467_v40  ;;  %v7487_v10 = vld [vmem:[%s9620_s8 + $0x140] sm:$0xff] }
 0xb9b   : > { %4418 = vmatpush.bf16.msra.mxu3 %v7449_v13  ;;  %4703 = vmatpush.bf16.msra.mxu0 %v7485_v16  ;;  %v7500_v40 = vld [vmem:[%s9620_s8 + $0x1a0] sm:$0xff]  ;;  %v7498_v13 = vld [vmem:[%s9620_s8 + $0x190] sm:$0xff] }
 0xb9c   : > { %v7512_v31 = vld [vmem:[%s9620_s8 + $0x200] sm:$0xff] }
 0xb9d   : > { %v7504_v16 = vld [vmem:[%s9620_s8 + $0x1c0] sm:$0xff] }
 0xb9e   : > { %4356 = vmatpush.bf16.msrb.mxu2 %v7458_v58  ;;  %4512 = vmatpush.bf16.msrb.mxu1 %v7466_v11  ;;  %v7499_v58 = vld [vmem:[%s9620_s8 + $0x198] sm:$0xff]  ;;  %v7480_v11 = vld [vmem:[%s9620_s8 + $0x108] sm:$0xff] }
 0xb9f   : > { %4419 = vmatpush.bf16.msra.mxu3 %v7448_v55  ;;  %4704 = vmatpush.bf16.msra.mxu0 %v7484_v23  ;;  %v7496_v55 = vld [vmem:[%s9620_s8 + $0x180] sm:$0xff] }
 0xba2   : > { %4357 = vmatpush.bf16.msrb.mxu2 %v7457_v46  ;;  %4513 = vmatpush.bf16.msrb.mxu1 %v7465_v36  ;;  %v7479_v46 = vld [vmem:[%s9620_s8 + $0x100] sm:$0xff]  ;;  %v7497_v36 = vld [vmem:[%s9620_s8 + $0x188] sm:$0xff] }
 0xba3   : > { %4420 = vmatpush.bf16.msra.mxu3 %v7447_v60  ;;  %4705 = vmatpush.bf16.msra.mxu0 %v7483_v57 }
 0xba4   : > { %6907 = vmatmul.msk.bf16.vlgmr.msrb.gmra.mxu0 %vm3330_vm2, %v9004_v27 }
 0xba6   : > { %4358 = vmatpush.bf16.msrb.mxu2 %v7456_v47  ;;  %4514 = vmatpush.bf16.msrb.mxu1 %v7464_v49 }
 0xba7   : > { %4421 = vmatpush.bf16.msra.mxu3 %v7446_v62  ;;  %4706 = vmatpush.bf16.msra.mxu0 %v7482_v9 }
 0xbaa   : > { %4359 = vmatpush.bf16.msrb.mxu2 %v7455_v50  ;;  %4515 = vmatpush.bf16.msrb.mxu1 %v7463_v53 }
 0xbab   : > { %4630 = vmatpush.bf16.msrb.mxu3 %v9329_v35  ;;  %4707 = vmatpush.bf16.msra.mxu0 %v7481_v41 }
 0xbae   : > { %4360 = vmatpush.bf16.msrb.mxu2 %v7454_v37  ;;  %4516 = vmatpush.bf16.msrb.mxu1 %v7462_v59 }
 0xbaf   : > { %4708 = vmatpush.bf16.msra.mxu0 %v7480_v11 }
 0xbb2   : > { %4609 = vmatpush.bf16.msra.mxu2 %v7478_v56  ;;  %4723 = vmatpush.bf16.msra.mxu1 %v9329_v35  ;;  %v7489_v35 = vld [vmem:[%s9620_s8 + $0x150] sm:$0xff] }
 0xbb3   : > { %4709 = vmatpush.bf16.msra.mxu0 %v7479_v46 }
 0xbb6   : > { %4610 = vmatpush.bf16.msra.mxu2 %v7477_v54 }
 0xbb7   : > { %4916 = vmatpush.bf16.msrb.mxu0 %v9434_v5 }
 0xbba   : > { %4611 = vmatpush.bf16.msra.mxu2 %v7476_v38  ;;  %v7511_v38 = vld [vmem:[%s9620_s8 + $0x1f8] sm:$0xff] }
 0xbbe   : > { %4612 = vmatpush.bf16.msra.mxu2 %v7475_v43  ;;  %v7510_v43 = vld [vmem:[%s9620_s8 + $0x1f0] sm:$0xff] }
 0xbc2   : > { %4613 = vmatpush.bf16.msra.mxu2 %v7474_v44 }
 0xbc6   : > { %4614 = vmatpush.bf16.msra.mxu2 %v7473_v2 }
 0xbca   : > { %4615 = vmatpush.bf16.msra.mxu2 %v7472_v14 }
 0xbce   : > { %4616 = vmatpush.bf16.msra.mxu2 %v7471_v61 }
 0xc0e   : > { %v4283_v20 = vpop.f32.mrf.mxu1 }
 0xc0f   : > { %v4287_v22 = vpack.c.bf16 %v4283_v20, %v4283_v20 }
 0xc11   : > { %v4439_v1 = vpop.f32.mrf.mxu0  ;;  %4361 = vmatmul.bf16.vlgmr.msrb.gmra.mxu2 %v4287_v22 }
 0xc12   : > { %v4443_v24 = vpack.c.bf16 %v4439_v1, %v4439_v1  ;;  %4895 = vmatpush.bf16.msrb.mxu2 %v7503_v52 }
 0xc14   : > { %4517 = vmatmul.bf16.vlgmr.msrb.gmra.mxu1 %v4443_v24  ;;  %v4250_v51 = vpop.f32.mrf.mxu2 }
 0xc15   : > { %4823 = vmatpush.bf16.msrb.mxu1 %v9434_v5  ;;  %v4254_v25 = vpack.c.bf16 %v4250_v51, %v4250_v51 }
 0xc16   : > { %v4285_v26 = vpop.f32.mrf.mxu1  ;;  %4896 = vmatpush.bf16.msrb.mxu2 %v7502_v4 }
 0xc17   : > { %4422 = vmatmul.bf16.vlgmr.msra.gmra.mxu3 %v4254_v25  ;;  %v7516_v26 = vld [vmem:[%s9620_s8 + $0x220] sm:$0xff] }
 0xc18   : > { %4795 = vmatpush.bf16.msra.mxu3 %v7494_v7  ;;  %v7517_v7 = vld [vmem:[%s9620_s8 + $0x228] sm:$0xff] }
 0xc19   : > { %v4441_v18 = vpop.f32.mrf.mxu0 }
 0xc1a   : > { %4897 = vmatpush.bf16.msrb.mxu2 %v7501_v17  ;;  %v7509_v18 = vld [vmem:[%s9620_s8 + $0x1e8] sm:$0xff] }
 0xc1c   : > { %v4252_v6 = vpop.f32.mrf.mxu2  ;;  %4796 = vmatpush.bf16.msra.mxu3 %v7493_v3  ;;  %v7515_v3 = vld [vmem:[%s9620_s8 + $0x218] sm:$0xff] }
 0xc1d   : > { %v7508_v6 = vld [vmem:[%s9620_s8 + $0x1e0] sm:$0xff] }
 0xc1e   : > { %4898 = vmatpush.bf16.msrb.mxu2 %v7500_v40 }
 0xc20   : > { %4797 = vmatpush.bf16.msra.mxu3 %v7492_v21  ;;  %v7514_v21 = vld [vmem:[%s9620_s8 + $0x210] sm:$0xff] }
 0xc21   : > { %v4539_v48 = vpop.f32.mrf.mxu0 }
 0xc22   : > { %v4543_v12 = vpack.c.bf16 %v4539_v48, %v4539_v48  ;;  %4899 = vmatpush.bf16.msrb.mxu2 %v7499_v58  ;;  %v7507_v48 = vld [vmem:[%s9620_s8 + $0x1d8] sm:$0xff] }
 0xc24   : > { %4617 = vmatmul.bf16.vlgmr.msra.gmra.mxu2 %v4543_v12  ;;  %7005 = vmatmul.msk.bf16.vlgmr.msra.gmra.mxu1 %vm3330_vm2, %v9008_v32  ;;  %v7513_v12 = vld [vmem:[%s9620_s8 + $0x208] sm:$0xff] }
 0xc25   : > { %4798 = vmatpush.bf16.msra.mxu3 %v7491_v15  ;;  %4988 = vmatpush.bf16.msra.mxu1 %v7511_v38  ;;  %v7505_v15 = vld [vmem:[%s9620_s8 + $0x1c8] sm:$0xff] }
 0xc26   : > { %4900 = vmatpush.bf16.msrb.mxu2 %v7498_v13 }
 0xc27   : > { %6956 = vmatmul.msk.bf16.vlgmr.msrb.gmra.mxu3 %vm3330_vm2, %v9006_v28 }
 0xc29   : > { %v4541_v29 = vpop.f32.mrf.mxu0  ;;  %4799 = vmatpush.bf16.msra.mxu3 %v7490_v34  ;;  %4989 = vmatpush.bf16.msra.mxu1 %v7510_v43 }
 0xc2a   : > { %4901 = vmatpush.bf16.msrb.mxu2 %v7497_v36  ;;  %v7506_v29 = vld [vmem:[%s9620_s8 + $0x1d0] sm:$0xff] }
 0xc2d   : > { %4800 = vmatpush.bf16.msra.mxu3 %v7489_v35  ;;  %4990 = vmatpush.bf16.msra.mxu1 %v7509_v18 }
 0xc2e   : > { %4902 = vmatpush.bf16.msrb.mxu2 %v7496_v55 }
 0xc31   : > { %4801 = vmatpush.bf16.msra.mxu3 %v7488_v63  ;;  %4991 = vmatpush.bf16.msra.mxu1 %v7508_v6 }
 0xc34   : > { %7057 = vmatmul.msk.bf16.vlgmr.msrb.gmra.mxu1 %vm3330_vm2, %v9004_v27 }
 0xc35   : > { %4802 = vmatpush.bf16.msra.mxu3 %v7487_v10  ;;  %4992 = vmatpush.bf16.msra.mxu1 %v7507_v48 }
 0xc39   : > { %5009 = vmatpush.bf16.msrb.mxu3 %v9434_v5  ;;  %v7518_v5 = vld [vmem:[%s9620_s8 + $0x230] sm:$0xff]  ;;  %4993 = vmatpush.bf16.msra.mxu1 %v7506_v29 }
 0xc3d   : > { %4994 = vmatpush.bf16.msra.mxu1 %v7505_v15 }
 0xc41   : > { %4995 = vmatpush.bf16.msra.mxu1 %v7504_v16 }
 0xc91   : > { %v4518_v47 = vpop.f32.mrf.mxu1 }
 0xc94   : > { %v4362_v49 = vpop.f32.mrf.mxu2 }
 0xc99   : > { %v4520_v50 = vpop.f32.mrf.mxu1 }
 0xc9a   : > { %v4423_v53 = vpop.f32.mrf.mxu3 }
 0xc9b   : > { %v4424_v37 = vadd.f32 %v4423_v53, %v4362_v49 }
 0xc9c   : > { %v4364_v56 = vpop.f32.mrf.mxu2 }
 0xc9d   : > { %v4522_v54 = vadd.f32 %v4518_v47, %v4424_v37 }
 0xca1   : > { %v4725_v59 = vpop.f32.mrf.mxu1 }
 0xca2   : > { %v4729_v60 = vpack.c.bf16 %v4725_v59, %v4725_v59  ;;  %v4425_v44 = vpop.f32.mrf.mxu3 }
 0xca4   : > { %4803 = vmatmul.bf16.vlgmr.msra.gmra.mxu3 %v4729_v60 }
 0xca7   : > { %v4618_v62 = vpop.f32.mrf.mxu2 }
 0xca8   : > { %v4622_v2 = vadd.f32 %v4618_v62, %v4522_v54 }
 0xca9   : > { %v4727_v14 = vpop.f32.mrf.mxu1 }
 0xcaa   : > { %v4632_v61 = vpop.f32.mrf.mxu3 }
 0xcab   : > { %v4636_v20 = vpack.c.bf16 %v4632_v61, %v4632_v61 }
 0xcad   : > { %4710 = vmatmul.bf16.vlgmr.msra.gmra.mxu0 %v4636_v20 }
 0xcae   : > { %5081 = vmatpush.bf16.msra.mxu0 %v7519_v19 }
 0xcaf   : > { %v4620_v22 = vpop.f32.mrf.mxu2 }
 0xcb1   : > { %v4825_v1 = vpop.f32.mrf.mxu1 }
 0xcb2   : > { %v4829_v24 = vpack.c.bf16 %v4825_v1, %v4825_v1  ;;  %v4634_v51 = vpop.f32.mrf.mxu3  ;;  %5082 = vmatpush.bf16.msra.mxu0 %v7518_v5 }
 0xcb4   : > { %4903 = vmatmul.bf16.vlgmr.msrb.gmra.mxu2 %v4829_v24  ;;  %7155 = vmatmul.msk.bf16.vlgmr.msrb.gmra.mxu3 %vm3330_vm2, %v9008_v32 }
 0xcb6   : > { %5083 = vmatpush.bf16.msra.mxu0 %v7517_v7 }
 0xcb9   : > { %v4827_v25 = vpop.f32.mrf.mxu1 }
 0xcba   : > { %5084 = vmatpush.bf16.msra.mxu0 %v7516_v26 }
 0xcbd   : > { %7106 = vmatmul.msk.bf16.vlgmr.msrb.gmra.mxu0 %vm3330_vm2, %v9006_v28 }
 0xcbe   : > { %5085 = vmatpush.bf16.msra.mxu0 %v7515_v3 }
 0xcc2   : > { %5086 = vmatpush.bf16.msra.mxu0 %v7514_v21 }
 0xcc6   : > { %5087 = vmatpush.bf16.msra.mxu0 %v7513_v12 }
 0xcca   : > { %5088 = vmatpush.bf16.msra.mxu0 %v7512_v31 }
 0xd27   : > { %v4804_v34 = vpop.f32.mrf.mxu3 }
 0xd2a   : > { %v4711_v52 = vpop.f32.mrf.mxu0 }
 0xd2b   : > { %v4715_v23 = vadd.f32 %v4711_v52, %v4622_v2 }
 0xd2d   : > { %v4808_v4 = vadd.f32 %v4804_v34, %v4715_v23 }
 0xd2f   : > { %v4806_v35 = vpop.f32.mrf.mxu3 }
 0xd32   : > { %v4713_v57 = vpop.f32.mrf.mxu0 }
 0xd37   : > { %v4904_v63 = vpop.f32.mrf.mxu2  ;;  %v5011_v17 = vpop.f32.mrf.mxu3 }
 0xd38   : > { %v4908_v9 = vadd.f32 %v4904_v63, %v4808_v4  ;;  %v5015_v10 = vpack.c.bf16 %v5011_v17, %v5011_v17 }
 0xd3a   : > { %5089 = vmatmul.bf16.vlgmr.msra.gmra.mxu0 %v5015_v10  ;;  %v4918_v40 = vpop.f32.mrf.mxu0 }
 0xd3b   : > { %v4922_v41 = vpack.c.bf16 %v4918_v40, %v4918_v40 }
 0xd3d   : > { %4996 = vmatmul.bf16.vlgmr.msra.gmra.mxu1 %v4922_v41 }
 0xd3f   : > { %v5013_v58 = vpop.f32.mrf.mxu3  ;;  %v4906_v11 = vpop.f32.mrf.mxu2 }
 0xd42   : > { %v4920_v13 = vpop.f32.mrf.mxu0 }
 0xdb7   : > { %v5090_v46 = vpop.f32.mrf.mxu0 }
 0xdba   : > { %v4997_v36 = vpop.f32.mrf.mxu1 }
 0xdbb   : > { %v5001_v55 = vadd.f32 %v4997_v36, %v4908_v9 }
 0xdbd   : > { %v5094_v47 = vadd.f32 %v5090_v46, %v5001_v55 }
 0xdbf   : > { %v5092_v49 = vpop.f32.mrf.mxu0  ;;  %v5096_v50 = vadd.f32 %v5094_v47, %v4195_v8 }
 0xdc1   : > { %v5098_v53 = vsel %vm53_vm0, %v5096_v50, 0.0  ;;  %v5106_v37 = vmul.f32 %v5096_v50, %v5096_v50  ;;  %7205 = vst [vmem:[%s5254_s13 + $0x4] sm:$0x3] %v5096_v50 }
 0xdc2   : > { %v5099_v56 = vrot.slane %v5098_v53, 4  ;;  %v4999_v54 = vpop.f32.mrf.mxu1 }
 0xdc3   : > { %v5107_v38 = vsel %vm53_vm0, %v5106_v37, 0.0 }
 0xdc4   : > { %v5100_v59 = vadd.f32 %v5099_v56, %v5098_v53  ;;  %v5108_v43 = vrot.slane %v5107_v38, 4 }
 0xdc6   : > { %v5101_v60 = vrot.slane %v5100_v59, 2  ;;  %v5109_v44 = vadd.f32 %v5108_v43, %v5107_v38 }
 0xdc8   : > { %v5102_v62 = vadd.f32 %v5101_v60, %v5100_v59  ;;  %v5110_v2 = vrot.slane %v5109_v44, 2  ;;  %v5138_v39 = vld [vmem:[%s9622_s10] sm:$0x3] (%p4219_p5)  ;;  %v5139_v27 = vld [vmem:[%s9622_s10 + $0x2] sm:$0x3] (%p4219_p5) }
 0xdc9   :  { %v5140_v28 = vld [vmem:[%s9622_s10 + $0x4] sm:$0x3] (%p4219_p5)  ;;  %v5141_v8 = vld [vmem:[%s9622_s10 + $0x6] sm:$0x3] (%p4219_p5) }
 0xdca   : > { %v5103_v14 = vrot.slane %v5102_v62, 1  ;;  %v5111_v61 = vadd.f32 %v5110_v2, %v5109_v44 }
 0xdcc   : > { %v5104_v19 = vadd.f32 %v5103_v14, %v5102_v62  ;;  %v5112_v20 = vrot.slane %v5111_v61, 1 }
 0xdce   : > { %v5105_v22 = vadd.f32 %v7841_v30, %v5104_v19   ;;  %v5113_v1 = vadd.f32 %v5112_v20, %v5111_v61  ;;  %4221 = sbr.rel (!%p4219_p5) target bundleno = 2953 (0xb89), region = 243 }
 0xdd0   : > { %v5114_v5 = vadd.f32 %v7837_v33, %v5113_v1   ;;  %v9640_v30 = vmov %v5105_v22  ;;  %v5119_v24 = vmul.f32 (%p4219_p5), 0.125, %v5105_v22 }
 0xdd2   : > { %v9639_v33 = vmov %v5114_v5  ;;  %v5120_v51 = vmul.f32 (%p4219_p5), 0.125, %v5114_v5  ;;  %v5121_v7 = vmul.f32 (%p4219_p5), %v5119_v24, %v5119_v24 }
 0xdd4   :  { %v5122_v25 = vsub.f32 %v5120_v51, %v5121_v7 }
 0xdd6   :  { %v5123_v26 = vmax.f32 %v5122_v25, 0.0 }
 0xdd8   :  { %v5124_v18 = vadd.f32 1e-05, %v5123_v26 }
 0xdda   :  { %7675 = vrsqrt.f32 %v5124_v18  ;;  %vm5131_vm3 = vweird.f32 %v5124_v18 }
 0xde0   :  { %v7676_v30 = vpop.eup %7675 }
 0xde1   :  { %v5126_v3 = vmul.f32 %v7676_v30, %v5124_v18  ;;  %vm5132_vm4 = vweird.f32 %v7676_v30 }
 0xde2   :  { %vm5133_vm5 = vmor %vm5131_vm3, %vm5132_vm4 }
 0xde3   :  { %v5127_v6 = vmul.f32 %v7676_v30, %v5126_v3 }
 0xde5   :  { %v5128_v21 = vmul.f32 0.5, %v5127_v6 }
 0xde7   :  { %v5129_v48 = vsub.f32 1.5, %v5128_v21 }
 0xde9   :  { %v5130_v12 = vmul.f32 %v7676_v30, %v5129_v48 }
 0xdeb   :  { %v5134_v29 = vsel %vm5133_vm5, %v7676_v30, %v5130_v12 }
 0xdec   :  { %v5135_v31 = vmul.f32 %v5134_v29, %v8997_v0 }
 0xdee   :  { %v5136_v32 = vmul.f32 %v5135_v31, %v5119_v24  ;;  %v5142_v42 = vperm.slane %v5135_v31, 0 }
 0xdf0   :  { %v5137_v0 = vsub.f32 %v9002_v45, %v5136_v32  ;;  %v5143_v33 = vmul.f32 %v5142_v42, %v5138_v39  ;;  %v5144_v15 = vmul.f32 %v5142_v42, %v5139_v27  ;;  %v5145_v16 = vmul.f32 %v5142_v42, %v5140_v28 }
 0xdf1   :  { %v5146_v34 = vmul.f32 %v5142_v42, %v5141_v8 }
 0xdf2   :  { %v5147_v52 = vperm.slane %v5137_v0, 0 }
 0xdf4   :  { %v5148_v23 = vadd.f32 %v5147_v52, %v5143_v33  ;;  %v5149_v35 = vadd.f32 %v5147_v52, %v5144_v15  ;;  %v5150_v4 = vadd.f32 %v5147_v52, %v5145_v16  ;;  %v5151_v57 = vadd.f32 %v5147_v52, %v5146_v34 }
 0xdf6   :  { %vm5152_vm0 = vcmp.gt.f32.partialorder %v5148_v23, 0.0  ;;  %v5156_v63 = vmul.f32 0.01, %v5148_v23  ;;  %vm5153_vm6 = vcmp.gt.f32.partialorder %v5149_v35, 0.0  ;;  %v5157_v17 = vmul.f32 0.01, %v5149_v35 }
 0xdf7   :  { %vm5154_vm7 = vcmp.gt.f32.partialorder %v5150_v4, 0.0  ;;  %v5158_v9 = vmul.f32 0.01, %v5150_v4  ;;  %vm5155_vm8 = vcmp.gt.f32.partialorder %v5151_v57, 0.0  ;;  %v5159_v10 = vmul.f32 0.01, %v5151_v57 }
 0xdf8   :  { %v5160_v40 = vsel %vm5152_vm0, %v5148_v23, %v5156_v63  ;;  %v5161_v41 = vsel %vm5153_vm6, %v5149_v35, %v5157_v17 }
 0xdf9   :  { %5164 = vst [vmem:[%s9622_s10] sm:$0x3] %v5160_v40  ;;  %v5162_v45 = vsel %vm5154_vm7, %v5150_v4, %v5158_v9  ;;  %v5163_v58 = vsel %vm5155_vm8, %v5151_v57, %v5159_v10 }
 0xdfa   :  { %5165 = vst [vmem:[%s9622_s10 + $0x2] sm:$0x3] %v5161_v41 }
 0xdfb   :  { %5166 = vst [vmem:[%s9622_s10 + $0x4] sm:$0x3] %v5162_v45 }
 0xdfc   :  { %5167 = vst [vmem:[%s9622_s10 + $0x6] sm:$0x3] %v5163_v58 }
 0xdfd   :  { %5172 = vsyncpa [#allocation5], 1 }

</bundles_post_ra>
